<compile_context>
chip_gen: v7x
topology: tpu7x:2x2x1
jax: 0.10.0
libtpu: 0.0.40
codegen_flags: <defaults>
</compile_context>

<pallas_src>
import functools

import jax
import jax.numpy as jnp
from jax.experimental import pallas as pl
from jax.experimental.pallas import tpu as pltpu


def _upsample_block_kernel(x_ref, w_ref, b_ref, a_ref, o_ref, xpad_ref, patch_ref):
    """One (batch, H-tile) grid step of 3x3 conv + bias + PReLU + PixelShuffle.

    x_ref     : (H, W, Cin)        bf16  full NHWC image (resident across h steps)
    w_ref     : (9*Cin, Cout)      bf16  im2col weight, columns in (i, j, c) order
    b_ref     : (1, Cout)          f32   bias, (i, j, c) order
    a_ref     : (1, Cout)          f32   PReLU slope alpha[c], (i, j, c) order
    o_ref     : (TH, r, W, r*Cin)  out   already pixel-shuffled output tile
    xpad_ref  : (TH+2, W+2, Cin)   bf16  scratch: zero-padded input tile (+halo)
    patch_ref : (TH*W, 9*Cin)      bf16  scratch: im2col patches
    """
    H, W, Cin = x_ref.shape
    TH, r, _, rcin = o_ref.shape

    h = pl.program_id(1)
    row0 = pl.multiple_of(h * TH, TH)

    # ---- padded input tile (padding=1) built in VMEM: zero only the border. --
    zcol = jnp.zeros((TH + 2, 1, Cin), dtype=xpad_ref.dtype)
    xpad_ref[:, 0:1, :] = zcol                    # left border column
    xpad_ref[:, W + 1:W + 2, :] = zcol            # right border column
    # Interior rows of this tile straight from the resident full-image block.
    xpad_ref[1:TH + 1, 1:W + 1, :] = x_ref[pl.ds(row0, TH), :, :]
    # 1-row halos (zeros at the image top/bottom border).
    top = x_ref[pl.ds(jnp.maximum(row0 - 1, 0), 1), :, :]
    xpad_ref[0:1, 1:W + 1, :] = jnp.where(h == 0, jnp.zeros_like(top), top)
    bot = x_ref[pl.ds(jnp.minimum(row0 + TH, H - 1), 1), :, :]
    xpad_ref[TH + 1:TH + 2, 1:W + 1, :] = jnp.where(
        h == pl.num_programs(1) - 1, jnp.zeros_like(bot), bot)

    # ---- im2col: 9 shifted taps -> one fat K = 9*Cin MXU matmul (bf16). ------
    xp = xpad_ref[...]
    for ky in range(3):
        for kx in range(3):
            t = ky * 3 + kx
            patch_ref[:, t * Cin:(t + 1) * Cin] = (
                xp[ky:ky + TH, kx:kx + W, :].reshape(TH * W, Cin))

    acc = jnp.dot(patch_ref[...], w_ref[...],
                  preferred_element_type=jnp.float32)          # (TH*W, Cout) f32

    # ---- fused bias + PReLU + PixelShuffle store, one row-phase at a time. ---
    # Columns are ordered (i, j, c): lane block i of width r*Cin, viewed as
    # (TH, W, r*Cin), is exactly row-phase i of the upscaled image.
    for i in range(r):
        lo, hi = i * rcin, (i + 1) * rcin
        yi = acc[:, lo:hi] + b_ref[:, lo:hi]
        yi = jnp.where(yi > 0, yi, yi * a_ref[:, lo:hi])       # PReLU, f32
        o_ref[:, i, :, :] = yi.reshape(TH, W, rcin).astype(o_ref.dtype)


def _pick_h_tile(H):
    """Largest power-of-two row tile (<= 64) that divides H; fall back to H."""
    for th in (64, 32, 16, 8):
        if H % th == 0:
            return th
    return H


def prepare_upsample_params(weight_oihw, bias, alpha, scale_factor):
    """One-time reshuffle of PyTorch Conv2d/PReLU params into kernel layout.

    In a real model call this once (outside the per-step jit) and feed the
    results to upsample_block_nhwc directly.
    """
    Cout, Cin, kh, kw = weight_oihw.shape
    r = scale_factor
    assert (kh, kw) == (3, 3) and Cout == Cin * r * r

    # OIHW -> im2col (9*Cin, Cout), with the Cout axis permuted from PyTorch's
    # (c, i, j) order (o = c*r^2 + i*r + j) to (i, j, c) so the kernel can emit
    # an already pixel-shuffled tile.
    w = jnp.transpose(weight_oihw, (2, 3, 1, 0))       # (ky, kx, cin, o)
    w = w.reshape(3, 3, Cin, Cin, r, r)                # split o -> (c, i, j)
    w = jnp.transpose(w, (0, 1, 2, 4, 5, 3))           # (ky, kx, cin, i, j, c)
    w = w.reshape(9 * Cin, Cout).astype(jnp.bfloat16)

    # Bias and PReLU slope in the same (i, j, c) column order.  (PReLU acts
    # post-shuffle on channel c only, so applying it pre-shuffle with alpha[c]
    # broadcast over (i, j) is exact.)
    b2 = jnp.transpose(bias.astype(jnp.float32).reshape(Cin, r, r),
                       (1, 2, 0)).reshape(1, Cout)
    a2 = jnp.tile(alpha.astype(jnp.float32), r * r).reshape(1, Cout)
    return w, b2, a2


@functools.partial(jax.jit,
                   static_argnames=("scale_factor", "out_dtype", "h_tile"))
def upsample_block_nhwc(x_nhwc, w_im2col, b2, a2, *, scale_factor,
                        out_dtype=jnp.float32, h_tile=None):
    """act(pixel_shuffle(conv2d(x))) on an NHWC image; returns NHWC.

    x_nhwc   : (N, H, W, Cin)        float (cast to bf16 for the MXU)
    w_im2col : (9*Cin, Cin*r^2)      bf16  from prepare_upsample_params
    b2, a2   : (1, Cin*r^2)          f32   from prepare_upsample_params
    returns  : (N, H*r, W*r, Cin)    out_dtype (use bf16 on mem-bound v5e/v6e
                                     when the consumer accepts it)
    """
    N, H, W, Cin = x_nhwc.shape
    r = scale_factor
    Cout = Cin * r * r
    rcin = r * Cin
    assert w_im2col.shape == (9 * Cin, Cout)

    x = x_nhwc.astype(jnp.bfloat16)
    TH = _pick_h_tile(H) if h_tile is None else h_tile
    assert H % TH == 0
    nh = H // TH

    out_isize = jnp.dtype(out_dtype).itemsize
    flops = 2 * N * H * W * (9 * Cin) * Cout
    bytes_accessed = (x.size * 2 + w_im2col.size * 2 + (b2.size + a2.size) * 4
                      + N * H * r * W * rcin * out_isize)

    # VMEM budget: double-buffered input/output blocks + constant operands +
    # bf16 scratch + the f32 matmul accumulator, with 2x headroom.
    vmem_est = (2 * H * W * Cin * 2                       # x block (bf16, x2)
                + 2 * TH * r * W * rcin * out_isize       # out block (x2)
                + 2 * (w_im2col.size * 2 + (b2.size + a2.size) * 4)
                + (TH + 2) * (W + 2) * Cin * 2            # xpad scratch (bf16)
                + TH * W * 9 * Cin * 2                    # patch scratch (bf16)
                + TH * W * Cout * 4)                      # f32 accumulator
    vmem_limit = int(min(max(2 * vmem_est, 32 * 1024 * 1024),
                         96 * 1024 * 1024))

    out = pl.pallas_call(
        _upsample_block_kernel,
        out_shape=jax.ShapeDtypeStruct((N, H, r, W, rcin), out_dtype),
        grid=(N, nh),
        in_specs=[
            # Full image per batch element; constant over the h axis, so it is
            # DMA'd once per batch element and stays resident across h steps.
            pl.BlockSpec((None, H, W, Cin), lambda n, h: (n, 0, 0, 0)),
            # Constant operands (weight / bias / PReLU slope).
            pl.BlockSpec((9 * Cin, Cout), lambda n, h: (0, 0)),
            pl.BlockSpec((1, Cout), lambda n, h: (0, 0)),
            pl.BlockSpec((1, Cout), lambda n, h: (0, 0)),
        ],
        out_specs=pl.BlockSpec((None, TH, r, W, rcin),
                               lambda n, h: (n, h, 0, 0, 0)),
        scratch_shapes=[
            pltpu.VMEM((TH + 2, W + 2, Cin), jnp.bfloat16),
            pltpu.VMEM((TH * W, 9 * Cin), jnp.bfloat16),
        ],
        compiler_params=pltpu.CompilerParams(
            dimension_semantics=("parallel", "parallel"),
            vmem_limit_bytes=vmem_limit),
        cost_estimate=pl.CostEstimate(flops=flops, transcendentals=0,
                                      bytes_accessed=bytes_accessed),
    )(x, w_im2col, b2, a2)

    # (N, H, r, W, r*Cin) is the shuffled NHWC image stored contiguously, so
    # this reshape is free (no HBM copy) -- unlike a post-hoc pixel shuffle.
    return out.reshape(N, H * r, W * r, Cin)


@functools.partial(jax.jit, static_argnames=("scale_factor",))
def upsample_block(x_nchw, weight_oihw, bias, alpha, *, scale_factor):
    """PyTorch-parity interface: NCHW in / NCHW out, f32.

    NOTE: the NCHW<->NHWC transposes below are full extra HBM passes; in an
    NHWC end-to-end model call prepare_upsample_params once and use
    upsample_block_nhwc directly.
    """
    w, b2, a2 = prepare_upsample_params(weight_oihw, bias, alpha, scale_factor)
    x = jnp.transpose(x_nchw, (0, 2, 3, 1))
    y = upsample_block_nhwc(x, w, b2, a2, scale_factor=scale_factor)
    return jnp.transpose(y, (0, 3, 1, 2))


def _reference(x_nchw, weight_oihw, bias, alpha, r):
    """Independent pure-JAX reference written directly from the PyTorch ops:
    NCHW conv -> torch-documented PixelShuffle -> post-shuffle per-channel
    PReLU.  Uses the same bf16 operands / f32 accumulation as the kernel."""
    N, Cin, H, W = x_nchw.shape
    conv = jax.lax.conv_general_dilated(
        x_nchw.astype(jnp.bfloat16), weight_oihw.astype(jnp.bfloat16),
        window_strides=(1, 1), padding=((1, 1), (1, 1)),
        dimension_numbers=("NCHW", "OIHW", "NCHW"),
        preferred_element_type=jnp.float32)
    conv = conv + bias.astype(jnp.float32).reshape(1, -1, 1, 1)
    # torch.nn.PixelShuffle: (N, C*r^2, H, W) -> (N, C, H*r, W*r)
    y = conv.reshape(N, Cin, r, r, H, W)
    y = jnp.transpose(y, (0, 1, 4, 2, 5, 3)).reshape(N, Cin, H * r, W * r)
    a = alpha.astype(jnp.float32).reshape(1, Cin, 1, 1)
    return jnp.where(y > 0, y, y * a)


if __name__ == "__main__":
    key = jax.random.PRNGKey(0)
    k_x, k_w, k_b, k_a = jax.random.split(key, 4)

    N, Cin, H, W = 2, 4, 16, 16
    r = 2
    Cout = Cin * r * r

    x = jax.random.normal(k_x, (N, Cin, H, W), dtype=jnp.float32)
    weight = jax.random.normal(k_w, (Cout, Cin, 3, 3), dtype=jnp.float32) * 0.1
    bias = jax.random.normal(k_b, (Cout,), dtype=jnp.float32) * 0.1
    # PReLU default init is 0.25; perturb so the per-channel slope matters.
    alpha = 0.25 + 0.1 * jax.random.normal(k_a, (Cin,), dtype=jnp.float32)

    ref = _reference(x, weight, bias, alpha, r)

    # 1) PyTorch-parity NCHW interface (single H tile at this size).
    out = upsample_block(x, weight, bias, alpha, scale_factor=r)
    out = jax.block_until_ready(out)
    assert out.shape == (N, Cin, H * r, W * r)
    err = float(jnp.max(jnp.abs(out - ref)))
    assert err < 2e-3, f"NCHW path mismatch vs reference: max abs err = {err}"

    # 2) Exercise the H-tiled path (nh=2, 1-row halos) through the NHWC entry.
    w_k, b_k, a_k = prepare_upsample_params(weight, bias, alpha, r)
    x_nhwc = jnp.transpose(x, (0, 2, 3, 1))
    out2 = upsample_block_nhwc(x_nhwc, w_k, b_k, a_k, scale_factor=r, h_tile=8)
    out2 = jax.block_until_ready(out2)
    out2 = jnp.transpose(out2, (0, 3, 1, 2))
    err2 = float(jnp.max(jnp.abs(out2 - ref)))
    assert err2 < 2e-3, f"H-tiled path mismatch vs reference: max abs err = {err2}"

    print("KERNEL_OK")
</pallas_src>

<mosaic_0001>
module attributes {stable_mosaic.version = 11 : i64} {
  func.func @_upsample_block_kernel(%arg0: i32, %arg1: i32, %arg2: memref<1x16x16x4xbf16, #tpu.memory_space<vmem>>, %arg3: memref<36x16xbf16, #tpu.memory_space<vmem>>, %arg4: memref<1x16xf32, #tpu.memory_space<vmem>>, %arg5: memref<1x16xf32, #tpu.memory_space<vmem>>, %arg6: memref<1x16x2x16x8xf32, #tpu.memory_space<vmem>>, %arg7: memref<18x18x4xbf16, #tpu.memory_space<vmem>>, %arg8: memref<256x36xbf16, #tpu.memory_space<vmem>>) attributes {dimension_semantics = [#tpu.dimension_semantics<parallel>, #tpu.dimension_semantics<parallel>], iteration_bounds = array<i64: 2, 1>, scalar_prefetch = 0 : i64, scratch_operands = 2 : i64, tpu.core_type = #tpu.core_type<tc>, window_params = [{transform_indices = @transform_0, window_bounds = array<i64: 1, 16, 16, 4>}, {pipeline_mode = #tpu.pipeline_mode<synchronous>, transform_indices = @transform_1, window_bounds = array<i64: 36, 16>}, {pipeline_mode = #tpu.pipeline_mode<synchronous>, transform_indices = @transform_2, window_bounds = array<i64: 1, 16>}, {pipeline_mode = #tpu.pipeline_mode<synchronous>, transform_indices = @transform_3, window_bounds = array<i64: 1, 16>}, {transform_indices = @transform_4, window_bounds = array<i64: 1, 16, 2, 16, 8>}]} {
    %c16_i32 = arith.constant 16 : i32
    %0 = arith.muli %arg1, %c16_i32 : i32
    %1 = tpu.assume_multiple %0, 16 : i32
    %cst = arith.constant 0.000000e+00 : bf16
    %2 = vector.broadcast %cst : bf16 to vector<18x1x4xbf16>
    %c0 = arith.constant 0 : index
    %c0_0 = arith.constant 0 : index
    %c0_1 = arith.constant 0 : index
    %3 = vector.load %arg7[%c0, %c0_0, %c0_1] : memref<18x18x4xbf16, #tpu.memory_space<vmem>>, vector<18x1x4xbf16>
    tpu.vector_store %arg7[%c0, %c0_0, %c0_1], %2 {strides = array<i32>} : memref<18x18x4xbf16, #tpu.memory_space<vmem>>, vector<18x1x4xbf16>,
    %c0_2 = arith.constant 0 : index
    %c17 = arith.constant 17 : index
    %c0_3 = arith.constant 0 : index
    %4 = vector.load %arg7[%c0_2, %c17, %c0_3] : memref<18x18x4xbf16, #tpu.memory_space<vmem>>, vector<18x1x4xbf16>
    tpu.vector_store %arg7[%c0_2, %c17, %c0_3], %2 {strides = array<i32>} : memref<18x18x4xbf16, #tpu.memory_space<vmem>>, vector<18x1x4xbf16>,
    %c0_4 = arith.constant 0 : index
    %5 = arith.index_cast %1 : i32 to index
    %c0_5 = arith.constant 0 : index
    %c0_6 = arith.constant 0 : index
    %6 = vector.load %arg2[%c0_4, %5, %c0_5, %c0_6] : memref<1x16x16x4xbf16, #tpu.memory_space<vmem>>, vector<1x16x16x4xbf16>
    %7 = vector.shape_cast %6 : vector<1x16x16x4xbf16> to vector<16x16x4xbf16>
    %c1 = arith.constant 1 : index
    %c1_7 = arith.constant 1 : index
    %c0_8 = arith.constant 0 : index
    %8 = vector.load %arg7[%c1, %c1_7, %c0_8] : memref<18x18x4xbf16, #tpu.memory_space<vmem>>, vector<16x16x4xbf16>
    tpu.vector_store %arg7[%c1, %c1_7, %c0_8], %7 {strides = array<i32>} : memref<18x18x4xbf16, #tpu.memory_space<vmem>>, vector<16x16x4xbf16>,
    %c1_i32 = arith.constant 1 : i32
    %9 = arith.subi %1, %c1_i32 : i32
    %c0_i32 = arith.constant 0 : i32
    %10 = arith.maxsi %9, %c0_i32 : i32
    %c0_9 = arith.constant 0 : index
    %11 = arith.index_cast %10 : i32 to index
    %c0_10 = arith.constant 0 : index
    %c0_11 = arith.constant 0 : index
    %12 = vector.load %arg2[%c0_9, %11, %c0_10, %c0_11] : memref<1x16x16x4xbf16, #tpu.memory_space<vmem>>, vector<1x1x16x4xbf16>
    %13 = vector.shape_cast %12 : vector<1x1x16x4xbf16> to vector<1x16x4xbf16>
    %c0_i32_12 = arith.constant 0 : i32
    %14 = arith.cmpi eq, %arg1, %c0_i32_12 : i32
    %cst_13 = arith.constant 0.000000e+00 : bf16
    %15 = vector.broadcast %cst_13 : bf16 to vector<1x16x4xbf16>
    %16 = arith.select %14, %15, %13 : vector<1x16x4xbf16>
    %c0_14 = arith.constant 0 : index
    %c1_15 = arith.constant 1 : index
    %c0_16 = arith.constant 0 : index
    %17 = vector.load %arg7[%c0_14, %c1_15, %c0_16] : memref<18x18x4xbf16, #tpu.memory_space<vmem>>, vector<1x16x4xbf16>
    tpu.vector_store %arg7[%c0_14, %c1_15, %c0_16], %16 {strides = array<i32>} : memref<18x18x4xbf16, #tpu.memory_space<vmem>>, vector<1x16x4xbf16>,
    %c16_i32_17 = arith.constant 16 : i32
    %18 = arith.addi %1, %c16_i32_17 : i32
    %c15_i32 = arith.constant 15 : i32
    %19 = arith.minsi %18, %c15_i32 : i32
    %c0_18 = arith.constant 0 : index
    %20 = arith.index_cast %19 : i32 to index
    %c0_19 = arith.constant 0 : index
    %c0_20 = arith.constant 0 : index
    %21 = vector.load %arg2[%c0_18, %20, %c0_19, %c0_20] : memref<1x16x16x4xbf16, #tpu.memory_space<vmem>>, vector<1x1x16x4xbf16>
    %22 = vector.shape_cast %21 : vector<1x1x16x4xbf16> to vector<1x16x4xbf16>
    %c0_i32_21 = arith.constant 0 : i32
    %23 = arith.cmpi eq, %arg1, %c0_i32_21 : i32
    %cst_22 = arith.constant 0.000000e+00 : bf16
    %24 = vector.broadcast %cst_22 : bf16 to vector<1x16x4xbf16>
    %25 = arith.select %23, %24, %22 : vector<1x16x4xbf16>
    %c17_23 = arith.constant 17 : index
    %c1_24 = arith.constant 1 : index
    %c0_25 = arith.constant 0 : index
    %26 = vector.load %arg7[%c17_23, %c1_24, %c0_25] : memref<18x18x4xbf16, #tpu.memory_space<vmem>>, vector<1x16x4xbf16>
    tpu.vector_store %arg7[%c17_23, %c1_24, %c0_25], %25 {strides = array<i32>} : memref<18x18x4xbf16, #tpu.memory_space<vmem>>, vector<1x16x4xbf16>,
    %c0_26 = arith.constant 0 : index
    %c0_27 = arith.constant 0 : index
    %c0_28 = arith.constant 0 : index
    %27 = vector.load %arg7[%c0_26, %c0_27, %c0_28] : memref<18x18x4xbf16, #tpu.memory_space<vmem>>, vector<18x18x4xbf16>
    %28 = vector.extract_strided_slice %27 {offsets = [0, 0, 0], sizes = [16, 16, 4], strides = [1, 1, 1]} : vector<18x18x4xbf16> to vector<16x16x4xbf16>
    %29 = vector.shape_cast %28 : vector<16x16x4xbf16> to vector<256x4xbf16>
    %c0_29 = arith.constant 0 : index
    %c0_30 = arith.constant 0 : index
    %30 = vector.load %arg8[%c0_29, %c0_30] : memref<256x36xbf16, #tpu.memory_space<vmem>>, vector<256x4xbf16>
    tpu.vector_store %arg8[%c0_29, %c0_30], %29 {strides = array<i32>} : memref<256x36xbf16, #tpu.memory_space<vmem>>, vector<256x4xbf16>,
    %31 = vector.extract_strided_slice %27 {offsets = [0, 1, 0], sizes = [16, 16, 4], strides = [1, 1, 1]} : vector<18x18x4xbf16> to vector<16x16x4xbf16>
    %32 = vector.shape_cast %31 : vector<16x16x4xbf16> to vector<256x4xbf16>
    %c0_31 = arith.constant 0 : index
    %c4 = arith.constant 4 : index
    %33 = vector.load %arg8[%c0_31, %c4] : memref<256x36xbf16, #tpu.memory_space<vmem>>, vector<256x4xbf16>
    tpu.vector_store %arg8[%c0_31, %c4], %32 {strides = array<i32>} : memref<256x36xbf16, #tpu.memory_space<vmem>>, vector<256x4xbf16>,
    %34 = vector.extract_strided_slice %27 {offsets = [0, 2, 0], sizes = [16, 16, 4], strides = [1, 1, 1]} : vector<18x18x4xbf16> to vector<16x16x4xbf16>
    %35 = vector.shape_cast %34 : vector<16x16x4xbf16> to vector<256x4xbf16>
    %c0_32 = arith.constant 0 : index
    %c8 = arith.constant 8 : index
    %36 = vector.load %arg8[%c0_32, %c8] : memref<256x36xbf16, #tpu.memory_space<vmem>>, vector<256x4xbf16>
    tpu.vector_store %arg8[%c0_32, %c8], %35 {strides = array<i32>} : memref<256x36xbf16, #tpu.memory_space<vmem>>, vector<256x4xbf16>,
    %37 = vector.extract_strided_slice %27 {offsets = [1, 0, 0], sizes = [16, 16, 4], strides = [1, 1, 1]} : vector<18x18x4xbf16> to vector<16x16x4xbf16>
    %38 = vector.shape_cast %37 : vector<16x16x4xbf16> to vector<256x4xbf16>
    %c0_33 = arith.constant 0 : index
    %c12 = arith.constant 12 : index
    %39 = vector.load %arg8[%c0_33, %c12] : memref<256x36xbf16, #tpu.memory_space<vmem>>, vector<256x4xbf16>
    tpu.vector_store %arg8[%c0_33, %c12], %38 {strides = array<i32>} : memref<256x36xbf16, #tpu.memory_space<vmem>>, vector<256x4xbf16>,
    %40 = vector.extract_strided_slice %27 {offsets = [1, 1, 0], sizes = [16, 16, 4], strides = [1, 1, 1]} : vector<18x18x4xbf16> to vector<16x16x4xbf16>
    %41 = vector.shape_cast %40 : vector<16x16x4xbf16> to vector<256x4xbf16>
    %c0_34 = arith.constant 0 : index
    %c16 = arith.constant 16 : index
    %42 = vector.load %arg8[%c0_34, %c16] : memref<256x36xbf16, #tpu.memory_space<vmem>>, vector<256x4xbf16>
    tpu.vector_store %arg8[%c0_34, %c16], %41 {strides = array<i32>} : memref<256x36xbf16, #tpu.memory_space<vmem>>, vector<256x4xbf16>,
    %43 = vector.extract_strided_slice %27 {offsets = [1, 2, 0], sizes = [16, 16, 4], strides = [1, 1, 1]} : vector<18x18x4xbf16> to vector<16x16x4xbf16>
    %44 = vector.shape_cast %43 : vector<16x16x4xbf16> to vector<256x4xbf16>
    %c0_35 = arith.constant 0 : index
    %c20 = arith.constant 20 : index
    %45 = vector.load %arg8[%c0_35, %c20] : memref<256x36xbf16, #tpu.memory_space<vmem>>, vector<256x4xbf16>
    tpu.vector_store %arg8[%c0_35, %c20], %44 {strides = array<i32>} : memref<256x36xbf16, #tpu.memory_space<vmem>>, vector<256x4xbf16>,
    %46 = vector.extract_strided_slice %27 {offsets = [2, 0, 0], sizes = [16, 16, 4], strides = [1, 1, 1]} : vector<18x18x4xbf16> to vector<16x16x4xbf16>
    %47 = vector.shape_cast %46 : vector<16x16x4xbf16> to vector<256x4xbf16>
    %c0_36 = arith.constant 0 : index
    %c24 = arith.constant 24 : index
    %48 = vector.load %arg8[%c0_36, %c24] : memref<256x36xbf16, #tpu.memory_space<vmem>>, vector<256x4xbf16>
    tpu.vector_store %arg8[%c0_36, %c24], %47 {strides = array<i32>} : memref<256x36xbf16, #tpu.memory_space<vmem>>, vector<256x4xbf16>,
    %49 = vector.extract_strided_slice %27 {offsets = [2, 1, 0], sizes = [16, 16, 4], strides = [1, 1, 1]} : vector<18x18x4xbf16> to vector<16x16x4xbf16>
    %50 = vector.shape_cast %49 : vector<16x16x4xbf16> to vector<256x4xbf16>
    %c0_37 = arith.constant 0 : index
    %c28 = arith.constant 28 : index
    %51 = vector.load %arg8[%c0_37, %c28] : memref<256x36xbf16, #tpu.memory_space<vmem>>, vector<256x4xbf16>
    tpu.vector_store %arg8[%c0_37, %c28], %50 {strides = array<i32>} : memref<256x36xbf16, #tpu.memory_space<vmem>>, vector<256x4xbf16>,
    %52 = vector.extract_strided_slice %27 {offsets = [2, 2, 0], sizes = [16, 16, 4], strides = [1, 1, 1]} : vector<18x18x4xbf16> to vector<16x16x4xbf16>
    %53 = vector.shape_cast %52 : vector<16x16x4xbf16> to vector<256x4xbf16>
    %c0_38 = arith.constant 0 : index
    %c32 = arith.constant 32 : index
    %54 = vector.load %arg8[%c0_38, %c32] : memref<256x36xbf16, #tpu.memory_space<vmem>>, vector<256x4xbf16>
    tpu.vector_store %arg8[%c0_38, %c32], %53 {strides = array<i32>} : memref<256x36xbf16, #tpu.memory_space<vmem>>, vector<256x4xbf16>,
    %c0_39 = arith.constant 0 : index
    %c0_40 = arith.constant 0 : index
    %55 = vector.load %arg8[%c0_39, %c0_40] : memref<256x36xbf16, #tpu.memory_space<vmem>>, vector<256x36xbf16>
    %c0_41 = arith.constant 0 : index
    %c0_42 = arith.constant 0 : index
    %56 = vector.load %arg3[%c0_41, %c0_42] : memref<36x16xbf16, #tpu.memory_space<vmem>>, vector<36x16xbf16>
    %cst_43 = arith.constant dense<0.000000e+00> : vector<256x16xf32>
    %57 = tpu.matmul %55, %56, %cst_43 {dimension_numbers = #tpu.dot_dimension_numbers<[1], [0], [0], [1], [0, 0, 1, 1], [], []>} : vector<256x36xbf16>, vector<36x16xbf16>, vector<256x16xf32> -> vector<256x16xf32>
    %58 = vector.extract_strided_slice %57 {offsets = [0, 0], sizes = [256, 8], strides = [1, 1]} : vector<256x16xf32> to vector<256x8xf32>
    %c0_44 = arith.constant 0 : index
    %c0_45 = arith.constant 0 : index
    %59 = vector.load %arg4[%c0_44, %c0_45] : memref<1x16xf32, #tpu.memory_space<vmem>>, vector<1x8xf32>
    %60 = vector.broadcast %59 : vector<1x8xf32> to vector<256x8xf32>
    %61 = arith.addf %58, %60 : vector<256x8xf32>
    %cst_46 = arith.constant 0.000000e+00 : f32
    %62 = vector.broadcast %cst_46 : f32 to vector<256x8xf32>
    %63 = arith.cmpf ogt, %61, %62 : vector<256x8xf32>
    %c0_47 = arith.constant 0 : index
    %c0_48 = arith.constant 0 : index
    %64 = vector.load %arg5[%c0_47, %c0_48] : memref<1x16xf32, #tpu.memory_space<vmem>>, vector<1x8xf32>
    %65 = vector.broadcast %64 : vector<1x8xf32> to vector<256x8xf32>
    %66 = arith.mulf %61, %65 : vector<256x8xf32>
    %67 = arith.select %63, %61, %66 : vector<256x8xi1>, vector<256x8xf32>
    %68 = vector.shape_cast %67 : vector<256x8xf32> to vector<16x16x8xf32>
    %c0_49 = arith.constant 0 : index
    %c0_50 = arith.constant 0 : index
    %c0_51 = arith.constant 0 : index
    %c0_52 = arith.constant 0 : index
    %c0_53 = arith.constant 0 : index
    %69 = vector.load %arg6[%c0_49, %c0_50, %c0_51, %c0_52, %c0_53] : memref<1x16x2x16x8xf32, #tpu.memory_space<vmem>>, vector<1x16x1x16x8xf32>
    %70 = vector.shape_cast %69 : vector<1x16x1x16x8xf32> to vector<16x16x8xf32>
    %71 = vector.shape_cast %68 : vector<16x16x8xf32> to vector<1x16x1x16x8xf32>
    tpu.vector_store %arg6[%c0_49, %c0_50, %c0_51, %c0_52, %c0_53], %71 {strides = array<i32>} : memref<1x16x2x16x8xf32, #tpu.memory_space<vmem>>, vector<1x16x1x16x8xf32>,
    %72 = vector.extract_strided_slice %57 {offsets = [0, 8], sizes = [256, 8], strides = [1, 1]} : vector<256x16xf32> to vector<256x8xf32>
    %c0_54 = arith.constant 0 : index
    %c8_55 = arith.constant 8 : index
    %73 = vector.load %arg4[%c0_54, %c8_55] : memref<1x16xf32, #tpu.memory_space<vmem>>, vector<1x8xf32>
    %74 = vector.broadcast %73 : vector<1x8xf32> to vector<256x8xf32>
    %75 = arith.addf %72, %74 : vector<256x8xf32>
    %cst_56 = arith.constant 0.000000e+00 : f32
    %76 = vector.broadcast %cst_56 : f32 to vector<256x8xf32>
    %77 = arith.cmpf ogt, %75, %76 : vector<256x8xf32>
    %c0_57 = arith.constant 0 : index
    %c8_58 = arith.constant 8 : index
    %78 = vector.load %arg5[%c0_57, %c8_58] : memref<1x16xf32, #tpu.memory_space<vmem>>, vector<1x8xf32>
    %79 = vector.broadcast %78 : vector<1x8xf32> to vector<256x8xf32>
    %80 = arith.mulf %75, %79 : vector<256x8xf32>
    %81 = arith.select %77, %75, %80 : vector<256x8xi1>, vector<256x8xf32>
    %82 = vector.shape_cast %81 : vector<256x8xf32> to vector<16x16x8xf32>
    %c0_59 = arith.constant 0 : index
    %c0_60 = arith.constant 0 : index
    %c1_61 = arith.constant 1 : index
    %c0_62 = arith.constant 0 : index
    %c0_63 = arith.constant 0 : index
    %83 = vector.load %arg6[%c0_59, %c0_60, %c1_61, %c0_62, %c0_63] : memref<1x16x2x16x8xf32, #tpu.memory_space<vmem>>, vector<1x16x1x16x8xf32>
    %84 = vector.shape_cast %83 : vector<1x16x1x16x8xf32> to vector<16x16x8xf32>
    %85 = vector.shape_cast %82 : vector<16x16x8xf32> to vector<1x16x1x16x8xf32>
    tpu.vector_store %arg6[%c0_59, %c0_60, %c1_61, %c0_62, %c0_63], %85 {strides = array<i32>} : memref<1x16x2x16x8xf32, #tpu.memory_space<vmem>>, vector<1x16x1x16x8xf32>,
    return
  }
  func.func @transform_0(%arg0: i32, %arg1: i32) -> (i32, i32, i32, i32) {
    %c0_i32 = arith.constant 0 : i32
    %c0_i32_0 = arith.constant 0 : i32
    %c0_i32_1 = arith.constant 0 : i32
    %c0_i32_2 = arith.constant 0 : i32
    return %arg0, %c0_i32, %c0_i32_0, %c0_i32_1 : i32, i32, i32, i32
  }
  func.func @transform_1(%arg0: i32, %arg1: i32) -> (i32, i32) {
    %c0_i32 = arith.constant 0 : i32
    %c0_i32_0 = arith.constant 0 : i32
    %c0_i32_1 = arith.constant 0 : i32
    return %c0_i32, %c0_i32_0 : i32, i32
  }
  func.func @transform_2(%arg0: i32, %arg1: i32) -> (i32, i32) {
    %c0_i32 = arith.constant 0 : i32
    %c0_i32_0 = arith.constant 0 : i32
    %c0_i32_1 = arith.constant 0 : i32
    return %c0_i32, %c0_i32_0 : i32, i32
  }
  func.func @transform_3(%arg0: i32, %arg1: i32) -> (i32, i32) {
    %c0_i32 = arith.constant 0 : i32
    %c0_i32_0 = arith.constant 0 : i32
    %c0_i32_1 = arith.constant 0 : i32
    return %c0_i32, %c0_i32_0 : i32, i32
  }
  func.func @transform_4(%arg0: i32, %arg1: i32) -> (i32, i32, i32, i32, i32) {
    %c0_i32 = arith.constant 0 : i32
    %c0_i32_0 = arith.constant 0 : i32
    %c0_i32_1 = arith.constant 0 : i32
    %c0_i32_2 = arith.constant 0 : i32
    return %arg0, %arg1, %c0_i32, %c0_i32_0, %c0_i32_1 : i32, i32, i32, i32, i32
  }
}

</mosaic_0001>

<bundles_post_ra>
// kernel: upsample_block_nhwc.1
= control target key start
LH: loop header
LB: loop body
LE: loop exit
PB: predicated region body
PF: predicated region fallthrough
CT: control target
= control target key end

     0   :  { %s3417_s15 = smov 0   ;;  %s3419_s16 = smov 0   ;;  %s5080_s0 = inlined_call_operand.vmem [shape: bf16[2,16,16,4], index: 0, kind: input, shape index: {}]   ;;  %s5081_s1 = inlined_call_operand.vmem [shape: bf16[36,16], index: 1, kind: input, shape index: {}]   ;;  %s5082_s2 = inlined_call_operand.vmem [shape: f32[1,16], index: 2, kind: input, shape index: {}]   ;;  %s5083_s3 = inlined_call_operand.vmem [shape: f32[1,16], index: 3, kind: input, shape index: {}]   ;;  %s5084_s4 = inlined_call_operand.vmem [shape: f32[2,16,2,16,8], index: 4, kind: output, shape index: {}]  }
   0x1   :  { %s3421_s17 = smov 0  }
   0x2 LB: > { %s26_s18 = sadd.s32 1, %s3376_s16  ;;  %p3102_p0 = scmp.ge.s32.totalorder %s3380_s17, 1  ;;  %s3380_s17 = sphi %s3421_s17, %s14_s17   ;;  %s3376_s16 = sphi %s3419_s16, %s5115_s16   ;;  %s3372_s15 = sphi %s3417_s15, %s5114_s15  }
   0x3   : > { %p28_p1 = scmp.ge.s32.totalorder %s26_s18, 2  ;;  %p176_p2 = scmp.lt.s32.totalorder %s3380_s17, 3 }
   0x5   : > { %s5117_s18 = smov (%p28_p1, %s26_s18), 0  ;;  %p177_p3 = pnand %p3102_p0, %p176_p2 }
   0x7   : > { %180 = sbr.rel (%p177_p3) target bundleno = 785 (0x311), region = 36 }
   0xe   : > { %p207_p4 = scmp.lt.s32.totalorder %s3372_s15, 1  ;;  %vm225_vm0 = vcmask 24576   ;;  %vm226_vm1 = vsmask.f32 256  ;;  %v255_v0 = vld [vmem:[#allocation2 + $0x6c] sm:$0x1] }
   0xf   : > { %vm3437_vm2 = vmand %vm225_vm0, %vm226_vm1  ;;  %v231_v3 = vld [vmem:[#allocation2 + $0xc] sm:$0x1]  ;;  %v258_v5 = vld [vmem:[#allocation2 + $0x78] sm:$0x1]  ;;  %vm282_vm3 = vsmask.f32 7938 }
  0x10   : > { %s5119_s15 = smov (!%p207_p4, %s3372_s15), 1  ;;  %v256_v2 = vsel %vm3437_vm2, 0, %v255_v0  ;;  %v232_v4 = vsel %vm3437_vm2, 0, %v231_v3  ;;  %v234_v6 = vld [vmem:[#allocation2 + $0x18] sm:$0x1]  ;;  %v259_v7 = vsel %vm3437_vm2, 0, %v258_v5  ;;  %vm3486_vm8 = vmand %vm225_vm0, %vm282_vm3 }
  0x11   : > { %257 = vst [vmem:[#allocation2 + $0x6c] sm:$0x1] %v256_v2  ;;  %s3238_s19 = sshll.u32 %s5119_s15, 7  ;;  %233 = vst [vmem:[#allocation2 + $0xc] sm:$0x1] %v232_v4  ;;  %v235_v8 = vsel %vm3437_vm2, 0, %v234_v6 }
  0x12   : > { %v252_v9 = vld [vmem:[#allocation2 + $0x60] sm:$0x1]  ;;  %s3455_s22 = scalar_lea.vmem %s5080_s0, %s3238_s19  ;;  %vm373_vm4 = vsmask.f32 4368  ;;  %vm696_vm5 = vcmask 27648   ;;  %vm1040_vm9 = vcmask 31744  }
  0x13   : > { %260 = vst [vmem:[#allocation2 + $0x78] sm:$0x1] %v259_v7  ;;  %236 = vst [vmem:[#allocation2 + $0x18] sm:$0x1] %v235_v8  ;;  %v253_v10 = vsel %vm3437_vm2, 0, %v252_v9  ;;  %vm1573_vm10 = vcmask 1042432  }
  0x14   : > { %v357_v11 = vld [vmem:[%s3455_s22 + $0x40] sm:$0xf]  ;;  %v358_v12 = vld [vmem:[%s3455_s22 + $0x44] sm:$0xf]  ;;  %254 = vst [vmem:[#allocation2 + $0x60] sm:$0x1] %v253_v10  ;;  %vm3466_vm6 = vmor %vm226_vm1, %vm373_vm4 }
  0x15   : > { %v341_v13 = vld [vmem:[%s3455_s22] sm:$0xf]  ;;  %v512_v14 = vshrl.u32 %v357_v11, 16  ;;  %v515_v15 = vshll.u32 %v357_v11, 16  ;;  %v520_v16 = vshrl.u32 %v358_v12, 16  ;;  %v523_v17 = vshll.u32 %v358_v12, 16  ;;  %vm3475_vm7 = vmand %vm696_vm5, %vm282_vm3 }
  0x16   : > { %v342_v18 = vld [vmem:[%s3455_s22 + $0x4] sm:$0xf]  ;;  %v376_v19 = vshrl.u32 %v341_v13, 16  ;;  %v379_v20 = vshll.u32 %v341_v13, 16  ;;  %v359_v23 = vld [vmem:[%s3455_s22 + $0x48] sm:$0xf] }
  0x17   : > { %v384_v21 = vshrl.u32 %v342_v18, 16  ;;  %v387_v22 = vshll.u32 %v342_v18, 16  ;;  %v514_v25 = vrot.slane %v512_v14, 7  ;;  %v3470_v26 = vrot.slane %v520_v16, 7  ;;  %v360_v27 = vld [vmem:[%s3455_s22 + $0x4c] sm:$0xf] }
  0x18   : > { %v529_v28 = vshrl.u32 %v359_v23, 16  ;;  %v755_v30 = vld [vmem:[#allocation2 + $0x6c] sm:$0xf]  ;;  %v378_v31 = vrot.slane %v376_v19, 7  ;;  %v532_v33 = vshll.u32 %v359_v23, 16  ;;  %v537_v34 = vshrl.u32 %v360_v27, 16 }
  0x19   : > { %v3479_v32 = vrot.slane %v384_v21, 7  ;;  %v517_v35 = vor.u32 %v515_v15, %v514_v25  ;;  %v518_v36 = vrot.slane %v514_v25, 4  ;;  %v525_v37 = vor.u32 %v523_v17, %v3470_v26  ;;  %v698_v38 = vld [vmem:[#allocation2 + $0xc] sm:$0xf]  ;;  %v343_v40 = vld [vmem:[%s3455_s22 + $0x8] sm:$0xf] }
  0x1a   : > { %v540_v39 = vshll.u32 %v360_v27, 16  ;;  %v381_v41 = vor.u32 %v379_v20, %v378_v31  ;;  %v382_v42 = vrot.slane %v378_v31, 4  ;;  %v531_v47 = vrot.slane %v529_v28, 7  ;;  %v344_v49 = vld [vmem:[%s3455_s22 + $0xc] sm:$0xf]  ;;  %s3383_s23 = smov 12  }
  0x1b   : > { %v389_v43 = vor.u32 %v387_v22, %v3479_v32  ;;  %v526_v45 = vsel %vm3466_vm6, %v518_v36, %v525_v37  ;;  %v756_v46 = vsel %vm3475_vm7, %v517_v35, %v755_v30  ;;  %v3494_v48 = vrot.slane %v537_v34, 7  ;;  %v308_v50 = vld [vmem:[#allocation2 + $0x68] sm:$0x1]  ;;  %v762_v53 = vld [vmem:[#allocation2 + $0x78] sm:$0xf]  ;;  %s3384_s24 = smov 8  }
  0x1c   : > { %757 = vst [vmem:[#allocation2 + $0x6c] sm:$0xf] %v756_v46  ;;  %758 = vst.msk [vmem:[#allocation2 + $0x70] sm:$0xf] %vm696_vm5, %v526_v45  ;;  %v699_v52 = vsel %vm3475_vm7, %v381_v41, %v698_v38  ;;  %v393_v54 = vshrl.u32 %v343_v40, 16  ;;  %v396_v55 = vshll.u32 %v343_v40, 16  ;;  %v534_v57 = vor.u32 %v532_v33, %v531_v47 }
  0x1d   : > { %v390_v51 = vsel %vm3466_vm6, %v382_v42, %v389_v43  ;;  %v355_v56 = vld [vmem:[%s3455_s22 + $0x38] sm:$0xf]  ;;  %700 = vst [vmem:[#allocation2 + $0xc] sm:$0xf] %v699_v52  ;;  %v535_v58 = vrot.slane %v531_v47, 4  ;;  %v542_v59 = vor.u32 %v540_v39, %v3494_v48  ;;  %v401_v63 = vshrl.u32 %v344_v49, 16 }
  0x1e   : > { %702 = vst.msk [vmem:[#allocation2 + $0x10] sm:$0xf] %vm696_vm5, %v390_v51  ;;  %v356_v60 = vld [vmem:[%s3455_s22 + $0x3c] sm:$0xf]  ;;  %v228_v61 = vld [vmem:[#allocation2] sm:$0x1]  ;;  %v763_v5 = vsel %vm3475_vm7, %v534_v57, %v762_v53 }
  0x1f   : > { %v395_v62 = vrot.slane %v393_v54, 7  ;;  %v404_v0 = vshll.u32 %v344_v49, 16  ;;  %v309_v2 = vsel %vm3486_vm8, 0, %v308_v50  ;;  %v284_v3 = vld [vmem:[#allocation2 + $0x8] sm:$0x1]  ;;  %v543_v4 = vsel %vm3466_vm6, %v535_v58, %v542_v59  ;;  %s3385_s25 = smov 20  }
  0x20   : > { %v706_v6 = vld [vmem:[#allocation2 + $0x18] sm:$0xf]  ;;  %310 = vst [vmem:[#allocation2 + $0x68] sm:$0x1] %v309_v2  ;;  %v495_v7 = vshrl.u32 %v355_v56, 16  ;;  %v498_v8 = vshll.u32 %v355_v56, 16 }
  0x21   : > { %764 = vst [vmem:[#allocation2 + $0x78] sm:$0xf] %v763_v5  ;;  %765 = vst.msk [vmem:[#allocation2 + $0x7c] sm:$0xf] %vm696_vm5, %v543_v4  ;;  %v398_v9 = vor.u32 %v396_v55, %v395_v62  ;;  %v399_v10 = vrot.slane %v395_v62, 4  ;;  %v3513_v11 = vrot.slane %v401_v63, 7 }
  0x22   : > { %v503_v12 = vshrl.u32 %v356_v60, 16  ;;  %v497_v13 = vrot.slane %v495_v7, 7  ;;  %v506_v14 = vshll.u32 %v356_v60, 16  ;;  %v229_v15 = vsel %vm3437_vm2, 0, %v228_v61  ;;  %v748_v31 = vld [vmem:[#allocation2 + $0x60] sm:$0xf] }
  0x23   : > { %v285_v16 = vsel %vm3486_vm8, 0, %v284_v3  ;;  %v406_v17 = vor.u32 %v404_v0, %v3513_v11  ;;  %v707_v18 = vsel %vm3475_vm7, %v398_v9, %v706_v6  ;;  %230 = vst [vmem:[#allocation2] sm:$0x1] %v229_v15  ;;  %v527_v20 = vrot.slane %v3470_v26, 4  ;;  %v3523_v21 = vld [vmem:[#allocation2 + $0x6c] sm:$0xf] }
  0x24   : > { %v505_v19 = vrot.slane %v503_v12, 7  ;;  %286 = vst [vmem:[#allocation2 + $0x8] sm:$0x1] %v285_v16  ;;  %v3525_v22 = vld [vmem:[#allocation2 + $0x70] sm:$0xf]  ;;  %v500_v23 = vor.u32 %v498_v8, %v497_v13  ;;  %v501_v25 = vrot.slane %v497_v13, 4 }
  0x25   : > { %708 = vst [vmem:[#allocation2 + $0x18] sm:$0xf] %v707_v18  ;;  %vm1574_vm11 = vcmask 1046532   ;;  %v3529_v27 = vcombine.low %v3523_v21, %v3525_v22  ;;  %v391_v28 = vrot.slane %v3479_v32, 4  ;;  %v3532_v30 = vld [vmem:[#allocation2 + $0xc] sm:$0xf]  ;;  %v407_v38 = vsel %vm3466_vm6, %v399_v10, %v406_v17 }
  0x26   : > { %v3382_v33 = vmov 0   ;;  %v3536_v35 = vld [vmem:[#allocation2 + $0x10] sm:$0xf]  ;;  %v1085_v36 = vshrl.u32 %v3532_v30, 16  ;;  %v1088_v37 = vshll.u32 %v3532_v30, 16  ;;  %v508_v39 = vor.u32 %v506_v14, %v505_v19  ;;  %vm3617_vm12 = vmor %vm1573_vm10, %vm1574_vm11  ;;  %s3386_s26 = smov 4  }
  0x27   : > { %5100 = vst [vmem:[#allocation4_spill] sm:$0xff] %v3529_v27  ;;  %v3534_v34 = vrot.slane %v3382_v33, 7  ;;  %v311_v40 = vld [vmem:[#allocation2 + $0x74] sm:$0x1]  ;;  %1822 = vrot.lane.b32.xlu1 %v3529_v27, %s3383_s23  ;;  %v3110_v41 = vcombine.low %v3532_v30, %v3536_v35  ;;  %v1098_v42 = vshrl.u32 %v3536_v35, 16  ;;  %1050 = vst.msk [vmem:[#allocation3 + $0x48] sm:$0xff] %vm1040_vm9, %v3529_v27  ;;  %v749_v53 = vsel %vm3475_vm7, %v500_v23, %v748_v31 }
  0x28   : > { %v408_v43 = vrot.slane %v3513_v11, 4  ;;  %709 = vst.msk [vmem:[#allocation2 + $0x1c] sm:$0xf] %vm696_vm5, %v407_v38  ;;  %v510_v45 = vrot.slane %v505_v19, 4  ;;  %v752_v46 = vld [vmem:[#allocation2 + $0x68] sm:$0x1]  ;;  %v509_v52 = vsel %vm3466_vm6, %v501_v25, %v508_v39 }
  0x29   : > { %v1087_v47 = vrot.slane %v1085_v36, 4  ;;  %v1090_v49 = vrot.slane %v1088_v37, 5  ;;  %v3551_v50 = vld [vmem:[#allocation2 + $0x78] sm:$0xf]  ;;  %v3553_v51 = vld [vmem:[#allocation2 + $0x7c] sm:$0xf]  ;;  %1806 = vrot.lane.b32.xlu0 %v3110_v41, %s3383_s23 }
  0x2a   : > { %v1277_v54 = vshrl.u32 %v3523_v21, 16  ;;  %v1280_v55 = vshll.u32 %v3523_v21, 16  ;;  %v1290_v56 = vshrl.u32 %v3525_v22, 16  ;;  %1042 = vst.msk [vmem:[#allocation3 + $0x8] sm:$0xff] %vm1040_vm9, %v3110_v41  ;;  %v3566_v57 = vcombine.low %v3551_v50, %v3553_v51  ;;  %750 = vst [vmem:[#allocation2 + $0x60] sm:$0xf] %v749_v53 }
  0x2b   : > { %751 = vst.msk [vmem:[#allocation2 + $0x64] sm:$0xf] %vm696_vm5, %v509_v52  ;;  %v287_v58 = vld [vmem:[#allocation2 + $0x14] sm:$0x1]  ;;  %v1094_v59 = vshll.u32 %v3536_v35, 16  ;;  %v753_v60 = vsel %vm3437_vm2, %v510_v45, %v752_v46  ;;  %v3573_v61 = vrot.slane %v3534_v34, 4  ;;  %v1091_v4 = vor.u32 %v1090_v49, %v1087_v47 }
  0x2c   : > { %v845_v62 = vld [vmem:[#allocation2] sm:$0xf]  ;;  %v849_v63 = vld [vmem:[#allocation2 + $0x8] sm:$0x1]  ;;  %1824 = vrot.lane.b32.xlu1 %v3566_v57, %s3383_s23  ;;  %1051 = vst.msk [vmem:[#allocation3 + $0x50] sm:$0xff] %vm1040_vm9, %v3566_v57  ;;  %v312_v2 = vsel %vm3486_vm8, 0, %v311_v40 }
  0x2d   : > { %754 = vst [vmem:[#allocation2 + $0x68] sm:$0x1] %v753_v60  ;;  %v846_v0 = vsel %vm3475_vm7, %v3534_v34, %v845_v62  ;;  %v1641_v3 = vrot.slane %v3525_v22, 5  ;;  %v3585_v5 = vrot.slane %v1098_v42, 4  ;;  %v3587_v6 = vld [vmem:[#allocation2 + $0x18] sm:$0xf]  ;;  %v840_v7 = vsel %vm3466_vm6, %v3573_v61, %v3534_v34 }
  0x2e   : > { %847 = vst [vmem:[#allocation2] sm:$0xf] %v846_v0  ;;  %v850_v8 = vsel %vm3437_vm2, %v3573_v61, %v849_v63  ;;  %313 = vst [vmem:[#allocation2 + $0x74] sm:$0x1] %v312_v2  ;;  %v3150_v9 = vrot.slane %v3523_v21, 9  ;;  %v1301_v10 = vshrl.u32 %v3551_v50, 16 }
  0x2f   : > { %v1304_v12 = vshll.u32 %v3551_v50, 16  ;;  %v1314_v13 = vshrl.u32 %v3553_v51, 16  ;;  %848 = vst.msk [vmem:[#allocation2 + $0x4] sm:$0xf] %vm696_vm5, %v840_v7  ;;  %851 = vst [vmem:[#allocation2 + $0x8] sm:$0x1] %v850_v8 }
  0x30   : > { %886 = vst.msk [vmem:[#allocation2 + $0xd0] sm:$0xf] %vm696_vm5, %v840_v7  ;;  %v288_v14 = vsel %vm3486_vm8, 0, %v287_v58  ;;  %v3604_v15 = vld [vmem:[#allocation2 + $0x1c] sm:$0xf]  ;;  %v1109_v16 = vshrl.u32 %v3587_v6, 16  ;;  %v3631_v37 = vsel %vm3617_vm12, %v3150_v9, %v1641_v3 }
  0x31   : > { %v1112_v17 = vshll.u32 %v3587_v6, 16  ;;  %v3608_v18 = vrot.slane %v1641_v3, 4  ;;  %289 = vst [vmem:[#allocation2 + $0x14] sm:$0x1] %v288_v14  ;;  %v1585_v19 = vrot.slane %v3536_v35, 5  ;;  %v3613_v21 = vcombine.low %v3587_v6, %v3604_v15  ;;  %s3387_s27 = smov 16  }
  0x32   : > { %v3142_v25 = vrot.slane %v3532_v30, 9  ;;  %vm1057_vm13 = vsmask.f32 3328  ;;  %v3622_v31 = vrot.slane %v1091_v4, 4  ;;  %v1122_v33 = vshrl.u32 %v3604_v15, 16  ;;  %s3388_s28 = smov 24  }
  0x33   : > { %v3625_v36 = vld [vmem:[#allocation2 + $0x60] sm:$0xf]  ;;  %v3627_v35 = vld [vmem:[#allocation2 + $0x64] sm:$0xf]  ;;  %v3633_v38 = vrot.slane %v1094_v59, 5  ;;  %1808 = vrot.lane.b32.xlu0 %v3613_v21, %s3383_s23  ;;  %1043 = vst.msk [vmem:[#allocation3 + $0x10] sm:$0xff] %vm1040_vm9, %v3613_v21 }
  0x34   : > { %v3149_v30 = vrot.slane %v3625_v36, 9  ;;  %v1634_v39 = vrot.slane %v3627_v35, 5  ;;  %v3641_v40 = vrot.slane %v1585_v19, 4  ;;  %vm1058_vm14 = vsmask.f32 7440  ;;  %s3389_s5 = smov 28  }
  0x35   : > { %v3643_v41 = vld [vmem:[#allocation2 + $0x68] sm:$0x1]  ;;  %v1279_v42 = vrot.slane %v1277_v54, 4  ;;  %v1282_v45 = vrot.slane %v1280_v55, 5  ;;  %v1286_v46 = vshll.u32 %v3525_v22, 16  ;;  %v3646_v47 = vrot.slane %v1290_v56, 4  ;;  %vm3679_vm15 = vmor %vm1057_vm13, %vm1058_vm14 }
  0x36   : > { %v1635_v49 = vsel %vm3617_vm12, %v3149_v30, %v1634_v39  ;;  %v1636_v52 = vrot.slane %v1634_v39, 4  ;;  %v1637_v53 = vrot.slane %v3643_v41, 5  ;;  %v3651_v58 = vld [vmem:[#allocation2] sm:$0xf]  ;;  %v759_v59 = vld [vmem:[#allocation2 + $0x74] sm:$0x1]  ;;  %v3655_v60 = vsel %vm3617_vm12, %v3142_v25, %v1585_v19 }
  0x37   : > { %v3657_v62 = vld [vmem:[#allocation2 + $0x4] sm:$0xf]  ;;  %v892_v54 = vld [vmem:[#allocation2 + $0x8] sm:$0x1]  ;;  %v3141_v22 = vrot.slane %v3651_v58, 9  ;;  %v760_v55 = vsel %vm3437_vm2, %v527_v20, %v759_v59  ;;  %v1101_v56 = vor.u32 %v3585_v5, %v3633_v38  ;;  %v1253_v63 = vshrl.u32 %v3625_v36, 16 }
  0x38   : > { %v1638_v0 = vsel %vm3617_vm12, %v1636_v52, %v1637_v53  ;;  %v1578_v2 = vrot.slane %v3657_v62, 5  ;;  %v1581_v3 = vrot.slane %v892_v54, 5  ;;  %761 = vst [vmem:[#allocation2 + $0x74] sm:$0x1] %v760_v55  ;;  %v703_v4 = vld [vmem:[#allocation2 + $0x14] sm:$0x1]  ;;  %v1097_v53 = vsel %vm3679_vm15, %v3622_v31, %v3633_v38 }
  0x39   : > { %v1061_v7 = vshrl.u32 %v3651_v58, 16  ;;  %v3671_v8 = vcombine.low %v1635_v49, %v1638_v0  ;;  %v704_v26 = vsel %vm3437_vm2, %v391_v28, %v703_v4  ;;  %v1064_v5 = vshll.u32 %v3651_v58, 16  ;;  %s3390_s8 = smov 32   ;;  %s3239_s13 = sshll.u32 %s5119_s15, 9 }
  0x3a   : > { %v1070_v9 = vshll.u32 %v3657_v62, 16  ;;  %v1579_v14 = vsel %vm3617_vm12, %v3141_v22, %v1578_v2  ;;  %v1580_v19 = vrot.slane %v1578_v2, 4  ;;  %705 = vst [vmem:[#allocation2 + $0x14] sm:$0x1] %v704_v26  ;;  %v1074_v32 = vshrl.u32 %v3657_v62, 16  ;;  %s3391_s15 = smov 120  }
  0x3b   : > { %5103 = vst [vmem:[#allocation5_spill] sm:$0xff] %v3671_v8  ;;  %v1063_v25 = vrot.slane %v1061_v7, 4  ;;  %1752 = vrot.lane.b32.xlu1 %v3671_v8, %s3384_s24  ;;  %v1066_v28 = vrot.slane %v1064_v5, 5  ;;  %v1080_v39 = vshll.u32 %v892_v54, 16  ;;  %v1283_v49 = vor.u32 %v1282_v45, %v1279_v42 }
  0x3c   : > { %v3690_v30 = vrot.slane %v1070_v9, 5  ;;  %v1582_v52 = vsel %vm3617_vm12, %v1580_v19, %v1581_v3  ;;  %v1076_v59 = vrot.slane %v1074_v32, 4  ;;  %v3698_v22 = vrot.slane %v1286_v46, 5 }
  0x3d   : > { %v3157_v55 = vcombine.low %v1579_v14, %v1582_v52  ;;  %v1067_v0 = vor.u32 %v1066_v28, %v1063_v25  ;;  %v1255_v2 = vrot.slane %v1253_v63, 4  ;;  %v1256_v4 = vshll.u32 %v3625_v36, 16 }
  0x3e   : > { %v1102_v7 = vrot.slane %v1101_v56, 4  ;;  %v1077_v54 = vor.u32 %v1076_v59, %v3690_v30  ;;  %v1293_v42 = vor.u32 %v3646_v47, %v3698_v22  ;;  %v1262_v45 = vshll.u32 %v3627_v35, 16  ;;  %v290_v59 = vld [vmem:[#allocation2 + $0x20] sm:$0x1] }
  0x3f   : > { %1736 = vrot.lane.b32.xlu0 %v3157_v55, %s3384_s24  ;;  %v919_v3 = vld [vmem:[#allocation2 + $0x74] sm:$0x1]  ;;  %v1082_v31 = vrot.slane %v1080_v39, 5  ;;  %v3706_v38 = vrot.slane %v1283_v49, 4  ;;  %v1258_v46 = vrot.slane %v1256_v4, 5  ;;  %v1266_v26 = vshrl.u32 %v3627_v35, 16 }
  0x40   : > { %v1644_v63 = vrot.slane %v919_v3, 5  ;;  %v1068_v5 = vrot.slane %v1067_v0, 4  ;;  %v1296_v9 = vshll.u32 %v919_v3, 16  ;;  %v1272_v56 = vshll.u32 %v3643_v41, 16 }
  0x41   : > { %v895_v14 = vld [vmem:[#allocation2 + $0x14] sm:$0x1]  ;;  %v1078_v19 = vrot.slane %v1077_v54, 4  ;;  %v1259_v25 = vor.u32 %v1258_v46, %v1255_v2  ;;  %v1264_v47 = vrot.slane %v1262_v45, 5  ;;  %v1268_v32 = vrot.slane %v1266_v26, 4 }
  0x42   : > { %v1645_v28 = vsel %vm3617_vm12, %v3608_v18, %v1644_v63  ;;  %v1588_v39 = vrot.slane %v895_v14, 5  ;;  %v1104_v49 = vshll.u32 %v895_v14, 16  ;;  %v1294_v52 = vrot.slane %v1293_v42, 4  ;;  %v237_v14 = vld [vmem:[#allocation2 + $0x24] sm:$0x1] }
  0x43   : > { %v3714_v55 = vcombine.low %v3631_v37, %v1645_v28  ;;  %v1289_v41 = vsel %vm3679_vm15, %v3706_v38, %v3698_v22  ;;  %v1298_v0 = vrot.slane %v1296_v9, 5  ;;  %v1260_v2 = vrot.slane %v1259_v25, 4  ;;  %v314_v38 = vld [vmem:[#allocation2 + $0x80] sm:$0x1] }
  0x44   : > { %v1589_v4 = vsel %vm3617_vm12, %v3641_v40, %v1588_v39  ;;  %v1106_v54 = vrot.slane %v1104_v49, 5  ;;  %v1073_v18 = vsel %vm3679_vm15, %v1068_v5, %v3690_v30  ;;  %v1269_v42 = vor.u32 %v1268_v32, %v1264_v47  ;;  %v346_v32 = vld [vmem:[%s3455_s22 + $0x14] sm:$0xf] }
  0x45   : > { %5106 = vst [vmem:[#allocation6_spill] sm:$0xff] %v3714_v55  ;;  %1754 = vrot.lane.b32.xlu1 %v3714_v55, %s3384_s24  ;;  %v3158_v37 = vcombine.low %v3655_v60, %v1589_v4  ;;  %v1083_v22 = vsel %vm3679_vm15, %v1078_v19, %v1082_v31  ;;  %v1274_v45 = vrot.slane %v1272_v56, 5  ;;  %v291_v3 = vsel %vm3486_vm8, 0, %v290_v59  ;;  %v261_v59 = vld [vmem:[#allocation2 + $0x84] sm:$0x1] }
  0x46   : > { %v1107_v40 = vsel %vm3679_vm15, %v1102_v7, %v1106_v54  ;;  %v1299_v30 = vsel %vm3679_vm15, %v1294_v52, %v1298_v0  ;;  %v1270_v46 = vrot.slane %v1269_v42, 4  ;;  %292 = vst [vmem:[#allocation2 + $0x20] sm:$0x1] %v291_v3  ;;  %v1111_v26 = vrot.slane %v1109_v16, 4  ;;  %v361_v4 = vld [vmem:[%s3455_s22 + $0x50] sm:$0xf] }
  0x47   : > { %1738 = vrot.lane.b32.xlu0 %v3158_v37, %s3384_s24  ;;  %v1265_v60 = vsel %vm3679_vm15, %v1260_v2, %v1264_v47  ;;  %v1114_v31 = vrot.slane %v1112_v17, 5  ;;  %v1118_v63 = vshll.u32 %v3604_v15, 16  ;;  %v1124_v7 = vrot.slane %v1122_v33, 4  ;;  %v345_v47 = vld [vmem:[%s3455_s22 + $0x10] sm:$0xf] }
  0x48   : > { %v3747_v5 = vcombine.low %v1097_v53, %v1107_v40  ;;  %v315_v16 = vsel %vm3486_vm8, 0, %v314_v38  ;;  %v1303_v9 = vrot.slane %v1301_v10, 4  ;;  %v1306_v56 = vrot.slane %v1304_v12, 5  ;;  %v3783_v54 = vld [vmem:[%s3455_s22 + $0x54] sm:$0xf] }
  0x49   : > { %1990 = vrot.lane.b32.xlu1 %v3714_v55, %s3385_s25  ;;  %v1275_v17 = vsel %vm3679_vm15, %v1270_v46, %v1274_v45  ;;  %v1115_v33 = vor.u32 %v1114_v31, %v1111_v26  ;;  %v3759_v53 = vrot.slane %v1118_v63, 5  ;;  %316 = vst [vmem:[#allocation2 + $0x80] sm:$0x1] %v315_v16  ;;  %v1310_v19 = vshll.u32 %v3553_v51, 16  ;;  %v317_v40 = vld [vmem:[#allocation2 + $0x8c] sm:$0x1] }
  0x4a   : > { %v1307_v25 = vor.u32 %v1306_v56, %v1303_v9  ;;  %v3143_v10 = vrot.slane %v3587_v6, 9  ;;  %v1592_v12 = vrot.slane %v3604_v15, 5  ;;  %v3125_v28 = vcombine.low %v1073_v18, %v1083_v22 }
  0x4b   : > { %1974 = vrot.lane.b32.xlu0 %v3158_v37, %s3385_s25  ;;  %v1125_v39 = vor.u32 %v1124_v7, %v3759_v53  ;;  %v3768_v49 = vrot.slane %v1310_v19, 5  ;;  %v3772_v52 = vrot.slane %v1314_v13, 4  ;;  %v544_v0 = vrot.slane %v3494_v48, 4  ;;  %v293_v37 = vld [vmem:[#allocation2 + $0x2c] sm:$0x1] }
  0x4c   : > { %v3775_v2 = vcombine.low %v1289_v41, %v1299_v30  ;;  %v3777_v6 = vcombine.low %v1265_v60, %v1275_v17  ;;  %v3779_v15 = vrot.slane %v1115_v33, 4  ;;  %v3787_v42 = vrot.slane %v1307_v25, 4  ;;  %v240_v60 = vld [vmem:[#allocation2 + $0x30] sm:$0x1]  ;;  %v347_v33 = vld [vmem:[%s3455_s22 + $0x18] sm:$0xf] }
  0x4d   : > { %1494 = vrot.lane.b32.xlu1 %v3747_v5, %s3386_s26  ;;  %v710_v18 = vld [vmem:[#allocation2 + $0x20] sm:$0x1]  ;;  %v3791_v13 = vsel %vm3617_vm12, %v3143_v10, %v1592_v12  ;;  %v3151_v48 = vrot.slane %v3551_v50, 9  ;;  %v238_v41 = vsel %vm3437_vm2, 0, %v237_v14  ;;  %v3800_v45 = vrot.slane %v1125_v39, 4 }
  0x4e   : > { %5107 = vst [vmem:[#allocation7_spill] sm:$0xff] %v3775_v2  ;;  %5108 = vst [vmem:[#allocation8_spill] sm:$0xff] %v3777_v6  ;;  %v711_v22 = vsel %vm3437_vm2, %v408_v43, %v710_v18  ;;  %v3802_v3 = vrot.slane %v1592_v12, 4  ;;  %v1648_v38 = vrot.slane %v3553_v51, 5  ;;  %v1317_v30 = vor.u32 %v3772_v52, %v3768_v49  ;;  %v264_v18 = vld [vmem:[#allocation2 + $0x90] sm:$0x1] }
  0x4f   : > { %239 = vst [vmem:[#allocation2 + $0x24] sm:$0x1] %v238_v41  ;;  %1492 = vrot.lane.b32.xlu0 %v3125_v28, %s3386_s26  ;;  %712 = vst [vmem:[#allocation2 + $0x20] sm:$0x1] %v711_v22  ;;  %v410_v46 = vshrl.u32 %v345_v47, 16  ;;  %v413_v11 = vshll.u32 %v345_v47, 16 }
  0x50   : > { %v418_v26 = vshrl.u32 %v346_v32, 16  ;;  %v766_v43 = vld [vmem:[#allocation2 + $0x80] sm:$0x1]  ;;  %v421_v31 = vshll.u32 %v346_v32, 16  ;;  %v262_v63 = vsel %vm3437_vm2, 0, %v261_v59  ;;  %v546_v7 = vshrl.u32 %v361_v4, 16 }
  0x51   : > { %v549_v16 = vshll.u32 %v361_v4, 16  ;;  %1510 = vrot.lane.b32.xlu1 %v3775_v2, %s3386_s26  ;;  %v767_v9 = vsel %vm3437_vm2, %v544_v0, %v766_v43  ;;  %v412_v56 = vrot.slane %v410_v46, 7  ;;  %263 = vst [vmem:[#allocation2 + $0x84] sm:$0x1] %v262_v63  ;;  %v554_v17 = vshrl.u32 %v3783_v54, 16 }
  0x52   : > { %v3814_v14 = vrot.slane %v418_v26, 7  ;;  %768 = vst [vmem:[#allocation2 + $0x80] sm:$0x1] %v767_v9  ;;  %v548_v19 = vrot.slane %v546_v7, 7  ;;  %v557_v25 = vshll.u32 %v3783_v54, 16  ;;  %v294_v10 = vsel %vm3486_vm8, 0, %v293_v37 }
  0x53   : > { %v318_v12 = vsel %vm3486_vm8, 0, %v317_v40  ;;  %v348_v47 = vld [vmem:[%s3455_s22 + $0x1c] sm:$0xf]  ;;  %1508 = vrot.lane.b32.xlu0 %v3777_v6, %s3386_s26  ;;  %v415_v32 = vor.u32 %v413_v11, %v412_v56  ;;  %v416_v28 = vrot.slane %v412_v56, 4  ;;  %295 = vst [vmem:[#allocation2 + $0x2c] sm:$0x1] %v294_v10  ;;  %v1121_v56 = vsel %vm3679_vm15, %v3779_v15, %v3759_v53 }
  0x54   : > { %v423_v39 = vor.u32 %v421_v31, %v3814_v14  ;;  %v425_v52 = vrot.slane %v3814_v14, 4  ;;  %319 = vst [vmem:[#allocation2 + $0x8c] sm:$0x1] %v318_v12  ;;  %v551_v59 = vor.u32 %v549_v16, %v548_v19  ;;  %v552_v0 = vrot.slane %v548_v19, 4  ;;  %v335_v6 = vld [vmem:[#allocation2 + $0xd4] sm:$0x1] }
  0x55   : > { %v556_v4 = vrot.slane %v554_v17, 7  ;;  %v241_v54 = vsel %vm3437_vm2, 0, %v240_v60  ;;  %1914 = vrot.lane.b32.xlu1 %v3775_v2, %s3387_s27  ;;  %v427_v22 = vshrl.u32 %v347_v33, 16  ;;  %v430_v40 = vshll.u32 %v347_v33, 16 }
  0x56   : > { %v424_v41 = vsel %vm3466_vm6, %v416_v28, %v423_v39  ;;  %v713_v37 = vld [vmem:[#allocation2 + $0x24] sm:$0xf]  ;;  %242 = vst [vmem:[#allocation2 + $0x30] sm:$0x1] %v241_v54  ;;  %v435_v46 = vshrl.u32 %v348_v47, 16  ;;  %v438_v31 = vshll.u32 %v348_v47, 16 }
  0x57   : > { %v898_v11 = vld [vmem:[#allocation2 + $0x20] sm:$0x1]  ;;  %v714_v26 = vsel %vm3475_vm7, %v415_v32, %v713_v37  ;;  %716 = vst.msk [vmem:[#allocation2 + $0x28] sm:$0xf] %vm696_vm5, %v424_v41  ;;  %v559_v60 = vor.u32 %v557_v25, %v556_v4  ;;  %v561_v43 = vrot.slane %v556_v4, 4  ;;  %1898 = vrot.lane.b32.xlu0 %v3747_v5, %s3387_s27  ;;  %v429_v16 = vrot.slane %v427_v22, 7 }
  0x58   : > { %v1128_v63 = vshll.u32 %v898_v11, 16  ;;  %v1595_v7 = vrot.slane %v898_v11, 5  ;;  %715 = vst [vmem:[#allocation2 + $0x24] sm:$0xf] %v714_v26  ;;  %v3839_v9 = vrot.slane %v435_v46, 7  ;;  %v1650_v14 = vrot.slane %v1648_v38, 4 }
  0x59   : > { %v560_v17 = vsel %vm3466_vm6, %v552_v0, %v559_v60  ;;  %v769_v33 = vld [vmem:[#allocation2 + $0x84] sm:$0xf]  ;;  %v265_v5 = vsel %vm3437_vm2, 0, %v264_v18  ;;  %v922_v25 = vld [vmem:[#allocation2 + $0x80] sm:$0x1]  ;;  %v1318_v10 = vrot.slane %v1317_v30, 4  ;;  %v432_v47 = vor.u32 %v430_v40, %v429_v16 }
  0x5a   : > { %v1130_v19 = vrot.slane %v1128_v63, 5  ;;  %v770_v12 = vsel %vm3475_vm7, %v551_v59, %v769_v33  ;;  %772 = vst.msk [vmem:[#allocation2 + $0x88] sm:$0xf] %vm696_vm5, %v560_v17  ;;  %266 = vst [vmem:[#allocation2 + $0x90] sm:$0x1] %v265_v5  ;;  %v1320_v53 = vshll.u32 %v922_v25, 16  ;;  %v1596_v15 = vsel %vm3617_vm12, %v3802_v3, %v1595_v7 }
  0x5b   : > { %v1651_v32 = vrot.slane %v922_v25, 5  ;;  %771 = vst [vmem:[#allocation2 + $0x84] sm:$0xf] %v770_v12  ;;  %v717_v28 = vld [vmem:[#allocation2 + $0x2c] sm:$0x1]  ;;  %v440_v0 = vor.u32 %v438_v31, %v3839_v9  ;;  %v433_v54 = vrot.slane %v429_v16, 4  ;;  %v1313_v3 = vsel %vm3679_vm15, %v3787_v42, %v3768_v49 }
  0x5c   : > { %v773_v39 = vld [vmem:[#allocation2 + $0x8c] sm:$0x1]  ;;  %v1131_v30 = vsel %vm3679_vm15, %v3800_v45, %v1130_v19  ;;  %v718_v59 = vsel %vm3437_vm2, %v425_v52, %v717_v28  ;;  %v1322_v41 = vrot.slane %v1320_v53, 5  ;;  %v1649_v45 = vsel %vm3617_vm12, %v3151_v48, %v1648_v38  ;;  %v3886_v42 = vld [vmem:[%s3455_s22 + $0x58] sm:$0xf] }
  0x5d   : > { %v774_v4 = vsel %vm3437_vm2, %v561_v43, %v773_v39  ;;  %v3865_v18 = vcombine.low %v1121_v56, %v1131_v30  ;;  %719 = vst [vmem:[#allocation2 + $0x2c] sm:$0x1] %v718_v59  ;;  %v720_v37 = vld [vmem:[#allocation2 + $0x30] sm:$0xf]  ;;  %v1652_v52 = vsel %vm3617_vm12, %v1650_v14, %v1651_v32  ;;  %v441_v40 = vsel %vm3466_vm6, %v433_v54, %v440_v0 }
  0x5e   : > { %775 = vst [vmem:[#allocation2 + $0x8c] sm:$0x1] %v774_v4  ;;  %v3879_v22 = vld [vmem:[#allocation2 + $0x28] sm:$0xf]  ;;  %v721_v49 = vsel %vm3475_vm7, %v432_v47, %v720_v37  ;;  %v1323_v50 = vsel %vm3679_vm15, %v1318_v10, %v1322_v41  ;;  %v3893_v51 = vcombine.low %v3791_v13, %v1596_v15  ;;  %723 = vst.msk [vmem:[#allocation2 + $0x34] sm:$0xf] %vm696_vm5, %v441_v40 }
  0x5f   : > { %1900 = vrot.lane.b32.xlu0 %v3865_v18, %s3387_s27  ;;  %v3895_v48 = vld [vmem:[#allocation2 + $0x24] sm:$0xf]  ;;  %v1146_v38 = vshrl.u32 %v3879_v22, 16  ;;  %v1142_v46 = vshll.u32 %v3879_v22, 16  ;;  %722 = vst [vmem:[#allocation2 + $0x30] sm:$0xf] %v721_v49  ;;  %v3900_v11 = vcombine.low %v1313_v3, %v1323_v50  ;;  %v3908_v43 = vcombine.low %v1649_v45, %v1652_v52 }
  0x60   : > { %v3904_v26 = vcombine.low %v3895_v48, %v3879_v22  ;;  %v1133_v60 = vshrl.u32 %v3895_v48, 16  ;;  %v1136_v13 = vshll.u32 %v3895_v48, 16  ;;  %v563_v16 = vshrl.u32 %v3886_v42, 16 }
  0x61   : > { %v3910_v31 = vld [vmem:[#allocation2 + $0x88] sm:$0xf]  ;;  %v1144_v63 = vrot.slane %v1142_v46, 5  ;;  %v1148_v7 = vrot.slane %v1146_v38, 4  ;;  %1916 = vrot.lane.b32.xlu1 %v3900_v11, %s3387_s27  ;;  %v566_v49 = vshll.u32 %v3886_v42, 16  ;;  %vm2362_vm0 = vcmask 1041408  }
  0x62   : > { %1044 = vst.msk [vmem:[#allocation3 + $0x18] sm:$0xff] %vm1040_vm9, %v3904_v26  ;;  %v3917_v56 = vld [vmem:[#allocation2 + $0x84] sm:$0xf]  ;;  %v1338_v14 = vshrl.u32 %v3910_v31, 16  ;;  %v1135_v17 = vrot.slane %v1133_v60, 4  ;;  %v1138_v33 = vrot.slane %v1136_v13, 5 }
  0x63   : > { %v1334_v5 = vshll.u32 %v3910_v31, 16  ;;  %1976 = vrot.lane.b32.xlu0 %v3893_v51, %s3385_s25  ;;  %v3925_v19 = vcombine.low %v3917_v56, %v3910_v31  ;;  %v1325_v25 = vshrl.u32 %v3917_v56, 16  ;;  %v1328_v10 = vshll.u32 %v3917_v56, 16  ;;  %v364_v46 = vld [vmem:[%s3455_s22 + $0x5c] sm:$0xf] }
  0x64   : > { %v1149_v12 = vor.u32 %v1148_v7, %v1144_v63  ;;  %v3929_v47 = vld [vmem:[#allocation2 + $0x2c] sm:$0x1]  ;;  %v1139_v53 = vor.u32 %v1138_v33, %v1135_v17  ;;  %v1340_v28 = vrot.slane %v1338_v14, 4  ;;  %v565_v40 = vrot.slane %v563_v16, 7  ;;  %v776_v42 = vld [vmem:[#allocation2 + $0x90] sm:$0xf] }
  0x65   : > { %v3931_v15 = vld [vmem:[#allocation2 + $0x8c] sm:$0x1]  ;;  %v3933_v32 = vrot.slane %v1334_v5, 5  ;;  %1052 = vst.msk [vmem:[#allocation3 + $0x58] sm:$0xff] %vm1040_vm9, %v3925_v19  ;;  %v1152_v39 = vshll.u32 %v3929_v47, 16  ;;  %v1327_v0 = vrot.slane %v1325_v25, 4  ;;  %1992 = vrot.lane.b32.xlu1 %v3908_v43, %s3385_s25 }
  0x66   : > { %v1330_v30 = vrot.slane %v1328_v10, 5  ;;  %v1344_v4 = vshll.u32 %v3931_v15, 16  ;;  %v1140_v54 = vrot.slane %v1139_v53, 4  ;;  %v1150_v3 = vrot.slane %v1149_v12, 4  ;;  %v3944_v45 = vld [vmem:[#allocation2 + $0x30] sm:$0xf] }
  0x67   : > { %v1341_v59 = vor.u32 %v1340_v28, %v3933_v32  ;;  %2044 = vrot.lane.b32.xlu0 %v3613_v21, %s3388_s28  ;;  %v1154_v41 = vrot.slane %v1152_v39, 5  ;;  %v3946_v52 = vld [vmem:[#allocation2 + $0x34] sm:$0xf]  ;;  %v568_v16 = vor.u32 %v566_v49, %v565_v40  ;;  %v320_v14 = vld [vmem:[#allocation2 + $0x98] sm:$0x1]  ;;  %v3144_v33 = vrot.slane %v3895_v48, 9 }
  0x68   : > { %v1331_v37 = vor.u32 %v1330_v30, %v1327_v0  ;;  %v1346_v38 = vrot.slane %v1344_v4, 5  ;;  %v1145_v21 = vsel %vm3679_vm15, %v1140_v54, %v1144_v63  ;;  %v3960_v7 = vcombine.low %v3944_v45, %v3946_v52  ;;  %v243_v17 = vld [vmem:[#allocation2 + $0x3c] sm:$0x1]  ;;  %v3353_v10 = vld [vmem:[%s5081_s1] sm:$0xff]  }
  0x69   : > { %2060 = vrot.lane.b32.xlu1 %v3566_v57, %s3388_s28  ;;  %v1342_v50 = vrot.slane %v1341_v59, 4  ;;  %v1155_v60 = vsel %vm3679_vm15, %v1150_v3, %v1154_v41  ;;  %v296_v57 = vld [vmem:[#allocation2 + $0x38] sm:$0x1]  ;;  %v1599_v5 = vrot.slane %v3879_v22, 5  ;;  %v571_v63 = vshrl.u32 %v364_v46, 16  ;;  %3259 = vmatprep.subr.bf16.mxu0 %v3353_v10 }
  0x6a   : > { %v1332_v13 = vrot.slane %v1331_v37, 4  ;;  %1045 = vst.msk [vmem:[#allocation3 + $0x20] sm:$0xff] %vm1040_vm9, %v3960_v7  ;;  %v574_v25 = vshll.u32 %v364_v46, 16  ;;  %v3971_v12 = vcombine.low %v1145_v21, %v1155_v60  ;;  %v777_v22 = vsel %vm3475_vm7, %v568_v16, %v776_v42  ;;  %v349_v28 = vld [vmem:[%s3455_s22 + $0x20] sm:$0xf]  ;;  %3260 = vmatpush3.bf16.msra.mxu0 %v3353_v10  ;;  %3297 = vmatprep.subr.bf16.mxu1 %v3353_v10 }
  0x6b   : > { %2046 = vrot.lane.b32.xlu0 %v3904_v26, %s3388_s28  ;;  %v1347_v48 = vsel %vm3679_vm15, %v1342_v50, %v1346_v38  ;;  %v297_v53 = vsel %vm3486_vm8, 0, %v296_v57  ;;  %v569_v0 = vrot.slane %v565_v40, 4  ;;  %v573_v30 = vrot.slane %v571_v63, 7  ;;  %778 = vst [vmem:[#allocation2 + $0x90] sm:$0xf] %v777_v22  ;;  %3300 = vmatpush3.bf16.msra.mxu1 %v3353_v10  ;;  %v3354_v50 = vld [vmem:[%s5081_s1 + $0x8] sm:$0xff]  }
  0x6c   : > { %v1337_v39 = vsel %vm3679_vm15, %v1332_v13, %v3933_v32  ;;  %298 = vst [vmem:[#allocation2 + $0x38] sm:$0x1] %v297_v53  ;;  %v321_v59 = vsel %vm3486_vm8, 0, %v320_v14  ;;  %v244_v4 = vsel %vm3437_vm2, 0, %v243_v17  ;;  %v350_v54 = vld [vmem:[%s3455_s22 + $0x24] sm:$0xf]  ;;  %v1600_v46 = vsel %vm3617_vm12, %v3144_v33, %v1599_v5  ;;  %3261 = vmatprep.subr.bf16.mxu0 %v3354_v50  ;;  %3298 = vmatprep.subr.bf16.mxu1 %v3354_v50 }
  0x6d   : > { %2062 = vrot.lane.b32.xlu1 %v3925_v19, %s3388_s28  ;;  %322 = vst [vmem:[#allocation2 + $0x98] sm:$0x1] %v321_v59  ;;  %v267_v3 = vld [vmem:[#allocation2 + $0x9c] sm:$0x1]  ;;  %v1601_v41 = vrot.slane %v1599_v5, 4  ;;  %v442_v32 = vrot.slane %v3839_v9, 4  ;;  %v576_v37 = vor.u32 %v574_v25, %v573_v30  ;;  %v3997_v38 = vcombine.low %v1337_v39, %v1347_v48 }
  0x6e   : > { %245 = vst [vmem:[#allocation2 + $0x3c] sm:$0x1] %v244_v4  ;;  %v444_v40 = vshrl.u32 %v349_v28, 16  ;;  %v365_v49 = vld [vmem:[%s3455_s22 + $0x60] sm:$0xf]  ;;  %v1602_v21 = vrot.slane %v3929_v47, 5  ;;  %3262 = vmatpush3.bf16.msra.mxu0 %v3354_v50  ;;  %v3109_v53 = vcombine.low %v3651_v58, %v3657_v62 }
  0x6f   : > { %2136 = vrot.lane.b32.xlu0 %v3865_v18, %s3389_s5  ;;  %v447_v9 = vshll.u32 %v349_v28, 16  ;;  %v1655_v60 = vrot.slane %v3910_v31, 5  ;;  %v577_v13 = vsel %vm3466_vm6, %v569_v0, %v576_v37  ;;  %v452_v57 = vshrl.u32 %v350_v54, 16  ;;  %3301 = vmatpush3.bf16.msra.mxu1 %v3354_v50  ;;  %v366_v10 = vld [vmem:[%s3455_s22 + $0x64] sm:$0xf] }
  0x70   : > { %v446_v42 = vrot.slane %v444_v40, 7  ;;  %v578_v16 = vrot.slane %v573_v30, 4  ;;  %779 = vst.msk [vmem:[#allocation2 + $0x94] sm:$0xf] %vm696_vm5, %v577_v13  ;;  %v455_v14 = vshll.u32 %v350_v54, 16  ;;  %v268_v47 = vsel %vm3437_vm2, 0, %v267_v3 }
  0x71   : > { %2152 = vrot.lane.b32.xlu1 %v3900_v11, %s3389_s5  ;;  %v580_v17 = vshrl.u32 %v365_v49, 16  ;;  %v3152_v33 = vrot.slane %v3917_v56, 9  ;;  %v4011_v63 = vrot.slane %v452_v57, 7  ;;  %269 = vst [vmem:[#allocation2 + $0x9c] sm:$0x1] %v268_v47  ;;  %v583_v22 = vshll.u32 %v365_v49, 16 }
  0x72   : > { %v449_v31 = vor.u32 %v447_v9, %v446_v42  ;;  %v450_v5 = vrot.slane %v446_v42, 4  ;;  %v4020_v28 = vcombine.low %v3625_v36, %v3627_v35  ;;  %v1603_v56 = vsel %vm3617_vm12, %v1601_v41, %v1602_v21  ;;  %v299_v4 = vld [vmem:[#allocation2 + $0x44] sm:$0x1]  ;;  %1041 = vst.msk [vmem:[#allocation3] sm:$0xff] %vm1040_vm9, %v3109_v53  ;;  %v4035_v54 = vld [vmem:[#allocation2 + $0x90] sm:$0xf] }
  0x73   : > { %2138 = vrot.lane.b32.xlu0 %v3971_v12, %s3389_s5  ;;  %v724_v25 = vld [vmem:[#allocation2 + $0x38] sm:$0x1]  ;;  %v582_v48 = vrot.slane %v580_v17, 7  ;;  %v1657_v39 = vrot.slane %v1655_v60, 4  ;;  %v1658_v0 = vrot.slane %v3931_v15, 5  ;;  %v457_v35 = vor.u32 %v455_v14, %v4011_v63 }
  0x74   : > { %v725_v30 = vsel %vm3437_vm2, %v442_v32, %v724_v25  ;;  %v780_v59 = vld [vmem:[#allocation2 + $0x98] sm:$0x1]  ;;  %v323_v62 = vld [vmem:[#allocation2 + $0xa4] sm:$0x1]  ;;  %1049 = vst.msk [vmem:[#allocation3 + $0x40] sm:$0xff] %vm1040_vm9, %v4020_v28  ;;  %v4041_v41 = vcombine.low %v1600_v46, %v1603_v56  ;;  %v588_v37 = vshrl.u32 %v366_v10, 16  ;;  %v1656_v49 = vsel %vm3617_vm12, %v3152_v33, %v1655_v60 }
  0x75   : > { %2154 = vrot.lane.b32.xlu1 %v3997_v38, %s3389_s5  ;;  %726 = vst [vmem:[#allocation2 + $0x38] sm:$0x1] %v725_v30  ;;  %v781_v36 = vsel %vm3437_vm2, %v578_v16, %v780_v59  ;;  %v727_v58 = vld [vmem:[#allocation2 + $0x3c] sm:$0xf]  ;;  %v585_v3 = vor.u32 %v583_v22, %v582_v48  ;;  %v458_v32 = vsel %vm3466_vm6, %v450_v5, %v457_v35  ;;  %v300_v40 = vsel %vm3486_vm8, 0, %v299_v4 }
  0x76   : > { %782 = vst [vmem:[#allocation2 + $0x98] sm:$0x1] %v781_v36  ;;  %v728_v15 = vsel %vm3475_vm7, %v449_v31, %v727_v58  ;;  %v1659_v50 = vsel %vm3617_vm12, %v1657_v39, %v1658_v0  ;;  %730 = vst.msk [vmem:[#allocation2 + $0x40] sm:$0xf] %vm696_vm5, %v458_v32  ;;  %v591_v46 = vshll.u32 %v366_v10, 16  ;;  %v324_v9 = vsel %vm3486_vm8, 0, %v323_v62 }
  0x77   : > { %2212 = vrot.lane.b32.xlu0 %v3893_v51, %s3390_s8  ;;  %729 = vst [vmem:[#allocation2 + $0x3c] sm:$0xf] %v728_v15  ;;  %v4053_v21 = vld [vmem:[#allocation2 + $0x94] sm:$0xf]  ;;  %301 = vst [vmem:[#allocation2 + $0x44] sm:$0x1] %v300_v40  ;;  %v4066_v14 = vcombine.low %v1656_v49, %v1659_v50 }
  0x78   : > { %v4060_v13 = vcombine.low %v4035_v54, %v4053_v21  ;;  %325 = vst [vmem:[#allocation2 + $0xa4] sm:$0x1] %v324_v9  ;;  %v246_v42 = vld [vmem:[#allocation2 + $0x48] sm:$0x1]  ;;  %v586_v60 = vrot.slane %v582_v48, 4  ;;  %v590_v57 = vrot.slane %v588_v37, 7 }
  0x79   : > { %2228 = vrot.lane.b32.xlu1 %v3908_v43, %s3390_s8  ;;  %v247_v17 = vsel %vm3437_vm2, 0, %v246_v42  ;;  %v1157_v33 = vshrl.u32 %v3944_v45, 16  ;;  %v1160_v31 = vshll.u32 %v3944_v45, 16  ;;  %v1349_v10 = vshrl.u32 %v4035_v54, 16  ;;  %v351_v53 = vld [vmem:[%s3455_s22 + $0x28] sm:$0xf] }
  0x7a   : > { %1053 = vst.msk [vmem:[#allocation3 + $0x60] sm:$0xff] %vm1040_vm9, %v4060_v13  ;;  %v593_v47 = vor.u32 %v591_v46, %v590_v57  ;;  %248 = vst [vmem:[#allocation2 + $0x48] sm:$0x1] %v247_v17  ;;  %v1352_v48 = vshll.u32 %v4035_v54, 16  ;;  %v595_v56 = vrot.slane %v590_v57, 4  ;;  %v1170_v0 = vshrl.u32 %v3946_v52, 16 }
  0x7b   : > { %1496 = vrot.lane.b32.xlu0 %v3865_v18, %s3386_s26  ;;  %v783_v18 = vld [vmem:[#allocation2 + $0x9c] sm:$0xf]  ;;  %v1159_v30 = vrot.slane %v1157_v33, 4  ;;  %v1162_v59 = vrot.slane %v1160_v31, 5  ;;  %v1166_v4 = vshll.u32 %v3946_v52, 16  ;;  %v461_v58 = vshrl.u32 %v351_v53, 16 }
  0x7c   : > { %v784_v16 = vsel %vm3475_vm7, %v585_v3, %v783_v18  ;;  %v594_v25 = vsel %vm3466_vm6, %v586_v60, %v593_v47  ;;  %v1351_v62 = vrot.slane %v1349_v10, 4  ;;  %v1354_v15 = vrot.slane %v1352_v48, 5  ;;  %v904_v9 = vld [vmem:[#allocation2 + $0x38] sm:$0x1]  ;;  %v352_v33 = vld [vmem:[%s3455_s22 + $0x2c] sm:$0xf] }
  0x7d   : > { %1512 = vrot.lane.b32.xlu1 %v3900_v11, %s3386_s26  ;;  %785 = vst [vmem:[#allocation2 + $0x9c] sm:$0xf] %v784_v16  ;;  %v459_v11 = vrot.slane %v4011_v63, 4  ;;  %v4085_v22 = vld [vmem:[#allocation2 + $0x40] sm:$0xf]  ;;  %v1362_v3 = vshrl.u32 %v4053_v21, 16  ;;  %v1163_v49 = vor.u32 %v1162_v59, %v1159_v30 }
  0x7e   : > { %v4077_v5 = vld [vmem:[#allocation2 + $0x3c] sm:$0xf]  ;;  %786 = vst.msk [vmem:[#allocation2 + $0xa0] sm:$0xf] %vm696_vm5, %v594_v25  ;;  %v731_v39 = vld [vmem:[#allocation2 + $0x44] sm:$0x1]  ;;  %v1355_v60 = vor.u32 %v1354_v15, %v1351_v62 }
  0x7f   : > { %2214 = vrot.lane.b32.xlu0 %v4041_v41, %s3390_s8  ;;  %v4093_v63 = vcombine.low %v4077_v5, %v4085_v22  ;;  %v787_v36 = vld [vmem:[#allocation2 + $0xa4] sm:$0x1]  ;;  %v732_v35 = vsel %vm3437_vm2, %v459_v11, %v731_v39  ;;  %v1358_v32 = vshll.u32 %v4053_v21, 16  ;;  %v4111_v50 = vrot.slane %v1166_v4, 5 }
  0x80   : > { %733 = vst [vmem:[#allocation2 + $0x44] sm:$0x1] %v732_v35  ;;  %v788_v40 = vsel %vm3437_vm2, %v595_v56, %v787_v36  ;;  %v1172_v46 = vrot.slane %v1170_v0, 4  ;;  %v4115_v42 = vrot.slane %v461_v58, 7  ;;  %v1606_v57 = vrot.slane %v3946_v52, 5 }
  0x81   : > { %2230 = vrot.lane.b32.xlu1 %v4066_v14, %s3390_s8  ;;  %1046 = vst.msk [vmem:[#allocation3 + $0x28] sm:$0xff] %vm1040_vm9, %v4093_v63  ;;  %789 = vst [vmem:[#allocation2 + $0xa4] sm:$0x1] %v788_v40  ;;  %v4126_v47 = vrot.slane %v1358_v32, 5  ;;  %v1364_v17 = vrot.slane %v1362_v3, 4  ;;  %v4129_v31 = vrot.slane %v1163_v49, 4 }
  0x82   : > { %v1173_v11 = vor.u32 %v1172_v46, %v4111_v50  ;;  %v1176_v25 = vshll.u32 %v904_v9, 16  ;;  %v3145_v10 = vrot.slane %v3944_v45, 9  ;;  %v3153_v52 = vrot.slane %v4035_v54, 9  ;;  %v734_v30 = vld [vmem:[#allocation2 + $0x48] sm:$0xf] }
  0x83   : > { %1498 = vrot.lane.b32.xlu0 %v3971_v12, %s3386_s26  ;;  %v1608_v56 = vrot.slane %v1606_v57, 4  ;;  %v1609_v39 = vrot.slane %v904_v9, 5  ;;  %v1662_v0 = vrot.slane %v4053_v21, 5  ;;  %v1365_v45 = vor.u32 %v1364_v17, %v4126_v47  ;;  %v270_v36 = vld [vmem:[#allocation2 + $0xa8] sm:$0x1] }
  0x84   : > { %v4107_v37 = vld [vmem:[#allocation2 + $0x9c] sm:$0xf]  ;;  %v469_v59 = vshrl.u32 %v352_v33, 16  ;;  %v472_v4 = vshll.u32 %v352_v33, 16  ;;  %v1169_v35 = vsel %vm3679_vm15, %v4129_v31, %v4111_v50  ;;  %v1174_v58 = vrot.slane %v1173_v11, 4 }
  0x85   : > { %1514 = vrot.lane.b32.xlu1 %v3997_v38, %s3386_s26  ;;  %v4113_v18 = vld [vmem:[#allocation2 + $0xa0] sm:$0xf]  ;;  %v1178_v62 = vrot.slane %v1176_v25, 5  ;;  %v1607_v21 = vsel %vm3617_vm12, %v3145_v10, %v1606_v57  ;;  %v4153_v15 = vsel %vm3617_vm12, %v3153_v52, %v1662_v0  ;;  %v367_v40 = vld [vmem:[%s3455_s22 + $0x68] sm:$0xf]  ;;  %v1610_v50 = vsel %vm3617_vm12, %v1608_v56, %v1609_v39 }
  0x86   : > { %v4122_v16 = vcombine.low %v4107_v37, %v4113_v18  ;;  %v4156_v3 = vrot.slane %v469_v59, 7  ;;  %v368_v49 = vld [vmem:[%s3455_s22 + $0x6c] sm:$0xf]  ;;  %v1664_v46 = vrot.slane %v1662_v0, 4  ;;  %v302_v17 = vld [vmem:[#allocation2 + $0x50] sm:$0x1]  ;;  %v4177_v52 = vcombine.low %v1607_v21, %v1610_v50 }
  0x87   : > { %1740 = vrot.lane.b32.xlu0 %v3893_v51, %s3384_s24  ;;  %v464_v51 = vshll.u32 %v351_v53, 16  ;;  %v4139_v53 = vrot.slane %v1355_v60, 4  ;;  %v1366_v60 = vrot.slane %v1365_v45, 4  ;;  %v326_v33 = vld [vmem:[#allocation2 + $0xb0] sm:$0x1]  ;;  %v1179_v31 = vsel %vm3679_vm15, %v1174_v58, %v1178_v62 }
  0x88   : > { %1054 = vst.msk [vmem:[#allocation3 + $0x68] sm:$0xff] %vm1040_vm9, %v4122_v16  ;;  %v474_v57 = vor.u32 %v472_v4, %v4156_v3  ;;  %v597_v11 = vshrl.u32 %v367_v40, 16  ;;  %v600_v25 = vshll.u32 %v367_v40, 16  ;;  %v249_v10 = vld [vmem:[#allocation2 + $0x54] sm:$0x1]  ;;  %v303_v45 = vsel %vm3486_vm8, 0, %v302_v17 }
  0x89   : > { %1756 = vrot.lane.b32.xlu1 %v3908_v43, %s3384_s24  ;;  %v928_v43 = vld [vmem:[#allocation2 + $0x98] sm:$0x1]  ;;  %v466_v48 = vor.u32 %v464_v51, %v4115_v42  ;;  %v271_v51 = vsel %vm3437_vm2, 0, %v270_v36  ;;  %v353_v56 = vld [vmem:[%s3455_s22 + $0x30] sm:$0xf]  ;;  %v4197_v59 = vcombine.low %v1169_v35, %v1179_v31  ;;  %v327_v36 = vsel %vm3486_vm8, 0, %v326_v33 }
  0x8a   : > { %v1368_v54 = vshll.u32 %v928_v43, 16  ;;  %v1665_v9 = vrot.slane %v928_v43, 5  ;;  %272 = vst [vmem:[#allocation2 + $0xa8] sm:$0x1] %v271_v51  ;;  %v605_v43 = vshrl.u32 %v368_v49, 16  ;;  %v599_v0 = vrot.slane %v597_v11, 7 }
  0x8b   : > { %1742 = vrot.lane.b32.xlu0 %v4041_v41, %s3384_s24  ;;  %v735_v32 = vsel %vm3475_vm7, %v466_v48, %v734_v30  ;;  %304 = vst [vmem:[#allocation2 + $0x50] sm:$0x1] %v303_v45  ;;  %v250_v58 = vsel %vm3437_vm2, 0, %v249_v10  ;;  %v1184_v62 = vshll.u32 %v4077_v5, 16  ;;  %328 = vst [vmem:[#allocation2 + $0xb0] sm:$0x1] %v327_v36 }
  0x8c   : > { %736 = vst [vmem:[#allocation2 + $0x48] sm:$0xf] %v735_v32  ;;  %v4187_v39 = vsel %vm3617_vm12, %v1664_v46, %v1665_v9  ;;  %v4190_v30 = vrot.slane %v605_v43, 7  ;;  %v602_v21 = vor.u32 %v600_v25, %v599_v0  ;;  %251 = vst [vmem:[#allocation2 + $0x54] sm:$0x1] %v250_v58  ;;  %v478_v35 = vshrl.u32 %v353_v56, 16 }
  0x8d   : > { %1758 = vrot.lane.b32.xlu1 %v4066_v14, %s3384_s24  ;;  %v481_v40 = vshll.u32 %v353_v56, 16  ;;  %v369_v46 = vld [vmem:[%s3455_s22 + $0x70] sm:$0xf]  ;;  %v1194_v51 = vshrl.u32 %v4085_v22, 16  ;;  %v1190_v11 = vshll.u32 %v4085_v22, 16  ;;  %v1373_v10 = vshrl.u32 %v4107_v37, 16 }
  0x8e   : > { %v612_v25 = vrot.slane %v4190_v30, 4  ;;  %v614_v43 = vshrl.u32 %v369_v46, 16  ;;  %v4236_v45 = vld [vmem:[%s3455_s22 + $0x74] sm:$0xf]  ;;  %v617_v36 = vshll.u32 %v369_v46, 16  ;;  %v1382_v58 = vshll.u32 %v4113_v18, 16 }
  0x8f   : > { %1810 = vrot.lane.b32.xlu0 %v3904_v26, %s3383_s23  ;;  %v467_v26 = vrot.slane %v4115_v42, 4  ;;  %v1361_v42 = vsel %vm3679_vm15, %v4139_v53, %v4126_v47  ;;  %v1181_v47 = vshrl.u32 %v4077_v5, 16  ;;  %v608_v53 = vshll.u32 %v368_v49, 16  ;;  %v4262_v46 = vld [vmem:[#allocation2 + $0x44] sm:$0x1] }
  0x90   : > { %vm1540_vm1 = vcmask 64544   ;;  %vm1784_vm3 = vcmask 97344   ;;  %vm1854_vm4 = vcmask 130144   ;;  %vm2669_vm11 = vcmask 64512  }
  0x91   : > { %1826 = vrot.lane.b32.xlu1 %v3925_v19, %s3383_s23  ;;  %v1370_v19 = vrot.slane %v1368_v54, 5  ;;  %v475_v48 = vsel %vm3466_vm6, %v467_v26, %v474_v57  ;;  %v354_v54 = vld [vmem:[%s3455_s22 + $0x34] sm:$0xf]  ;;  %v603_v26 = vrot.slane %v599_v0, 4  ;;  %v610_v32 = vor.u32 %v608_v53, %v4190_v30  ;;  %v790_v57 = vld [vmem:[#allocation2 + $0xa8] sm:$0xf] }
  0x92   : > { %737 = vst.msk [vmem:[#allocation2 + $0x4c] sm:$0xf] %vm696_vm5, %v475_v48  ;;  %v486_v49 = vshrl.u32 %v354_v54, 16  ;;  %v489_v50 = vshll.u32 %v354_v54, 16  ;;  %v791_v33 = vsel %vm3475_vm7, %v602_v21, %v790_v57  ;;  %v4227_v31 = vrot.slane %v1181_v47, 4 }
  0x93   : > { %1812 = vrot.lane.b32.xlu0 %v3960_v7, %s3383_s23  ;;  %v1371_v4 = vsel %vm3679_vm15, %v1366_v60, %v1370_v19  ;;  %v476_v60 = vrot.slane %v4156_v3, 4  ;;  %v611_v19 = vsel %vm3466_vm6, %v603_v26, %v610_v32  ;;  %v4218_v17 = vld [vmem:[#allocation2 + $0x48] sm:$0xf]  ;;  %792 = vst [vmem:[#allocation2 + $0xa8] sm:$0xf] %v791_v33  ;;  %v1376_v47 = vshll.u32 %v4107_v37, 16 }
  0x94   : > { %v4210_v9 = vcombine.low %v1361_v42, %v1371_v4  ;;  %793 = vst.msk [vmem:[#allocation2 + $0xac] sm:$0xf] %vm696_vm5, %v611_v19  ;;  %v4223_v42 = vrot.slane %v486_v49, 7  ;;  %v1386_v30 = vshrl.u32 %v4113_v18, 16  ;;  %v738_v4 = vld [vmem:[#allocation2 + $0x50] sm:$0x1] }
  0x95   : > { %1828 = vrot.lane.b32.xlu1 %v4060_v13, %s3383_s23  ;;  %v739_v21 = vsel %vm3437_vm2, %v476_v60, %v738_v4  ;;  %v794_v26 = vld [vmem:[#allocation2 + $0xb0] sm:$0x1]  ;;  %v4255_v49 = vrot.slane %v1190_v11, 5  ;;  %v622_v57 = vshrl.u32 %v4236_v45, 16  ;;  %v305_v33 = vld [vmem:[#allocation2 + $0x5c] sm:$0x1] }
  0x96   : > { %v491_v0 = vor.u32 %v489_v50, %v4223_v42  ;;  %v1196_v50 = vrot.slane %v1194_v51, 4  ;;  %740 = vst [vmem:[#allocation2 + $0x50] sm:$0x1] %v739_v21  ;;  %v4278_v11 = vrot.slane %v1382_v58, 5  ;;  %v306_v21 = vsel %vm3486_vm8, 0, %v305_v33 }
  0x97   : > { %1902 = vrot.lane.b32.xlu0 %v3971_v12, %s3387_s27  ;;  %v273_v12 = vld [vmem:[#allocation2 + $0xb4] sm:$0x1]  ;;  %307 = vst [vmem:[#allocation2 + $0x5c] sm:$0x1] %v306_v21  ;;  %v3146_v21 = vrot.slane %v4077_v5, 9 }
  0x98   : > { %v274_v3 = vsel %vm3437_vm2, 0, %v273_v12  ;;  %v741_v12 = vld [vmem:[#allocation2 + $0x54] sm:$0xf] }
  0x99   : > { %1918 = vrot.lane.b32.xlu1 %v3997_v38, %s3387_s27  ;;  %v480_v38 = vrot.slane %v478_v35, 7  ;;  %275 = vst [vmem:[#allocation2 + $0xb4] sm:$0x1] %v274_v3  ;;  %v4232_v48 = vld [vmem:[#allocation2 + $0x4c] sm:$0xf]  ;;  %v4253_v35 = vrot.slane %v614_v43, 7 }
  0x9a   : > { %v4244_v54 = vcombine.low %v4218_v17, %v4232_v48  ;;  %v1378_v3 = vrot.slane %v1376_v47, 5  ;;  %v1200_v43 = vshll.u32 %v4262_v46, 16  ;;  %v4294_v47 = vpop.permute.xlu1 %1822 }
  0x9b   : > { %1904 = vrot.lane.b32.xlu0 %v4197_v59, %s3387_s27  ;;  %v483_v53 = vor.u32 %v481_v40, %v480_v38  ;;  %v484_v56 = vrot.slane %v480_v38, 4  ;;  %v1186_v40 = vrot.slane %v1184_v62, 5  ;;  %v4270_v62 = vcombine.low %v4153_v15, %v4187_v39  ;;  %v4272_v51 = vld [vmem:[#allocation2 + $0xac] sm:$0xf] }
  0x9c   : > { %1047 = vst.msk [vmem:[#allocation3 + $0x30] sm:$0xff] %vm1040_vm9, %v4244_v54  ;;  %v619_v19 = vor.u32 %v617_v36, %v4253_v35  ;;  %v1375_v38 = vrot.slane %v1373_v10, 4  ;;  %v1197_v39 = vor.u32 %v1196_v50, %v4255_v49  ;;  %v625_v10 = vshll.u32 %v4236_v45, 16 }
  0x9d   : > { %1920 = vrot.lane.b32.xlu1 %v4210_v9, %s3387_s27  ;;  %v492_v32 = vsel %vm3466_vm6, %v484_v56, %v491_v0  ;;  %v742_v60 = vsel %vm3475_vm7, %v483_v53, %v741_v12  ;;  %v1187_v15 = vor.u32 %v1186_v40, %v4227_v31  ;;  %v4285_v53 = vld [vmem:[#allocation2 + $0xa4] sm:$0x1]  ;;  %v4298_v31 = vrot.slane %v622_v57, 7 }
  0x9e   : > { %744 = vst.msk [vmem:[#allocation2 + $0x58] sm:$0xf] %vm696_vm5, %v492_v32  ;;  %743 = vst [vmem:[#allocation2 + $0x54] sm:$0xf] %v742_v60  ;;  %v1379_v4 = vor.u32 %v1378_v3, %v1375_v38  ;;  %v1392_v45 = vshll.u32 %v4285_v53, 16  ;;  %v1198_v12 = vrot.slane %v1197_v39, 4  ;;  %v4329_v3 = vpop.permute.xlu1 %1824 }
  0x9f   : > { %1978 = vrot.lane.b32.xlu0 %v4041_v41, %s3385_s25  ;;  %v795_v41 = vsel %vm3437_vm2, %v612_v25, %v794_v26  ;;  %v4280_v25 = vld [vmem:[#allocation2 + $0xa8] sm:$0xf]  ;;  %v4310_v26 = vpop.permute.xlu0 %1806  ;;  %v1188_v32 = vrot.slane %v1187_v15, 4  ;;  %v1202_v40 = vrot.slane %v1200_v43, 5  ;;  %v1613_v43 = vrot.slane %v4085_v22, 5 }
  0xa0   : > { %796 = vst [vmem:[#allocation2 + $0xb0] sm:$0x1] %v795_v41  ;;  %v4289_v56 = vcombine.low %v4280_v25, %v4272_v51  ;;  %v797_v0 = vld [vmem:[#allocation2 + $0xb4] sm:$0xf]  ;;  %v627_v41 = vor.u32 %v625_v10, %v4298_v31  ;;  %v1394_v33 = vrot.slane %v1392_v45, 5 }
  0xa1   : > { %1994 = vrot.lane.b32.xlu1 %v4066_v14, %s3385_s25  ;;  %v1388_v14 = vrot.slane %v1386_v30, 4  ;;  %v798_v30 = vsel %vm3475_vm7, %v619_v19, %v797_v0  ;;  %v1380_v19 = vrot.slane %v1379_v4, 4  ;;  %v1193_v38 = vsel %vm3679_vm15, %v1188_v32, %v4255_v49  ;;  %v3355_v39 = vld [vmem:[%s5081_s1 + $0x10] ss:$0 sps:$4 sm:$0x33]  }
  0xa2   : > { %1055 = vst.msk [vmem:[#allocation3 + $0x70] sm:$0xff] %vm1040_vm9, %v4289_v56  ;;  %799 = vst [vmem:[#allocation2 + $0xb4] sm:$0xf] %v798_v30  ;;  %v745_v30 = vld [vmem:[#allocation2 + $0x5c] sm:$0x1]  ;;  %3303 = vmatprep.subr.msk.bf16.mxu0 %vm2362_vm0, %v3355_v39  ;;  %3304 = vmatprep.subr.msk.bf16.mxu1 %vm2362_vm0, %v3355_v39 }
  0xa3   : > { %1980 = vrot.lane.b32.xlu0 %v4177_v52, %s3385_s25  ;;  %v1389_v36 = vor.u32 %v1388_v14, %v4278_v11  ;;  %v329_v14 = vld [vmem:[#allocation2 + $0xbc] sm:$0x1]  ;;  %v1385_v0 = vsel %vm3679_vm15, %v1380_v19, %v4278_v11  ;;  %v371_v45 = vld [vmem:[%s3455_s22 + $0x78] sm:$0xf]  ;;  %v2364_v11 = vsel %vm2362_vm0, %v3355_v39, 0 }
  0xa4   : > { %v330_v4 = vsel %vm3486_vm8, 0, %v329_v14  ;;  %3264 = vmatpush3.bf16.msra.mxu0 %v2364_v11  ;;  %v372_v19 = vld [vmem:[%s3455_s22 + $0x7c] sm:$0xf]  ;;  %3302 = vmatpush3.bf16.msra.mxu1 %v2364_v11  ;;  %v634_v39 = vshll.u32 %v371_v45, 16  ;;  %s4845_s22 = scalar_lea.vmem %s5084_s4, %s3239_s13 }
  0xa5   : > { %1996 = vrot.lane.b32.xlu1 %v4270_v62, %s3385_s25  ;;  %v4306_v58 = vld [vmem:[#allocation2 + $0x58] sm:$0xf]  ;;  %v4312_v50 = vld [vmem:[#allocation2 + $0x54] sm:$0xf]  ;;  %v1390_v57 = vrot.slane %v1389_v36, 4  ;;  %v4341_v49 = vpop.permute.xlu0 %1808 }
  0xa6   : > { %v4320_v60 = vcombine.low %v4312_v50, %v4306_v58  ;;  %331 = vst [vmem:[#allocation2 + $0xbc] sm:$0x1] %v330_v4  ;;  %v276_v36 = vld [vmem:[#allocation2 + $0xc0] sm:$0x1]  ;;  %v3148_v32 = vrot.slane %v4312_v50, 9  ;;  %v1627_v5 = vrot.slane %v4306_v58, 5 }
  0xa7   : > { %2048 = vrot.lane.b32.xlu0 %v3960_v7, %s3388_s28  ;;  %v620_v7 = vrot.slane %v4253_v35, 4  ;;  %v1203_v35 = vsel %vm3679_vm15, %v1198_v12, %v1202_v40  ;;  %v1395_v10 = vsel %vm3679_vm15, %v1390_v57, %v1394_v33  ;;  %v1615_v57 = vrot.slane %v1613_v43, 4 }
  0xa8   : > { %1048 = vst.msk [vmem:[#allocation3 + $0x38] sm:$0xff] %vm1040_vm9, %v4320_v60  ;;  %v4363_v12 = vcombine.low %v1385_v0, %v1395_v10  ;;  %v1616_v33 = vrot.slane %v4262_v46, 5  ;;  %v1628_v14 = vsel %vm3617_vm12, %v3148_v32, %v1627_v5  ;;  %v332_v0 = vld [vmem:[#allocation2 + $0xc8] sm:$0x1]  ;;  %v1614_v46 = vsel %vm3617_vm12, %v3146_v21, %v1613_v43  ;;  %v279_v32 = vld [vmem:[#allocation2 + $0xcc] sm:$0x1] }
  0xa9   : > { %2064 = vrot.lane.b32.xlu1 %v4060_v13, %s3388_s28  ;;  %v493_v13 = vrot.slane %v4223_v42, 4  ;;  %v628_v15 = vsel %vm3466_vm6, %v620_v7, %v627_v41  ;;  %v4347_v42 = vcombine.low %v1193_v38, %v1203_v35  ;;  %v3154_v7 = vrot.slane %v4107_v37, 9  ;;  %v4374_v38 = vld [vmem:[#allocation2 + $0xb4] sm:$0xf] }
  0xaa   : > { %800 = vst.msk [vmem:[#allocation2 + $0xb8] sm:$0xf] %vm696_vm5, %v628_v15  ;;  %v1669_v41 = vrot.slane %v4113_v18, 5  ;;  %v277_v35 = vsel %vm3437_vm2, 0, %v276_v36  ;;  %v629_v18 = vrot.slane %v4298_v31, 4  ;;  %v3156_v15 = vrot.slane %v4374_v38, 9 }
  0xab   : > { %2050 = vrot.lane.b32.xlu0 %v4093_v63, %s3388_s28  ;;  %v746_v22 = vsel %vm3437_vm2, %v493_v13, %v745_v30  ;;  %v631_v13 = vshrl.u32 %v371_v45, 16  ;;  %278 = vst [vmem:[#allocation2 + $0xc0] sm:$0x1] %v277_v35  ;;  %v639_v4 = vshrl.u32 %v372_v19, 16  ;;  %v1672_v36 = vrot.slane %v4285_v53, 5 }
  0xac   : > { %747 = vst [vmem:[#allocation2 + $0x5c] sm:$0x1] %v746_v22  ;;  %v642_v22 = vshll.u32 %v372_v19, 16  ;;  %v1671_v31 = vrot.slane %v1669_v41, 4  ;;  %v1629_v21 = vrot.slane %v1627_v5, 4  ;;  %v1617_v53 = vsel %vm3617_vm12, %v1615_v57, %v1616_v33 }
  0xad   : > { %2066 = vrot.lane.b32.xlu1 %v4122_v16, %s3388_s28  ;;  %v4365_v40 = vpop.permute.xlu1 %1752  ;;  %v633_v30 = vrot.slane %v631_v13, 7  ;;  %v801_v43 = vld [vmem:[#allocation2 + $0xbc] sm:$0x1]  ;;  %v641_v19 = vrot.slane %v639_v4, 7  ;;  %v333_v13 = vsel %vm3486_vm8, 0, %v332_v0  ;;  %v1670_v33 = vsel %vm3617_vm12, %v3154_v7, %v1669_v41 }
  0xae   : > { %v802_v27 = vsel %vm3437_vm2, %v629_v18, %v801_v43  ;;  %334 = vst [vmem:[#allocation2 + $0xc8] sm:$0x1] %v333_v13  ;;  %v280_v18 = vsel %vm3437_vm2, 0, %v279_v32 }
  0xaf   : > { %2140 = vrot.lane.b32.xlu0 %v4197_v59, %s3389_s5  ;;  %v637_v35 = vrot.slane %v633_v30, 4  ;;  %v636_v4 = vor.u32 %v634_v39, %v633_v30  ;;  %803 = vst [vmem:[#allocation2 + $0xbc] sm:$0x1] %v802_v27  ;;  %v644_v8 = vor.u32 %v642_v22, %v641_v19  ;;  %v1673_v27 = vsel %vm3617_vm12, %v1671_v31, %v1672_v36 }
  0xb0   : > { %281 = vst [vmem:[#allocation2 + $0xcc] sm:$0x1] %v280_v18  ;;  %v646_v32 = vrot.slane %v641_v19, 4  ;;  %v4440_v24 = vcombine.low %v1670_v33, %v1673_v27 }
  0xb1   : > { %2156 = vrot.lane.b32.xlu1 %v4210_v9, %s3389_s5  ;;  %v4378_v37 = vpop.permute.xlu0 %1736  ;;  %v4386_v10 = vld [vmem:[#allocation2 + $0xb8] sm:$0xf]  ;;  %v645_v30 = vsel %vm3466_vm6, %v637_v35, %v644_v8  ;;  %vm2022_vm6 = vcmask 195744  }
  0xb2   : > { %v4393_v11 = vcombine.low %v4374_v38, %v4386_v10  ;;  %v1683_v45 = vrot.slane %v4386_v10, 5  ;;  %v804_v22 = vld [vmem:[#allocation2 + $0xc0] sm:$0xf]  ;;  %807 = vst.msk [vmem:[#allocation2 + $0xc4] sm:$0xf] %vm696_vm5, %v645_v30  ;;  %vm1946_vm5 = vcmask 162944  }
  0xb3   : > { %2142 = vrot.lane.b32.xlu0 %v4347_v42, %s3389_s5  ;;  %v4406_v2 = vld [vmem:[#allocation2 + $0x5c] sm:$0x1] }
  0xb4   : > { %1056 = vst.msk [vmem:[#allocation3 + $0x78] sm:$0xff] %vm1040_vm9, %v4393_v11  ;;  %v1684_v5 = vsel %vm3617_vm12, %v3156_v15, %v1683_v45  ;;  %v1630_v0 = vrot.slane %v4406_v2, 5  ;;  %v4421_v15 = vcombine.low %v1614_v46, %v1617_v53  ;;  %v336_v46 = vsel %vm3486_vm8, 0, %v335_v6 }
  0xb5   : > { %2158 = vrot.lane.b32.xlu1 %v4363_v12, %s3389_s5  ;;  %337 = vst [vmem:[#allocation2 + $0xd4] sm:$0x1] %v336_v46  ;;  %v808_v31 = vld [vmem:[#allocation2 + $0xc8] sm:$0x1]  ;;  %v1208_v53 = vshll.u32 %v4218_v17, 16  ;;  %vm2260_vm8 = vcmask 294144  }
  0xb6   : > { %v1631_v39 = vsel %vm3617_vm12, %v1629_v21, %v1630_v0  ;;  %v4446_v44 = vld [vmem:[#allocation2 + $0xbc] sm:$0x1]  ;;  %v809_v6 = vsel %vm3437_vm2, %v646_v32, %v808_v31  ;;  %v1205_v21 = vshrl.u32 %v4218_v17, 16  ;;  %v1214_v0 = vshll.u32 %v4232_v48, 16 }
  0xb7   : > { %2216 = vrot.lane.b32.xlu0 %v4177_v52, %s3390_s8  ;;  %v4400_v55 = vpop.permute.xlu1 %1754  ;;  %v4431_v41 = vcombine.low %v1628_v14, %v1631_v39  ;;  %v1685_v14 = vrot.slane %v1683_v45, 4  ;;  %810 = vst [vmem:[#allocation2 + $0xc8] sm:$0x1] %v809_v6  ;;  %v883_v45 = vld [vmem:[#allocation2 + $0xcc] sm:$0xf]  ;;  %v1210_v18 = vrot.slane %v1208_v53, 5 }
  0xb8   : > { %v884_v19 = vsel %vm3475_vm7, %v3534_v34, %v883_v45  ;;  %v1216_v27 = vrot.slane %v1214_v0, 5  ;;  %v1676_v53 = vrot.slane %v4272_v51, 5  ;;  %vm2313_vm9 = vcmask 293888  }
  0xb9   : > { %2232 = vrot.lane.b32.xlu1 %v4270_v62, %s3390_s8  ;;  %v1739_v57 = vpop.permute.xlu0 %1738  ;;  %885 = vst [vmem:[#allocation2 + $0xcc] sm:$0xf] %v884_v19 }
  0xbb   : > { %1500 = vrot.lane.b32.xlu0 %v4197_v59, %s3386_s26  ;;  %v4429_v7 = vpop.permute.xlu1 %1990  ;;  %v805_v59 = vsel %vm3475_vm7, %v636_v4, %v804_v22  ;;  %v1218_v4 = vshrl.u32 %v4232_v48, 16  ;;  %vm2184_vm7 = vcmask 261344  }
  0xbc   : > { %806 = vst [vmem:[#allocation2 + $0xc0] sm:$0xf] %v805_v59  ;;  %v887_v29 = vld [vmem:[#allocation2 + $0xd4] sm:$0x1]  ;;  %v934_v59 = vld [vmem:[#allocation2 + $0xb0] sm:$0x1] }
  0xbd   : > { %1516 = vrot.lane.b32.xlu1 %v4210_v9, %s3386_s26  ;;  %v4442_v8 = vpop.permute.xlu0 %1974  ;;  %v1686_v9 = vrot.slane %v4446_v44, 5  ;;  %v1220_v39 = vrot.slane %v1218_v4, 4 }
  0xbf   : > { %2218 = vrot.lane.b32.xlu0 %v4421_v15, %s3390_s8  ;;  %v1495_v36 = vpop.permute.xlu1 %1494  ;;  %v1687_v35 = vsel %vm3617_vm12, %v1685_v14, %v1686_v9 }
  0xc0   : > { %1542 = vst.msk [vmem:[#allocation3 + $0x8] sm:$0xff] %vm1540_vm1, %v1495_v36 }
  0xc1   : > { %2234 = vrot.lane.b32.xlu1 %v4440_v24, %s3390_s8  ;;  %1786 = vst.msk [vmem:[#allocation3 + $0x8] sm:$0xff] %vm1784_vm3, %v1739_v57  ;;  %v1493_v43 = vpop.permute.xlu0 %1492  ;;  %v1406_v57 = vshll.u32 %v4272_v51, 16 }
  0xc2   : > { %1541 = vst.msk [vmem:[#allocation3] sm:$0xff] %vm1540_vm1, %v1493_v43 }
  0xc3   : > { %1502 = vrot.lane.b32.xlu0 %v4347_v42, %s3386_s26  ;;  %1856 = vst.msk [vmem:[#allocation3 + $0x8] sm:$0xff] %vm1854_vm4, %v4341_v49  ;;  %v1511_v13 = vpop.permute.xlu1 %1510  ;;  %v4471_v49 = vcombine.low %v1684_v5, %v1687_v35  ;;  %v1400_v5 = vshll.u32 %v4280_v25, 16  ;;  %v1408_v30 = vrot.slane %v1406_v57, 5 }
  0xc4   : > { %1785 = vst.msk [vmem:[#allocation3] sm:$0xff] %vm1784_vm3, %v4378_v37  ;;  %v1410_v37 = vshrl.u32 %v4272_v51, 16  ;;  %v3155_v51 = vrot.slane %v4280_v25, 9 }
  0xc5   : > { %1550 = vst.msk [vmem:[#allocation3 + $0x48] sm:$0xff] %vm1540_vm1, %v1511_v13  ;;  %1518 = vrot.lane.b32.xlu1 %v4363_v12, %s3386_s26  ;;  %v1509_v34 = vpop.permute.xlu0 %1508 }
  0xc6   : > { %1855 = vst.msk [vmem:[#allocation3] sm:$0xff] %vm1854_vm4, %v4310_v26  ;;  %v1397_v26 = vshrl.u32 %v4280_v25, 16  ;;  %v1412_v22 = vrot.slane %v1410_v37, 4  ;;  %v1238_v25 = vshll.u32 %v4306_v58, 16 }
  0xc7   : > { %1794 = vst.msk [vmem:[#allocation3 + $0x48] sm:$0xff] %vm1784_vm3, %v4400_v55  ;;  %1744 = vrot.lane.b32.xlu0 %v4177_v52, %s3384_s24  ;;  %v888_v55 = vsel %vm3437_vm2, %v3573_v61, %v887_v29  ;;  %v1915_v33 = vpop.permute.xlu1 %1914  ;;  %v1207_v52 = vrot.slane %v1205_v21, 4  ;;  %vm2092_vm2 = vcmask 228544  }
  0xc8   : > { %1549 = vst.msk [vmem:[#allocation3 + $0x40] sm:$0xff] %vm1540_vm1, %v1509_v34  ;;  %889 = vst [vmem:[#allocation2 + $0xd4] sm:$0x1] %v888_v55  ;;  %v1399_v61 = vrot.slane %v1397_v26, 4  ;;  %v1413_v14 = vor.u32 %v1412_v22, %v1408_v30 }
  0xc9   : > { %1864 = vst.msk [vmem:[#allocation3 + $0x48] sm:$0xff] %vm1854_vm4, %v4329_v3  ;;  %v910_v3 = vld [vmem:[#allocation2 + $0x50] sm:$0x1]  ;;  %1760 = vrot.lane.b32.xlu1 %v4270_v62, %s3384_s24  ;;  %v1899_v1 = vpop.permute.xlu0 %1898  ;;  %v1221_v62 = vor.u32 %v1220_v39, %v1216_v27 }
  0xca   : > { %1793 = vst.msk [vmem:[#allocation3 + $0x40] sm:$0xff] %vm1784_vm3, %v4365_v40  ;;  %v1402_v40 = vrot.slane %v1400_v5, 5  ;;  %v1224_v32 = vshll.u32 %v910_v3, 16  ;;  %v1414_v45 = vrot.slane %v1413_v14, 4  ;;  %v1623_v34 = vrot.slane %v910_v3, 5 }
  0xcb   : > { %1863 = vst.msk [vmem:[#allocation3 + $0x40] sm:$0xff] %vm1854_vm4, %v4294_v47  ;;  %1746 = vrot.lane.b32.xlu0 %v4421_v15, %s3384_s24  ;;  %v1211_v47 = vor.u32 %v1210_v18, %v1207_v52  ;;  %v1222_v36 = vrot.slane %v1221_v62, 4  ;;  %v1679_v5 = vrot.slane %v934_v59, 5  ;;  %v1232_v52 = vshll.u32 %v4312_v50, 16 }
  0xcc   : > { %1955 = vst.msk [vmem:[#allocation3 + $0x40] sm:$0xff] %vm1946_vm5, %v1915_v33  ;;  %1947 = vst.msk [vmem:[#allocation3] sm:$0xff] %vm1946_vm5, %v1899_v1  ;;  %v1403_v46 = vor.u32 %v1402_v40, %v1399_v61  ;;  %v1226_v6 = vrot.slane %v1224_v32, 5  ;;  %v1242_v18 = vshrl.u32 %v4306_v58, 16  ;;  %v1677_v3 = vsel %vm3617_vm12, %v3155_v51, %v1676_v53 }
  0xcd   : > { %2031 = vst.msk [vmem:[#allocation3 + $0x40] sm:$0xff] %vm2022_vm6, %v4429_v7  ;;  %2023 = vst.msk [vmem:[#allocation3] sm:$0xff] %vm2022_vm6, %v4442_v8  ;;  %1762 = vrot.lane.b32.xlu1 %v4440_v24, %s3384_s24  ;;  %v1416_v7 = vshll.u32 %v934_v59, 16  ;;  %v1212_v31 = vrot.slane %v1211_v47, 4  ;;  %v1620_v8 = vrot.slane %v4232_v48, 5  ;;  %v3147_v48 = vrot.slane %v4218_v17, 9 }
  0xce   : > { %v1404_v43 = vrot.slane %v1403_v46, 4  ;;  %v1227_v19 = vsel %vm3679_vm15, %v1222_v36, %v1226_v6  ;;  %v1421_v58 = vshrl.u32 %v4374_v38, 16  ;;  %v1424_v1 = vshll.u32 %v4374_v38, 16 }
  0xcf   : > { %1814 = vrot.lane.b32.xlu0 %v4093_v63, %s3383_s23  ;;  %v1418_v63 = vrot.slane %v1416_v7, 5  ;;  %v1217_v35 = vsel %vm3679_vm15, %v1212_v31, %v1216_v27  ;;  %v1622_v13 = vrot.slane %v1620_v8, 4  ;;  %v1621_v57 = vsel %vm3617_vm12, %v3147_v48, %v1620_v8 }
  0xd0   : > { %v4528_v4 = vcombine.low %v1217_v35, %v1227_v19  ;;  %v1409_v0 = vsel %vm3679_vm15, %v1404_v43, %v1408_v30  ;;  %v1434_v61 = vshrl.u32 %v4386_v10, 16  ;;  %v1430_v40 = vshll.u32 %v4386_v10, 16 }
  0xd1   : > { %v1901_v9 = vpop.permute.xlu0 %1900  ;;  %1830 = vrot.lane.b32.xlu1 %v4122_v16, %s3383_s23  ;;  %v1419_v29 = vsel %vm3679_vm15, %v1414_v45, %v1418_v63  ;;  %v1624_v55 = vsel %vm3617_vm12, %v1622_v13, %v1623_v34  ;;  %v1234_v47 = vrot.slane %v1232_v52, 5  ;;  %v1240_v62 = vrot.slane %v1238_v25, 5 }
  0xd2   : > { %1948 = vst.msk [vmem:[#allocation3 + $0x8] sm:$0xff] %vm1946_vm5, %v1901_v9  ;;  %v4538_v17 = vcombine.low %v1409_v0, %v1419_v29  ;;  %v4555_v39 = vcombine.low %v1621_v57, %v1624_v55  ;;  %v1244_v32 = vrot.slane %v1242_v18, 4  ;;  %v1423_v38 = vrot.slane %v1421_v58, 4 }
  0xd3   : > { %1816 = vrot.lane.b32.xlu0 %v4244_v54, %s3383_s23  ;;  %v1917_v21 = vpop.permute.xlu1 %1916  ;;  %v1426_v10 = vrot.slane %v1424_v1, 5  ;;  %v1432_v46 = vrot.slane %v1430_v40, 5  ;;  %v1436_v14 = vrot.slane %v1434_v61, 4  ;;  %v1248_v6 = vshll.u32 %v4406_v2, 16 }
  0xd4   : > { %1956 = vst.msk [vmem:[#allocation3 + $0x48] sm:$0xff] %vm1946_vm5, %v1917_v21  ;;  %v1245_v36 = vor.u32 %v1244_v32, %v1240_v62  ;;  %v1440_v43 = vshll.u32 %v4446_v44, 16 }
  0xd5   : > { %v1977_v16 = vpop.permute.xlu0 %1976  ;;  %1832 = vrot.lane.b32.xlu1 %v4289_v56, %s3383_s23  ;;  %v1437_v8 = vor.u32 %v1436_v14, %v1432_v46  ;;  %v1250_v2 = vrot.slane %v1248_v6, 5 }
  0xd6   : > { %2024 = vst.msk [vmem:[#allocation3 + $0x8] sm:$0xff] %vm2022_vm6, %v1977_v16  ;;  %v1246_v21 = vrot.slane %v1245_v36, 4  ;;  %v1442_v16 = vrot.slane %v1440_v43, 5 }
  0xd7   : > { %1906 = vrot.lane.b32.xlu0 %v4347_v42, %s3387_s27  ;;  %v1993_v37 = vpop.permute.xlu1 %1992  ;;  %v1678_v42 = vrot.slane %v1676_v53, 4  ;;  %v1438_v19 = vrot.slane %v1437_v8, 4 }
  0xd8   : > { %2032 = vst.msk [vmem:[#allocation3 + $0x48] sm:$0xff] %vm2022_vm6, %v1993_v37  ;;  %v1251_v13 = vsel %vm3679_vm15, %v1246_v21, %v1250_v2 }
  0xd9   : > { %v2045_v26 = vpop.permute.xlu0 %2044  ;;  %1922 = vrot.lane.b32.xlu1 %v4363_v12, %s3387_s27  ;;  %v1229_v12 = vshrl.u32 %v4312_v50, 16  ;;  %v1680_v50 = vsel %vm3617_vm12, %v1678_v42, %v1679_v5  ;;  %v1443_v29 = vsel %vm3679_vm15, %v1438_v19, %v1442_v16 }
  0xda   : > { %2093 = vst.msk [vmem:[#allocation3] sm:$0xff] %vm2092_vm2, %v2045_v26 }
  0xdb   : > { %1908 = vrot.lane.b32.xlu0 %v4528_v4, %s3387_s27  ;;  %v2061_v33 = vpop.permute.xlu1 %2060  ;;  %v1231_v22 = vrot.slane %v1229_v12, 4 }
  0xdc   : > { %2101 = vst.msk [vmem:[#allocation3 + $0x40] sm:$0xff] %vm2092_vm2, %v2061_v33 }
  0xdd   : > { %v2047_v27 = vpop.permute.xlu0 %2046  ;;  %1924 = vrot.lane.b32.xlu1 %v4538_v17, %s3387_s27  ;;  %v1235_v31 = vor.u32 %v1234_v47, %v1231_v22 }
  0xde   : > { %2094 = vst.msk [vmem:[#allocation3 + $0x8] sm:$0xff] %vm2092_vm2, %v2047_v27 }
  0xdf   : > { %1982 = vrot.lane.b32.xlu0 %v4421_v15, %s3385_s25  ;;  %v2063_v30 = vpop.permute.xlu1 %2062  ;;  %v4571_v15 = vcombine.low %v1677_v3, %v1680_v50  ;;  %v1236_v63 = vrot.slane %v1235_v31, 4  ;;  %v4641_v50 = vld [vmem:[#allocation2 + $0xc0] sm:$0xf] }
  0xe0   : > { %2102 = vst.msk [vmem:[#allocation3 + $0x48] sm:$0xff] %vm2092_vm2, %v2063_v30  ;;  %v1872_v1 = vshrl.u32 %v4641_v50, 16  ;;  %v1875_v61 = vshll.u32 %v4641_v50, 16  ;;  %v3175_v19 = vrot.slane %v4641_v50, 9 }
  0xe1   : > { %v2137_v59 = vpop.permute.xlu0 %2136  ;;  %1998 = vrot.lane.b32.xlu1 %v4440_v24, %s3385_s25  ;;  %v1427_v24 = vor.u32 %v1426_v10, %v1423_v38  ;;  %v1241_v44 = vsel %vm3679_vm15, %v1236_v63, %v1240_v62  ;;  %v940_v10 = vld [vmem:[#allocation2 + $0xc8] sm:$0x1] }
  0xe2   : > { %2185 = vst.msk [vmem:[#allocation3] sm:$0xff] %vm2184_vm7, %v2137_v59  ;;  %v1877_v62 = vrot.slane %v1875_v61, 5 }
  0xe3   : > { %1984 = vrot.lane.b32.xlu0 %v4555_v39, %s3385_s25  ;;  %v2153_v7 = vpop.permute.xlu1 %2152 }
  0xe4   : > { %2193 = vst.msk [vmem:[#allocation3 + $0x40] sm:$0xff] %vm2184_vm7, %v2153_v7  ;;  %v1891_v7 = vshll.u32 %v940_v10, 16 }
  0xe5   : > { %v2139_v9 = vpop.permute.xlu0 %2138  ;;  %2000 = vrot.lane.b32.xlu1 %v4571_v15, %s3385_s25 }
  0xe6   : > { %2186 = vst.msk [vmem:[#allocation3 + $0x8] sm:$0xff] %vm2184_vm7, %v2139_v9 }
  0xe7   : > { %2052 = vrot.lane.b32.xlu0 %v4244_v54, %s3388_s28  ;;  %v2155_v45 = vpop.permute.xlu1 %2154  ;;  %v1428_v54 = vrot.slane %v1427_v24, 4  ;;  %v1893_v24 = vrot.slane %v1891_v7, 5 }
  0xe8   : > { %2194 = vst.msk [vmem:[#allocation3 + $0x48] sm:$0xff] %vm2184_vm7, %v2155_v45 }
  0xe9   : > { %v2213_v35 = vpop.permute.xlu0 %2212  ;;  %2068 = vrot.lane.b32.xlu1 %v4289_v56, %s3388_s28  ;;  %v4599_v56 = vcombine.low %v1241_v44, %v1251_v13  ;;  %v1433_v0 = vsel %vm3679_vm15, %v1428_v54, %v1432_v46  ;;  %v5109_v54 = vld [vmem:[#allocation8_spill] sm:$0xff]  ;;  %v4692_v44 = vld [vmem:[#allocation2 + $0xd0] sm:$0xf] }
  0xea   : > { %2261 = vst.msk [vmem:[#allocation3] sm:$0xff] %vm2260_vm8, %v2213_v35  ;;  %v4610_v51 = vcombine.low %v1433_v0, %v1443_v29  ;;  %v2123_v0 = vshrl.u32 %v4692_v44, 16  ;;  %v2119_v29 = vshll.u32 %v4692_v44, 16 }
  0xeb   : > { %2054 = vrot.lane.b32.xlu0 %v4320_v60, %s3388_s28  ;;  %v2229_v48 = vpop.permute.xlu1 %2228 }
  0xec   : > { %2269 = vst.msk [vmem:[#allocation3 + $0x40] sm:$0xff] %vm2260_vm8, %v2229_v48  ;;  %v1969_v48 = vrot.slane %v940_v10, 5 }
  0xed   : > { %v1497_v53 = vpop.permute.xlu0 %1496  ;;  %2070 = vrot.lane.b32.xlu1 %v4393_v11, %s3388_s28 }
  0xee   : > { %1543 = vst.msk [vmem:[#allocation3 + $0x10] sm:$0xff] %vm1540_vm1, %v1497_v53  ;;  %v4694_v53 = vld [vmem:[#allocation2 + $0xcc] sm:$0xf] }
  0xef   : > { %2144 = vrot.lane.b32.xlu0 %v4528_v4, %s3389_s5  ;;  %v1513_v34 = vpop.permute.xlu1 %1512  ;;  %v3179_v20 = vrot.slane %v4694_v53, 9 }
  0xf0   : > { %1551 = vst.msk [vmem:[#allocation3 + $0x50] sm:$0xff] %vm1540_vm1, %v1513_v34 }
  0xf1   : > { %v2215_v37 = vpop.permute.xlu0 %2214  ;;  %v2277_v26 = vld [vmem:[#allocation3] sm:$0xff]  ;;  %2160 = vrot.lane.b32.xlu1 %v4538_v17, %s3389_s5 }
  0xf2   : > { %2262 = vst.msk [vmem:[#allocation3 + $0x8] sm:$0xff] %vm2260_vm8, %v2215_v37  ;;  %3265 = vmatprep.mubr.msk.bf16.mxu0 %vm2313_vm9, %v2277_v26  ;;  %v2110_v26 = vshrl.u32 %v4694_v53, 16 }
  0xf3   : > { %2146 = vrot.lane.b32.xlu0 %v4599_v56, %s3389_s5  ;;  %v2231_v42 = vpop.permute.xlu1 %2230  ;;  %v2285_v5 = vld [vmem:[#allocation3 + $0x40] sm:$0xff] }
  0xf4   : > { %2270 = vst.msk [vmem:[#allocation3 + $0x48] sm:$0xff] %vm2260_vm8, %v2231_v42  ;;  %3281 = vmatprep.mubr.msk.bf16.mxu1 %vm2313_vm9, %v2285_v5 }
  0xf5   : > { %v1499_v57 = vpop.permute.xlu0 %1498  ;;  %2162 = vrot.lane.b32.xlu1 %v4610_v51, %s3389_s5 }
  0xf6   : > { %1544 = vst.msk [vmem:[#allocation3 + $0x18] sm:$0xff] %vm1540_vm1, %v1499_v57  ;;  %v5110_v57 = vld [vmem:[#allocation5_spill] sm:$0xff] }
  0xf7   : > { %2220 = vrot.lane.b32.xlu0 %v4555_v39, %s3390_s8  ;;  %v1515_v55 = vpop.permute.xlu1 %1514 }
  0xf8   : > { %1552 = vst.msk [vmem:[#allocation3 + $0x58] sm:$0xff] %vm1540_vm1, %v1515_v55  ;;  %v2112_v55 = vrot.slane %v2110_v26, 4 }
  0xf9   : > { %v1741_v33 = vpop.permute.xlu0 %1740  ;;  %v2278_v12 = vld [vmem:[#allocation3 + $0x8] sm:$0xff]  ;;  %2236 = vrot.lane.b32.xlu1 %v4571_v15, %s3390_s8 }
  0xfa   : > { %1787 = vst.msk [vmem:[#allocation3 + $0x10] sm:$0xff] %vm1784_vm3, %v1741_v33  ;;  %3266 = vmatmul.mubr.msk.bf16.vlgmr.msra.gmra.mrb[0].mxu0 %vm2313_vm9, %v2278_v12  ;;  %v2121_v12 = vrot.slane %v2119_v29, 5 }
  0xfb   : > { %1504 = vrot.lane.b32.xlu0 %v4528_v4, %s3386_s26  ;;  %v1757_v52 = vpop.permute.xlu1 %1756  ;;  %v2286_v18 = vld [vmem:[#allocation3 + $0x48] sm:$0xff] }
  0xfc   : > { %1795 = vst.msk [vmem:[#allocation3 + $0x50] sm:$0xff] %vm1784_vm3, %v1757_v52  ;;  %3282 = vmatmul.mubr.msk.bf16.vlgmr.msra.gmra.mrb[0].mxu1 %vm2313_vm9, %v2286_v18  ;;  %v2125_v52 = vrot.slane %v2123_v0, 4 }
  0xfd   : > { %v1743_v25 = vpop.permute.xlu0 %1742  ;;  %1520 = vrot.lane.b32.xlu1 %v4538_v17, %s3386_s26  ;;  %v4643_v17 = vld [vmem:[#allocation2 + $0xc4] sm:$0xf] }
  0xfe   : > { %1788 = vst.msk [vmem:[#allocation3 + $0x18] sm:$0xff] %vm1784_vm3, %v1743_v25  ;;  %v1885_v40 = vshrl.u32 %v4643_v17, 16  ;;  %v1881_v30 = vshll.u32 %v4643_v17, 16  ;;  %v3173_v6 = vcombine.low %v4641_v50, %v4643_v17  ;;  %v1966_v63 = vrot.slane %v4643_v17, 5  ;;  %v943_v25 = vld [vmem:[#allocation2 + $0xd4] sm:$0x1] }
  0xff   : > { %2222 = vrot.lane.b32.xlu0 %v4431_v41, %s3390_s8  ;;  %v1759_v27 = vpop.permute.xlu1 %1758 }
 0x100   : > { %1796 = vst.msk [vmem:[#allocation3 + $0x58] sm:$0xff] %vm1784_vm3, %v1759_v27  ;;  %v1883_v32 = vrot.slane %v1881_v30, 5  ;;  %v1887_v59 = vrot.slane %v1885_v40, 4  ;;  %v1968_v16 = vrot.slane %v1966_v63, 4  ;;  %v1967_v34 = vsel %vm3617_vm12, %v3175_v19, %v1966_v63 }
 0x101   : > { %v1811_v3 = vpop.permute.xlu0 %1810  ;;  %2238 = vrot.lane.b32.xlu1 %v4471_v49, %s3390_s8 }
 0x102   : > { %1857 = vst.msk [vmem:[#allocation3 + $0x10] sm:$0xff] %vm1854_vm4, %v1811_v3  ;;  %v1888_v14 = vor.u32 %v1887_v59, %v1883_v32  ;;  %v1970_v37 = vsel %vm3617_vm12, %v1968_v16, %v1969_v48  ;;  %v2126_v3 = vor.u32 %v2125_v52, %v2121_v12 }
 0x103   : > { %1506 = vrot.lane.b32.xlu0 %v4599_v56, %s3386_s26  ;;  %v1827_v4 = vpop.permute.xlu1 %1826 }
 0x104   : > { %1865 = vst.msk [vmem:[#allocation3 + $0x50] sm:$0xff] %vm1854_vm4, %v1827_v4  ;;  %v2129_v4 = vshll.u32 %v943_v25, 16  ;;  %v2127_v40 = vrot.slane %v2126_v3, 4 }
 0x105   : > { %v1813_v58 = vpop.permute.xlu0 %1812  ;;  %1522 = vrot.lane.b32.xlu1 %v4610_v51, %s3386_s26 }
 0x106   : > { %1858 = vst.msk [vmem:[#allocation3 + $0x18] sm:$0xff] %vm1854_vm4, %v1813_v58  ;;  %v3177_v58 = vcombine.low %v4694_v53, %v4692_v44 }
 0x107   : > { %1748 = vrot.lane.b32.xlu0 %v4555_v39, %s3384_s24  ;;  %v1829_v22 = vpop.permute.xlu1 %1828  ;;  %v1874_v39 = vrot.slane %v1872_v1, 4  ;;  %v5111_v1 = vld [vmem:[#allocation4_spill] sm:$0xff] }
 0x108   : > { %1866 = vst.msk [vmem:[#allocation3 + $0x58] sm:$0xff] %vm1854_vm4, %v1829_v22 }
 0x109   : > { %v1903_v47 = vpop.permute.xlu0 %1902  ;;  %1764 = vrot.lane.b32.xlu1 %v4571_v15, %s3384_s24  ;;  %v1878_v15 = vor.u32 %v1877_v62, %v1874_v39  ;;  %v2204_v62 = vrot.slane %v4692_v44, 5 }
 0x10a   : > { %1949 = vst.msk [vmem:[#allocation3 + $0x10] sm:$0xff] %vm1946_vm5, %v1903_v47 }
 0x10b   : > { %1750 = vrot.lane.b32.xlu0 %v4431_v41, %s3384_s24  ;;  %v1919_v38 = vpop.permute.xlu1 %1918  ;;  %v1879_v9 = vrot.slane %v1878_v15, 4  ;;  %v2206_v15 = vrot.slane %v2204_v62, 4 }
 0x10c   : > { %1957 = vst.msk [vmem:[#allocation3 + $0x50] sm:$0xff] %vm1946_vm5, %v1919_v38 }
 0x10d   : > { %v1905_v46 = vpop.permute.xlu0 %1904  ;;  %1766 = vrot.lane.b32.xlu1 %v4471_v49, %s3384_s24 }
 0x10e   : > { %1950 = vst.msk [vmem:[#allocation3 + $0x18] sm:$0xff] %vm1946_vm5, %v1905_v46  ;;  %v5112_v46 = vld [vmem:[#allocation7_spill] sm:$0xff] }
 0x10f   : > { %1818 = vrot.lane.b32.xlu0 %v4320_v60, %s3383_s23  ;;  %v1921_v31 = vpop.permute.xlu1 %1920  ;;  %v1889_v60 = vrot.slane %v1888_v14, 4  ;;  %v2207_v14 = vrot.slane %v943_v25, 5 }
 0x110   : > { %1958 = vst.msk [vmem:[#allocation3 + $0x58] sm:$0xff] %vm1946_vm5, %v1921_v31 }
 0x111   : > { %v1979_v36 = vpop.permute.xlu0 %1978  ;;  %1834 = vrot.lane.b32.xlu1 %v4393_v11, %s3383_s23  ;;  %v1884_v11 = vsel %vm3679_vm15, %v1879_v9, %v1883_v32  ;;  %v1894_v45 = vsel %vm3679_vm15, %v1889_v60, %v1893_v24  ;;  %v2208_v9 = vsel %vm3617_vm12, %v2206_v15, %v2207_v14 }
 0x112   : > { %2025 = vst.msk [vmem:[#allocation3 + $0x10] sm:$0xff] %vm2022_vm6, %v1979_v36  ;;  %v3174_v35 = vcombine.low %v1884_v11, %v1894_v45  ;;  %v5113_v11 = vld [vmem:[#allocation6_spill] sm:$0xff] }
 0x113   : > { %1820 = vrot.lane.b32.xlu0 %v4020_v28, %s3383_s23  ;;  %v1995_v8 = vpop.permute.xlu1 %1994 }
 0x114   : > { %2033 = vst.msk [vmem:[#allocation3 + $0x50] sm:$0xff] %vm2022_vm6, %v1995_v8 }
 0x115   : > { %v1981_v43 = vpop.permute.xlu0 %1980  ;;  %1836 = vrot.lane.b32.xlu1 %v3173_v6, %s3383_s23 }
 0x116   : > { %2026 = vst.msk [vmem:[#allocation3 + $0x18] sm:$0xff] %vm2022_vm6, %v1981_v43 }
 0x117   : > { %1910 = vrot.lane.b32.xlu0 %v4599_v56, %s3387_s27  ;;  %v1997_v21 = vpop.permute.xlu1 %1996 }
 0x118   : > { %2034 = vst.msk [vmem:[#allocation3 + $0x58] sm:$0xff] %vm2022_vm6, %v1997_v21 }
 0x119   : > { %v2049_v2 = vpop.permute.xlu0 %2048  ;;  %1926 = vrot.lane.b32.xlu1 %v4610_v51, %s3387_s27  ;;  %v2113_v51 = vshll.u32 %v4694_v53, 16 }
 0x11a   : > { %2095 = vst.msk [vmem:[#allocation3 + $0x10] sm:$0xff] %vm2092_vm2, %v2049_v2 }
 0x11b   : > { %1912 = vrot.lane.b32.xlu0 %v5109_v54, %s3387_s27  ;;  %v2065_v13 = vpop.permute.xlu1 %2064  ;;  %v2115_v33 = vrot.slane %v2113_v51, 5 }
 0x11c   : > { %2103 = vst.msk [vmem:[#allocation3 + $0x50] sm:$0xff] %vm2092_vm2, %v2065_v13 }
 0x11d   : > { %v2051_v56 = vpop.permute.xlu0 %2050  ;;  %1928 = vrot.lane.b32.xlu1 %v3174_v35, %s3387_s27 }
 0x11e   : > { %2096 = vst.msk [vmem:[#allocation3 + $0x18] sm:$0xff] %vm2092_vm2, %v2051_v56 }
 0x11f   : > { %1986 = vrot.lane.b32.xlu0 %v4431_v41, %s3385_s25  ;;  %v2067_v42 = vpop.permute.xlu1 %2066  ;;  %v3176_v41 = vcombine.low %v1967_v34, %v1970_v37 }
 0x120   : > { %2104 = vst.msk [vmem:[#allocation3 + $0x58] sm:$0xff] %vm2092_vm2, %v2067_v42 }
 0x121   : > { %v2141_v5 = vpop.permute.xlu0 %2140  ;;  %2002 = vrot.lane.b32.xlu1 %v4471_v49, %s3385_s25  ;;  %v2116_v49 = vor.u32 %v2115_v33, %v2112_v55 }
 0x122   : > { %2187 = vst.msk [vmem:[#allocation3 + $0x10] sm:$0xff] %vm2184_vm7, %v2141_v5 }
 0x123   : > { %1988 = vrot.lane.b32.xlu0 %v5110_v57, %s3385_s25  ;;  %v2157_v18 = vpop.permute.xlu1 %2156  ;;  %v2117_v61 = vrot.slane %v2116_v49, 4 }
 0x124   : > { %2195 = vst.msk [vmem:[#allocation3 + $0x50] sm:$0xff] %vm2184_vm7, %v2157_v18 }
 0x125   : > { %v2143_v27 = vpop.permute.xlu0 %2142  ;;  %2004 = vrot.lane.b32.xlu1 %v3176_v41, %s3385_s25  ;;  %v2122_v47 = vsel %vm3679_vm15, %v2117_v61, %v2121_v12 }
 0x126   : > { %2188 = vst.msk [vmem:[#allocation3 + $0x18] sm:$0xff] %vm2184_vm7, %v2143_v27 }
 0x127   : > { %2056 = vrot.lane.b32.xlu0 %v4020_v28, %s3388_s28  ;;  %v2159_v50 = vpop.permute.xlu1 %2158  ;;  %v2131_v28 = vrot.slane %v2129_v4, 5 }
 0x128   : > { %2196 = vst.msk [vmem:[#allocation3 + $0x58] sm:$0xff] %vm2184_vm7, %v2159_v50 }
 0x129   : > { %v2217_v17 = vpop.permute.xlu0 %2216  ;;  %2072 = vrot.lane.b32.xlu1 %v3173_v6, %s3388_s28  ;;  %v2132_v39 = vsel %vm3679_vm15, %v2127_v40, %v2131_v28  ;;  %v2205_v6 = vsel %vm3617_vm12, %v3179_v20, %v2204_v62 }
 0x12a   : > { %2263 = vst.msk [vmem:[#allocation3 + $0x10] sm:$0xff] %vm2260_vm8, %v2217_v17  ;;  %v3178_v10 = vcombine.low %v2122_v47, %v2132_v39  ;;  %v3180_v43 = vcombine.low %v2205_v6, %v2208_v9 }
 0x12b   : > { %2058 = vrot.lane.b32.xlu0 %v5111_v1, %s3388_s28  ;;  %v2233_v30 = vpop.permute.xlu1 %2232 }
 0x12c   : > { %2271 = vst.msk [vmem:[#allocation3 + $0x50] sm:$0xff] %vm2260_vm8, %v2233_v30 }
 0x12d   : > { %v1501_v22 = vpop.permute.xlu0 %1500  ;;  %2074 = vrot.lane.b32.xlu1 %v3177_v58, %s3388_s28 }
 0x12e   : > { %1545 = vst.msk [vmem:[#allocation3 + $0x20] sm:$0xff] %vm1540_vm1, %v1501_v22 }
 0x12f   : > { %2148 = vrot.lane.b32.xlu0 %v5109_v54, %s3389_s5  ;;  %v1517_v32 = vpop.permute.xlu1 %1516 }
 0x130   : > { %1553 = vst.msk [vmem:[#allocation3 + $0x60] sm:$0xff] %vm1540_vm1, %v1517_v32 }
 0x131   : > { %v2219_v59 = vpop.permute.xlu0 %2218  ;;  %v2279_v38 = vld [vmem:[#allocation3 + $0x10] sm:$0xff]  ;;  %2164 = vrot.lane.b32.xlu1 %v3174_v35, %s3389_s5 }
 0x132   : > { %2264 = vst.msk [vmem:[#allocation3 + $0x18] sm:$0xff] %vm2260_vm8, %v2219_v59  ;;  %3269 = vmatprep.mubr.msk.bf16.mxu0 %vm2313_vm9, %v2279_v38 }
 0x133   : > { %2150 = vrot.lane.b32.xlu0 %v5112_v46, %s3389_s5  ;;  %v2235_v7 = vpop.permute.xlu1 %2234  ;;  %v2287_v31 = vld [vmem:[#allocation3 + $0x50] sm:$0xff] }
 0x134   : > { %2272 = vst.msk [vmem:[#allocation3 + $0x58] sm:$0xff] %vm2260_vm8, %v2235_v7  ;;  %3285 = vmatprep.mubr.msk.bf16.mxu1 %vm2313_vm9, %v2287_v31 }
 0x135   : > { %v1503_v36 = vpop.permute.xlu0 %1502  ;;  %2166 = vrot.lane.b32.xlu1 %v3178_v10, %s3389_s5 }
 0x136   : > { %1546 = vst.msk [vmem:[#allocation3 + $0x28] sm:$0xff] %vm1540_vm1, %v1503_v36 }
 0x137   : > { %2224 = vrot.lane.b32.xlu0 %v5110_v57, %s3390_s8  ;;  %v1519_v60 = vpop.permute.xlu1 %1518 }
 0x138   : > { %1554 = vst.msk [vmem:[#allocation3 + $0x68] sm:$0xff] %vm1540_vm1, %v1519_v60 }
 0x139   : > { %v1745_v24 = vpop.permute.xlu0 %1744  ;;  %v2280_v8 = vld [vmem:[#allocation3 + $0x18] sm:$0xff]  ;;  %2240 = vrot.lane.b32.xlu1 %v3176_v41, %s3390_s8 }
 0x13a   : > { %1789 = vst.msk [vmem:[#allocation3 + $0x20] sm:$0xff] %vm1784_vm3, %v1745_v24  ;;  %3270 = vmatmul.mubr.msk.bf16.gmra.mrb[4].mxu0 %vm2313_vm9, %v2280_v8 }
 0x13b   : > { %2226 = vrot.lane.b32.xlu0 %v5113_v11, %s3390_s8  ;;  %v1761_v45 = vpop.permute.xlu1 %1760  ;;  %v2288_v63 = vld [vmem:[#allocation3 + $0x58] sm:$0xff] }
 0x13c   : > { %1797 = vst.msk [vmem:[#allocation3 + $0x60] sm:$0xff] %vm1784_vm3, %v1761_v45  ;;  %3286 = vmatmul.mubr.msk.bf16.gmra.mrb[4].mxu1 %vm2313_vm9, %v2288_v63 }
 0x13d   : > { %v1747_v23 = vpop.permute.xlu0 %1746  ;;  %2242 = vrot.lane.b32.xlu1 %v3180_v43, %s3390_s8 }
 0x13e   : > { %1790 = vst.msk [vmem:[#allocation3 + $0x28] sm:$0xff] %vm1784_vm3, %v1747_v23 }
 0x13f   : > { %v1763_v21 = vpop.permute.xlu1 %1762 }
 0x140   : > { %1798 = vst.msk [vmem:[#allocation3 + $0x68] sm:$0xff] %vm1784_vm3, %v1763_v21 }
 0x141   : > { %v1815_v2 = vpop.permute.xlu0 %1814 }
 0x142   : > { %1859 = vst.msk [vmem:[#allocation3 + $0x20] sm:$0xff] %vm1854_vm4, %v1815_v2  ;;  %v4832_v2 = vld [vmem:[%s5082_s2] ss:$0 sm:$0xff] }
 0x143   : > { %v1831_v35 = vpop.permute.xlu1 %1830 }
 0x144   : > { %1867 = vst.msk [vmem:[#allocation3 + $0x60] sm:$0xff] %vm1854_vm4, %v1831_v35 }
 0x145   : > { %v1817_v54 = vpop.permute.xlu0 %1816 }
 0x146   : > { %1860 = vst.msk [vmem:[#allocation3 + $0x28] sm:$0xff] %vm1854_vm4, %v1817_v54  ;;  %v4838_v54 = vld [vmem:[%s5083_s3] ss:$0 sm:$0xff] }
 0x147   : > { %v1833_v19 = vpop.permute.xlu1 %1832 }
 0x148   : > { %1868 = vst.msk [vmem:[#allocation3 + $0x68] sm:$0xff] %vm1854_vm4, %v1833_v19 }
 0x149   : > { %v1907_v16 = vpop.permute.xlu0 %1906 }
 0x14a   : > { %1951 = vst.msk [vmem:[#allocation3 + $0x20] sm:$0xff] %vm1946_vm5, %v1907_v16 }
 0x14b   : > { %v1923_v48 = vpop.permute.xlu1 %1922 }
 0x14c   : > { %1959 = vst.msk [vmem:[#allocation3 + $0x60] sm:$0xff] %vm1946_vm5, %v1923_v48 }
 0x14d   : > { %v1909_v44 = vpop.permute.xlu0 %1908 }
 0x14e   : > { %1952 = vst.msk [vmem:[#allocation3 + $0x28] sm:$0xff] %vm1946_vm5, %v1909_v44 }
 0x14f   : > { %v1925_v13 = vpop.permute.xlu1 %1924 }
 0x150   : > { %1960 = vst.msk [vmem:[#allocation3 + $0x68] sm:$0xff] %vm1946_vm5, %v1925_v13 }
 0x151   : > { %v1983_v53 = vpop.permute.xlu0 %1982 }
 0x152   : > { %2027 = vst.msk [vmem:[#allocation3 + $0x20] sm:$0xff] %vm2022_vm6, %v1983_v53 }
 0x153   : > { %v1999_v56 = vpop.permute.xlu1 %1998 }
 0x154   : > { %2035 = vst.msk [vmem:[#allocation3 + $0x60] sm:$0xff] %vm2022_vm6, %v1999_v56 }
 0x155   : > { %v1985_v0 = vpop.permute.xlu0 %1984 }
 0x156   : > { %2028 = vst.msk [vmem:[#allocation3 + $0x28] sm:$0xff] %vm2022_vm6, %v1985_v0 }
 0x157   : > { %v2001_v29 = vpop.permute.xlu1 %2000 }
 0x158   : > { %2036 = vst.msk [vmem:[#allocation3 + $0x68] sm:$0xff] %vm2022_vm6, %v2001_v29 }
 0x159   : > { %v2053_v34 = vpop.permute.xlu0 %2052 }
 0x15a   : > { %2097 = vst.msk [vmem:[#allocation3 + $0x20] sm:$0xff] %vm2092_vm2, %v2053_v34 }
 0x15b   : > { %v2069_v37 = vpop.permute.xlu1 %2068 }
 0x15c   : > { %2105 = vst.msk [vmem:[#allocation3 + $0x60] sm:$0xff] %vm2092_vm2, %v2069_v37 }
 0x15d   : > { %v2055_v26 = vpop.permute.xlu0 %2054 }
 0x15e   : > { %2098 = vst.msk [vmem:[#allocation3 + $0x28] sm:$0xff] %vm2092_vm2, %v2055_v26 }
 0x15f   : > { %v2071_v51 = vpop.permute.xlu1 %2070 }
 0x160   : > { %2106 = vst.msk [vmem:[#allocation3 + $0x68] sm:$0xff] %vm2092_vm2, %v2071_v51 }
 0x161   : > { %v2145_v42 = vpop.permute.xlu0 %2144 }
 0x162   : > { %2189 = vst.msk [vmem:[#allocation3 + $0x20] sm:$0xff] %vm2184_vm7, %v2145_v42 }
 0x163   : > { %v2161_v5 = vpop.permute.xlu1 %2160 }
 0x164   : > { %2197 = vst.msk [vmem:[#allocation3 + $0x60] sm:$0xff] %vm2184_vm7, %v2161_v5 }
 0x165   : > { %v2147_v41 = vpop.permute.xlu0 %2146 }
 0x166   : > { %2190 = vst.msk [vmem:[#allocation3 + $0x28] sm:$0xff] %vm2184_vm7, %v2147_v41 }
 0x167   : > { %v2163_v57 = vpop.permute.xlu1 %2162 }
 0x168   : > { %2198 = vst.msk [vmem:[#allocation3 + $0x68] sm:$0xff] %vm2184_vm7, %v2163_v57 }
 0x169   : > { %v2221_v55 = vpop.permute.xlu0 %2220 }
 0x16a   : > { %2265 = vst.msk [vmem:[#allocation3 + $0x20] sm:$0xff] %vm2260_vm8, %v2221_v55 }
 0x16b   : > { %v2237_v33 = vpop.permute.xlu1 %2236 }
 0x16c   : > { %2273 = vst.msk [vmem:[#allocation3 + $0x60] sm:$0xff] %vm2260_vm8, %v2237_v33 }
 0x16d   : > { %v1505_v12 = vpop.permute.xlu0 %1504 }
 0x16e   : > { %1547 = vst.msk [vmem:[#allocation3 + $0x30] sm:$0xff] %vm1540_vm1, %v1505_v12 }
 0x16f   : > { %v1521_v52 = vpop.permute.xlu1 %1520 }
 0x170   : > { %1555 = vst.msk [vmem:[#allocation3 + $0x70] sm:$0xff] %vm1540_vm1, %v1521_v52 }
 0x171   : > { %v2223_v18 = vpop.permute.xlu0 %2222  ;;  %v2281_v25 = vld [vmem:[#allocation3 + $0x20] sm:$0xff] }
 0x172   : > { %2266 = vst.msk [vmem:[#allocation3 + $0x28] sm:$0xff] %vm2260_vm8, %v2223_v18  ;;  %3273 = vmatprep.mubr.msk.bf16.mxu0 %vm2313_vm9, %v2281_v25 }
 0x173   : > { %v2239_v27 = vpop.permute.xlu1 %2238  ;;  %v2289_v49 = vld [vmem:[#allocation3 + $0x60] sm:$0xff] }
 0x174   : > { %2274 = vst.msk [vmem:[#allocation3 + $0x68] sm:$0xff] %vm2260_vm8, %v2239_v27  ;;  %3289 = vmatprep.mubr.msk.bf16.mxu1 %vm2313_vm9, %v2289_v49 }
 0x175   : > { %v1507_v3 = vpop.permute.xlu0 %1506 }
 0x176   : > { %1548 = vst.msk [vmem:[#allocation3 + $0x38] sm:$0xff] %vm1540_vm1, %v1507_v3 }
 0x177   : > { %v1523_v4 = vpop.permute.xlu1 %1522 }
 0x178   : > { %1556 = vst.msk [vmem:[#allocation3 + $0x78] sm:$0xff] %vm1540_vm1, %v1523_v4 }
 0x179   : > { %v1749_v50 = vpop.permute.xlu0 %1748  ;;  %v2282_v17 = vld [vmem:[#allocation3 + $0x28] sm:$0xff] }
 0x17a   : > { %1791 = vst.msk [vmem:[#allocation3 + $0x30] sm:$0xff] %vm1784_vm3, %v1749_v50  ;;  %3274 = vmatmul.mubr.msk.bf16.gmra.mrb[8].mxu0 %vm2313_vm9, %v2282_v17 }
 0x17b   : > { %v1765_v58 = vpop.permute.xlu1 %1764  ;;  %v2290_v1 = vld [vmem:[#allocation3 + $0x68] sm:$0xff] }
 0x17c   : > { %1799 = vst.msk [vmem:[#allocation3 + $0x70] sm:$0xff] %vm1784_vm3, %v1765_v58  ;;  %3290 = vmatmul.mubr.msk.bf16.gmra.mrb[8].mxu1 %vm2313_vm9, %v2290_v1 }
 0x17d   : > { %v1751_v61 = vpop.permute.xlu0 %1750 }
 0x17e   : > { %1792 = vst.msk [vmem:[#allocation3 + $0x38] sm:$0xff] %vm1784_vm3, %v1751_v61 }
 0x17f   : > { %v1767_v40 = vpop.permute.xlu1 %1766 }
 0x180   : > { %1800 = vst.msk [vmem:[#allocation3 + $0x78] sm:$0xff] %vm1784_vm3, %v1767_v40 }
 0x181   : > { %v1819_v28 = vpop.permute.xlu0 %1818 }
 0x182   : > { %1861 = vst.msk [vmem:[#allocation3 + $0x30] sm:$0xff] %vm1854_vm4, %v1819_v28 }
 0x183   : > { %v1835_v30 = vpop.permute.xlu1 %1834 }
 0x184   : > { %1869 = vst.msk [vmem:[#allocation3 + $0x70] sm:$0xff] %vm1854_vm4, %v1835_v30 }
 0x185   : > { %v1821_v22 = vpop.permute.xlu0 %1820 }
 0x186   : > { %1862 = vst.msk [vmem:[#allocation3 + $0x38] sm:$0xff] %vm1854_vm4, %v1821_v22 }
 0x187   : > { %v1837_v47 = vpop.permute.xlu1 %1836 }
 0x188   : > { %1870 = vst.msk [vmem:[#allocation3 + $0x78] sm:$0xff] %vm1854_vm4, %v1837_v47 }
 0x189   : > { %v1911_v39 = vpop.permute.xlu0 %1910 }
 0x18a   : > { %1953 = vst.msk [vmem:[#allocation3 + $0x30] sm:$0xff] %vm1946_vm5, %v1911_v39 }
 0x18b   : > { %v1927_v62 = vpop.permute.xlu1 %1926 }
 0x18c   : > { %1961 = vst.msk [vmem:[#allocation3 + $0x70] sm:$0xff] %vm1946_vm5, %v1927_v62 }
 0x18d   : > { %v1913_v32 = vpop.permute.xlu0 %1912 }
 0x18e   : > { %1954 = vst.msk [vmem:[#allocation3 + $0x38] sm:$0xff] %vm1946_vm5, %v1913_v32 }
 0x18f   : > { %v1929_v59 = vpop.permute.xlu1 %1928 }
 0x190   : > { %1962 = vst.msk [vmem:[#allocation3 + $0x78] sm:$0xff] %vm1946_vm5, %v1929_v59 }
 0x191   : > { %v1987_v38 = vpop.permute.xlu0 %1986 }
 0x192   : > { %2029 = vst.msk [vmem:[#allocation3 + $0x30] sm:$0xff] %vm2022_vm6, %v1987_v38 }
 0x193   : > { %v2003_v10 = vpop.permute.xlu1 %2002 }
 0x194   : > { %2037 = vst.msk [vmem:[#allocation3 + $0x70] sm:$0xff] %vm2022_vm6, %v2003_v10 }
 0x195   : > { %v1989_v46 = vpop.permute.xlu0 %1988 }
 0x196   : > { %2030 = vst.msk [vmem:[#allocation3 + $0x38] sm:$0xff] %vm2022_vm6, %v1989_v46 }
 0x197   : > { %v2005_v20 = vpop.permute.xlu1 %2004 }
 0x198   : > { %2038 = vst.msk [vmem:[#allocation3 + $0x78] sm:$0xff] %vm2022_vm6, %v2005_v20 }
 0x199   : > { %v2057_v15 = vpop.permute.xlu0 %2056 }
 0x19a   : > { %2099 = vst.msk [vmem:[#allocation3 + $0x30] sm:$0xff] %vm2092_vm2, %v2057_v15 }
 0x19b   : > { %v2073_v14 = vpop.permute.xlu1 %2072 }
 0x19c   : > { %2107 = vst.msk [vmem:[#allocation3 + $0x70] sm:$0xff] %vm2092_vm2, %v2073_v14 }
 0x19d   : > { %v2059_v7 = vpop.permute.xlu0 %2058 }
 0x19e   : > { %2100 = vst.msk [vmem:[#allocation3 + $0x38] sm:$0xff] %vm2092_vm2, %v2059_v7 }
 0x19f   : > { %v2075_v31 = vpop.permute.xlu1 %2074 }
 0x1a0   : > { %2108 = vst.msk [vmem:[#allocation3 + $0x78] sm:$0xff] %vm2092_vm2, %v2075_v31 }
 0x1a1   : > { %v2149_v36 = vpop.permute.xlu0 %2148 }
 0x1a2   : > { %2191 = vst.msk [vmem:[#allocation3 + $0x30] sm:$0xff] %vm2184_vm7, %v2149_v36 }
 0x1a3   : > { %v2165_v6 = vpop.permute.xlu1 %2164 }
 0x1a4   : > { %2199 = vst.msk [vmem:[#allocation3 + $0x70] sm:$0xff] %vm2184_vm7, %v2165_v6 }
 0x1a5   : > { %v2151_v9 = vpop.permute.xlu0 %2150 }
 0x1a6   : > { %2192 = vst.msk [vmem:[#allocation3 + $0x38] sm:$0xff] %vm2184_vm7, %v2151_v9 }
 0x1a7   : > { %v2167_v60 = vpop.permute.xlu1 %2166 }
 0x1a8   : > { %2200 = vst.msk [vmem:[#allocation3 + $0x78] sm:$0xff] %vm2184_vm7, %v2167_v60 }
 0x1a9   : > { %v2225_v24 = vpop.permute.xlu0 %2224 }
 0x1aa   : > { %2267 = vst.msk [vmem:[#allocation3 + $0x30] sm:$0xff] %vm2260_vm8, %v2225_v24 }
 0x1ab   : > { %v2241_v8 = vpop.permute.xlu1 %2240 }
 0x1ac   : > { %2275 = vst.msk [vmem:[#allocation3 + $0x70] sm:$0xff] %vm2260_vm8, %v2241_v8 }
 0x1ad   : > { %v2227_v43 = vpop.permute.xlu0 %2226 }
 0x1ae   : > { %2268 = vst.msk [vmem:[#allocation3 + $0x38] sm:$0xff] %vm2260_vm8, %v2227_v43 }
 0x1af   : > { %v2243_v11 = vpop.permute.xlu1 %2242 }
 0x1b0   : > { %2276 = vst.msk [vmem:[#allocation3 + $0x78] sm:$0xff] %vm2260_vm8, %v2243_v11 }
 0x1b1   : > { %v2283_v45 = vld [vmem:[#allocation3 + $0x30] sm:$0xff] }
 0x1b2   : > { %3277 = vmatprep.mubr.msk.bf16.mxu0 %vm2313_vm9, %v2283_v45 }
 0x1b3   : > { %v2291_v63 = vld [vmem:[#allocation3 + $0x70] sm:$0xff] }
 0x1b4   : > { %3293 = vmatprep.mubr.msk.bf16.mxu1 %vm2313_vm9, %v2291_v63 }
 0x1b5   : > { %v2284_v23 = vld [vmem:[#allocation3 + $0x38] sm:$0xff] }
 0x1b6   : > { %3278 = vmatmul.mubr.msk.bf16.gmra.mrb[12].mxu0 %vm2313_vm9, %v2284_v23 }
 0x1b7   : > { %v2292_v21 = vld [vmem:[#allocation3 + $0x78] sm:$0xff] }
 0x1b8   : > { %3294 = vmatmul.mubr.msk.bf16.gmra.mrb[12].mxu1 %vm2313_vm9, %v2292_v21 }
 0x1cd   : > { %v3267_v35 = vpop.f32.mrb[0].mxu0 }
 0x1ce   : > { %v2536_v19 = vadd.f32 %v3267_v35, %v4832_v2  ;;  %v2400_v16 = vpop.f32.mrb[1].mxu0 }
 0x1cf   : > { %v2534_v48 = vadd.f32 %v4832_v2, %v2400_v16  ;;  %v3268_v44 = vpop.f32.mrb[2].mxu0  ;;  %v3283_v56 = vpop.f32.mrb[0].mxu1 }
 0x1d0   : > { %vm2568_vm10 = vcmp.gt.f32.partialorder %v2536_v19, 0.0  ;;  %v2607_v13 = vmul.f32 %v4838_v54, %v2536_v19  ;;  %v2537_v53 = vadd.f32 %v3268_v44, %v4832_v2  ;;  %v2403_v0 = vpop.f32.mrb[3].mxu0  ;;  %v2552_v34 = vadd.f32 %v3283_v56, %v4832_v2  ;;  %v2464_v26 = vpop.f32.mrb[1].mxu1 }
 0x1d1   : > { %vm2566_vm12 = vcmp.gt.f32.partialorder %v2534_v48, 0.0  ;;  %v2605_v29 = vmul.f32 %v4838_v54, %v2534_v48  ;;  %v2535_v37 = vadd.f32 %v4832_v2, %v2403_v0  ;;  %v2550_v5 = vadd.f32 %v4832_v2, %v2464_v26  ;;  %v3284_v41 = vpop.f32.mrb[2].mxu1 }
 0x1d2   : > { %v2639_v51 = vsel %vm2568_vm10, %v2536_v19, %v2607_v13  ;;  %vm2569_vm13 = vcmp.gt.f32.partialorder %v2537_v53, 0.0  ;;  %v2608_v42 = vmul.f32 %v4838_v54, %v2537_v53  ;;  %vm2584_vm14 = vcmp.gt.f32.partialorder %v2552_v34, 0.0  ;;  %v2467_v33 = vpop.f32.mrb[3].mxu1 }
 0x1d3   : > { %2672 = vst.msk [vmem:[%s4845_s22 + $0x20] sm:$0xff] %vm2669_vm11, %v2639_v51  ;;  %v2637_v57 = vsel %vm2566_vm12, %v2534_v48, %v2605_v29  ;;  %v2623_v55 = vmul.f32 %v4838_v54, %v2552_v34  ;;  %vm2567_vm15 = vcmp.gt.f32.partialorder %v2535_v37, 0.0  ;;  %2880 = vrot.lane.b32.xlu0 %v2639_v51, %s3391_s15  ;;  %v2606_v52 = vmul.f32 %v4838_v54, %v2535_v37 }
 0x1d4   : > { %2670 = vst.msk [vmem:[%s4845_s22] sm:$0xff] %vm2669_vm11, %v2637_v57  ;;  %v2640_v12 = vsel %vm2569_vm13, %v2537_v53, %v2608_v42  ;;  %vm2582_vm0 = vcmp.gt.f32.partialorder %v2550_v5, 0.0  ;;  %v2621_v18 = vmul.f32 %v4838_v54, %v2550_v5  ;;  %v2553_v27 = vadd.f32 %v3284_v41, %v4832_v2 }
 0x1d5   : > { %2673 = vst.msk [vmem:[%s4845_s22 + $0x28] sm:$0xff] %vm2669_vm11, %v2640_v12  ;;  %v2655_v25 = vsel %vm2584_vm14, %v2552_v34, %v2623_v55  ;;  %v2551_v49 = vadd.f32 %v4832_v2, %v2467_v33  ;;  %2882 = vrot.lane.b32.xlu1 %v2640_v12, %s3391_s15  ;;  %v2638_v3 = vsel %vm2567_vm15, %v2535_v37, %v2606_v52 }
 0x1d6   : > { %2688 = vst.msk [vmem:[%s4845_s22 + $0x120] sm:$0xff] %vm2669_vm11, %v2655_v25  ;;  %v2653_v4 = vsel %vm2582_vm0, %v2550_v5, %v2621_v18  ;;  %2671 = vst.msk [vmem:[%s4845_s22 + $0x8] sm:$0xff] %vm2669_vm11, %v2638_v3  ;;  %vm2585_vm1 = vcmp.gt.f32.partialorder %v2553_v27, 0.0  ;;  %v2624_v50 = vmul.f32 %v4838_v54, %v2553_v27 }
 0x1d7   : > { %2686 = vst.msk [vmem:[%s4845_s22 + $0x100] sm:$0xff] %vm2669_vm11, %v2653_v4  ;;  %vm2583_vm3 = vcmp.gt.f32.partialorder %v2551_v49, 0.0  ;;  %v2622_v17 = vmul.f32 %v4838_v54, %v2551_v49  ;;  %2876 = vrot.lane.b32.xlu0 %v2637_v57, %s3391_s15 }
 0x1d8   : > { %v2656_v58 = vsel %vm2585_vm1, %v2553_v27, %v2624_v50 }
 0x1d9   : > { %v2654_v1 = vsel %vm2583_vm3, %v2551_v49, %v2622_v17  ;;  %2878 = vrot.lane.b32.xlu1 %v2638_v3, %s3391_s15  ;;  %2689 = vst.msk [vmem:[%s4845_s22 + $0x128] sm:$0xff] %vm2669_vm11, %v2656_v58 }
 0x1da   : > { %2687 = vst.msk [vmem:[%s4845_s22 + $0x108] sm:$0xff] %vm2669_vm11, %v2654_v1 }
 0x1db   : > { %2912 = vrot.lane.b32.xlu0 %v2655_v25, %s3391_s15 }
 0x1dd   : > { %2914 = vrot.lane.b32.xlu1 %v2656_v58, %s3391_s15 }
 0x1df   : > { %2908 = vrot.lane.b32.xlu0 %v2653_v4, %s3391_s15 }
 0x1e1   : > { %2910 = vrot.lane.b32.xlu1 %v2654_v1, %s3391_s15 }
 0x20d   : > { %v3271_v61 = vpop.f32.mrb[4].mxu0 }
 0x20e   : > { %v2540_v40 = vadd.f32 %v3271_v61, %v4832_v2  ;;  %v2416_v28 = vpop.f32.mrb[5].mxu0 }
 0x20f   : > { %v2538_v30 = vadd.f32 %v4832_v2, %v2416_v28  ;;  %v3272_v22 = vpop.f32.mrb[6].mxu0  ;;  %v3287_v62 = vpop.f32.mrb[4].mxu1 }
 0x210   : > { %vm2572_vm4 = vcmp.gt.f32.partialorder %v2540_v40, 0.0  ;;  %v2611_v47 = vmul.f32 %v4838_v54, %v2540_v40  ;;  %v2541_v39 = vadd.f32 %v3272_v22, %v4832_v2  ;;  %v2419_v32 = vpop.f32.mrb[7].mxu0  ;;  %v2556_v38 = vadd.f32 %v3287_v62, %v4832_v2  ;;  %v2480_v46 = vpop.f32.mrb[5].mxu1 }
 0x211   : > { %vm2570_vm5 = vcmp.gt.f32.partialorder %v2538_v30, 0.0  ;;  %v2609_v59 = vmul.f32 %v4838_v54, %v2538_v30  ;;  %v2539_v10 = vadd.f32 %v4832_v2, %v2419_v32  ;;  %v2554_v14 = vadd.f32 %v4832_v2, %v2480_v46  ;;  %v3288_v7 = vpop.f32.mrb[6].mxu1 }
 0x212   : > { %v2643_v20 = vsel %vm2572_vm4, %v2540_v40, %v2611_v47  ;;  %vm2573_vm6 = vcmp.gt.f32.partialorder %v2541_v39, 0.0  ;;  %v2612_v15 = vmul.f32 %v4838_v54, %v2541_v39  ;;  %vm2588_vm2 = vcmp.gt.f32.partialorder %v2556_v38, 0.0  ;;  %v2483_v6 = vpop.f32.mrb[7].mxu1 }
 0x213   : > { %2676 = vst.msk [vmem:[%s4845_s22 + $0x60] sm:$0xff] %vm2669_vm11, %v2643_v20  ;;  %v2641_v31 = vsel %vm2570_vm5, %v2538_v30, %v2609_v59  ;;  %v2627_v36 = vmul.f32 %v4838_v54, %v2556_v38  ;;  %vm2571_vm7 = vcmp.gt.f32.partialorder %v2539_v10, 0.0  ;;  %2888 = vrot.lane.b32.xlu0 %v2643_v20, %s3391_s15  ;;  %v2610_v60 = vmul.f32 %v4838_v54, %v2539_v10 }
 0x214   : > { %2674 = vst.msk [vmem:[%s4845_s22 + $0x40] sm:$0xff] %vm2669_vm11, %v2641_v31  ;;  %v2644_v9 = vsel %vm2573_vm6, %v2541_v39, %v2612_v15  ;;  %vm2586_vm8 = vcmp.gt.f32.partialorder %v2554_v14, 0.0  ;;  %v2625_v24 = vmul.f32 %v4838_v54, %v2554_v14  ;;  %v2557_v43 = vadd.f32 %v3288_v7, %v4832_v2 }
 0x215   : > { %2677 = vst.msk [vmem:[%s4845_s22 + $0x68] sm:$0xff] %vm2669_vm11, %v2644_v9  ;;  %v2659_v8 = vsel %vm2588_vm2, %v2556_v38, %v2627_v36  ;;  %v2555_v11 = vadd.f32 %v4832_v2, %v2483_v6  ;;  %2890 = vrot.lane.b32.xlu1 %v2644_v9, %s3391_s15  ;;  %v2642_v45 = vsel %vm2571_vm7, %v2539_v10, %v2610_v60 }
 0x216   : > { %2692 = vst.msk [vmem:[%s4845_s22 + $0x160] sm:$0xff] %vm2669_vm11, %v2659_v8  ;;  %v2657_v63 = vsel %vm2586_vm8, %v2554_v14, %v2625_v24  ;;  %2675 = vst.msk [vmem:[%s4845_s22 + $0x48] sm:$0xff] %vm2669_vm11, %v2642_v45  ;;  %vm2589_vm9 = vcmp.gt.f32.partialorder %v2557_v43, 0.0  ;;  %v2628_v23 = vmul.f32 %v4838_v54, %v2557_v43 }
 0x217   : > { %2690 = vst.msk [vmem:[%s4845_s22 + $0x140] sm:$0xff] %vm2669_vm11, %v2657_v63  ;;  %vm2587_vm10 = vcmp.gt.f32.partialorder %v2555_v11, 0.0  ;;  %v2626_v21 = vmul.f32 %v4838_v54, %v2555_v11  ;;  %2884 = vrot.lane.b32.xlu0 %v2641_v31, %s3391_s15 }
 0x218   : > { %v2660_v35 = vsel %vm2589_vm9, %v2557_v43, %v2628_v23 }
 0x219   : > { %v2658_v19 = vsel %vm2587_vm10, %v2555_v11, %v2626_v21  ;;  %2886 = vrot.lane.b32.xlu1 %v2642_v45, %s3391_s15  ;;  %2693 = vst.msk [vmem:[%s4845_s22 + $0x168] sm:$0xff] %vm2669_vm11, %v2660_v35 }
 0x21a   : > { %2691 = vst.msk [vmem:[%s4845_s22 + $0x148] sm:$0xff] %vm2669_vm11, %v2658_v19 }
 0x21b   : > { %2920 = vrot.lane.b32.xlu0 %v2659_v8, %s3391_s15 }
 0x21d   : > { %2922 = vrot.lane.b32.xlu1 %v2660_v35, %s3391_s15 }
 0x21f   : > { %2916 = vrot.lane.b32.xlu0 %v2657_v63, %s3391_s15 }
 0x221   : > { %2918 = vrot.lane.b32.xlu1 %v2658_v19, %s3391_s15 }
 0x245   : > { %v2881_v16 = vpop.permute.xlu0 %2880 }
 0x246   : > { %3206 = vst.msk [vmem:[%s4845_s22 + $0x30] sm:$0xff] %vm2669_vm11, %v2881_v16 }
 0x247   : > { %v2883_v48 = vpop.permute.xlu1 %2882 }
 0x248   : > { %3207 = vst.msk [vmem:[%s4845_s22 + $0x38] sm:$0xff] %vm2669_vm11, %v2883_v48 }
 0x249   : > { %v2877_v44 = vpop.permute.xlu0 %2876 }
 0x24a   : > { %3204 = vst.msk [vmem:[%s4845_s22 + $0x10] sm:$0xff] %vm2669_vm11, %v2877_v44 }
 0x24b   : > { %v2879_v13 = vpop.permute.xlu1 %2878 }
 0x24c   : > { %3205 = vst.msk [vmem:[%s4845_s22 + $0x18] sm:$0xff] %vm2669_vm11, %v2879_v13 }
 0x24d   : > { %v2913_v53 = vpop.permute.xlu0 %2912  ;;  %v3275_v56 = vpop.f32.mrb[8].mxu0 }
 0x24e   : > { %3222 = vst.msk [vmem:[%s4845_s22 + $0x130] sm:$0xff] %vm2669_vm11, %v2913_v53  ;;  %v2544_v0 = vadd.f32 %v3275_v56, %v4832_v2  ;;  %v2432_v29 = vpop.f32.mrb[9].mxu0 }
 0x24f   : > { %v2542_v34 = vadd.f32 %v4832_v2, %v2432_v29  ;;  %v2915_v37 = vpop.permute.xlu1 %2914  ;;  %v3276_v26 = vpop.f32.mrb[10].mxu0 }
 0x250   : > { %vm2576_vm12 = vcmp.gt.f32.partialorder %v2544_v0, 0.0  ;;  %v2615_v51 = vmul.f32 %v4838_v54, %v2544_v0  ;;  %v3291_v42 = vpop.f32.mrb[8].mxu1  ;;  %3223 = vst.msk [vmem:[%s4845_s22 + $0x138] sm:$0xff] %vm2669_vm11, %v2915_v37  ;;  %v2545_v5 = vadd.f32 %v3276_v26, %v4832_v2  ;;  %v2435_v41 = vpop.f32.mrb[11].mxu0 }
 0x251   : > { %vm2574_vm13 = vcmp.gt.f32.partialorder %v2542_v34, 0.0  ;;  %v2613_v57 = vmul.f32 %v4838_v54, %v2542_v34  ;;  %v2560_v55 = vadd.f32 %v3291_v42, %v4832_v2  ;;  %v2543_v33 = vadd.f32 %v4832_v2, %v2435_v41  ;;  %v2496_v12 = vpop.f32.mrb[9].mxu1  ;;  %v2909_v52 = vpop.permute.xlu0 %2908 }
 0x252   : > { %v2647_v18 = vsel %vm2576_vm12, %v2544_v0, %v2615_v51  ;;  %vm2577_vm14 = vcmp.gt.f32.partialorder %v2545_v5, 0.0  ;;  %v2616_v25 = vmul.f32 %v4838_v54, %v2545_v5  ;;  %v2558_v27 = vadd.f32 %v4832_v2, %v2496_v12  ;;  %v3292_v49 = vpop.f32.mrb[10].mxu1  ;;  %3220 = vst.msk [vmem:[%s4845_s22 + $0x110] sm:$0xff] %vm2669_vm11, %v2909_v52 }
 0x253   : > { %2680 = vst.msk [vmem:[%s4845_s22 + $0xa0] sm:$0xff] %vm2669_vm11, %v2647_v18  ;;  %v2645_v3 = vsel %vm2574_vm13, %v2542_v34, %v2613_v57  ;;  %vm2592_vm15 = vcmp.gt.f32.partialorder %v2560_v55, 0.0  ;;  %v2631_v4 = vmul.f32 %v4838_v54, %v2560_v55  ;;  %vm2575_vm0 = vcmp.gt.f32.partialorder %v2543_v33, 0.0  ;;  %v2499_v50 = vpop.f32.mrb[11].mxu1  ;;  %v2911_v17 = vpop.permute.xlu1 %2910  ;;  %2896 = vrot.lane.b32.xlu0 %v2647_v18, %s3391_s15 }
 0x254   : > { %2678 = vst.msk [vmem:[%s4845_s22 + $0x80] sm:$0xff] %vm2669_vm11, %v2645_v3  ;;  %v2648_v58 = vsel %vm2577_vm14, %v2545_v5, %v2616_v25  ;;  %v2614_v1 = vmul.f32 %v4838_v54, %v2543_v33  ;;  %vm2590_vm1 = vcmp.gt.f32.partialorder %v2558_v27, 0.0  ;;  %v2629_v61 = vmul.f32 %v4838_v54, %v2558_v27  ;;  %3221 = vst.msk [vmem:[%s4845_s22 + $0x118] sm:$0xff] %vm2669_vm11, %v2911_v17 }
 0x255   : > { %v2663_v40 = vsel %vm2592_vm15, %v2560_v55, %v2631_v4  ;;  %2681 = vst.msk [vmem:[%s4845_s22 + $0xa8] sm:$0xff] %vm2669_vm11, %v2648_v58  ;;  %v2561_v28 = vadd.f32 %v3292_v49, %v4832_v2  ;;  %v2559_v30 = vadd.f32 %v4832_v2, %v2499_v50  ;;  %2898 = vrot.lane.b32.xlu1 %v2648_v58, %s3391_s15 }
 0x256   : > { %2696 = vst.msk [vmem:[%s4845_s22 + $0x1a0] sm:$0xff] %vm2669_vm11, %v2663_v40  ;;  %v2646_v22 = vsel %vm2575_vm0, %v2543_v33, %v2614_v1  ;;  %v2661_v47 = vsel %vm2590_vm1, %v2558_v27, %v2629_v61 }
 0x257   : > { %2679 = vst.msk [vmem:[%s4845_s22 + $0x88] sm:$0xff] %vm2669_vm11, %v2646_v22  ;;  %2694 = vst.msk [vmem:[%s4845_s22 + $0x180] sm:$0xff] %vm2669_vm11, %v2661_v47  ;;  %vm2593_vm3 = vcmp.gt.f32.partialorder %v2561_v28, 0.0  ;;  %v2632_v39 = vmul.f32 %v4838_v54, %v2561_v28  ;;  %vm2591_vm4 = vcmp.gt.f32.partialorder %v2559_v30, 0.0  ;;  %v2630_v62 = vmul.f32 %v4838_v54, %v2559_v30  ;;  %2892 = vrot.lane.b32.xlu0 %v2645_v3, %s3391_s15 }
 0x259   : > { %v2664_v32 = vsel %vm2593_vm3, %v2561_v28, %v2632_v39  ;;  %v2662_v59 = vsel %vm2591_vm4, %v2559_v30, %v2630_v62  ;;  %2894 = vrot.lane.b32.xlu1 %v2646_v22, %s3391_s15 }
 0x25a   : > { %2697 = vst.msk [vmem:[%s4845_s22 + $0x1a8] sm:$0xff] %vm2669_vm11, %v2664_v32  ;;  %2695 = vst.msk [vmem:[%s4845_s22 + $0x188] sm:$0xff] %vm2669_vm11, %v2662_v59 }
 0x25b   : > { %2928 = vrot.lane.b32.xlu0 %v2663_v40, %s3391_s15 }
 0x25d   : > { %2930 = vrot.lane.b32.xlu1 %v2664_v32, %s3391_s15 }
 0x25f   : > { %2924 = vrot.lane.b32.xlu0 %v2661_v47, %s3391_s15 }
 0x261   : > { %2926 = vrot.lane.b32.xlu1 %v2662_v59, %s3391_s15 }
 0x285   : > { %v2889_v38 = vpop.permute.xlu0 %2888 }
 0x286   : > { %3210 = vst.msk [vmem:[%s4845_s22 + $0x70] sm:$0xff] %vm2669_vm11, %v2889_v38 }
 0x287   : > { %v2891_v10 = vpop.permute.xlu1 %2890 }
 0x288   : > { %3211 = vst.msk [vmem:[%s4845_s22 + $0x78] sm:$0xff] %vm2669_vm11, %v2891_v10 }
 0x289   : > { %v2885_v46 = vpop.permute.xlu0 %2884  ;;  %v3279_v20 = vpop.f32.mrb[12].mxu0 }
 0x28a   : > { %3208 = vst.msk [vmem:[%s4845_s22 + $0x50] sm:$0xff] %vm2669_vm11, %v2885_v46  ;;  %v2548_v15 = vadd.f32 %v3279_v20, %v4832_v2  ;;  %v2448_v14 = vpop.f32.mrb[13].mxu0 }
 0x28b   : > { %v2546_v7 = vadd.f32 %v4832_v2, %v2448_v14  ;;  %v2887_v31 = vpop.permute.xlu1 %2886  ;;  %v3280_v36 = vpop.f32.mrb[14].mxu0 }
 0x28c   : > { %vm2580_vm5 = vcmp.gt.f32.partialorder %v2548_v15, 0.0  ;;  %v2619_v6 = vmul.f32 %v4838_v54, %v2548_v15  ;;  %v3295_v9 = vpop.f32.mrb[12].mxu1  ;;  %3209 = vst.msk [vmem:[%s4845_s22 + $0x58] sm:$0xff] %vm2669_vm11, %v2887_v31  ;;  %v2549_v60 = vadd.f32 %v3280_v36, %v4832_v2  ;;  %v2451_v24 = vpop.f32.mrb[15].mxu0 }
 0x28d   : > { %vm2578_vm6 = vcmp.gt.f32.partialorder %v2546_v7, 0.0  ;;  %v2617_v8 = vmul.f32 %v4838_v54, %v2546_v7  ;;  %v2564_v43 = vadd.f32 %v3295_v9, %v4832_v2  ;;  %v2547_v11 = vadd.f32 %v4832_v2, %v2451_v24  ;;  %v2512_v45 = vpop.f32.mrb[13].mxu1  ;;  %v2921_v63 = vpop.permute.xlu0 %2920 }
 0x28e   : > { %v2651_v23 = vsel %vm2580_vm5, %v2548_v15, %v2619_v6  ;;  %vm2581_vm2 = vcmp.gt.f32.partialorder %v2549_v60, 0.0  ;;  %v2620_v21 = vmul.f32 %v4838_v54, %v2549_v60  ;;  %v2562_v35 = vadd.f32 %v4832_v2, %v2512_v45  ;;  %v3296_v19 = vpop.f32.mrb[14].mxu1  ;;  %3226 = vst.msk [vmem:[%s4845_s22 + $0x170] sm:$0xff] %vm2669_vm11, %v2921_v63 }
 0x28f   : > { %2684 = vst.msk [vmem:[%s4845_s22 + $0xe0] sm:$0xff] %vm2669_vm11, %v2651_v23  ;;  %v2649_v16 = vsel %vm2578_vm6, %v2546_v7, %v2617_v8  ;;  %vm2596_vm7 = vcmp.gt.f32.partialorder %v2564_v43, 0.0  ;;  %v2635_v48 = vmul.f32 %v4838_v54, %v2564_v43  ;;  %vm2579_vm8 = vcmp.gt.f32.partialorder %v2547_v11, 0.0  ;;  %v2515_v44 = vpop.f32.mrb[15].mxu1  ;;  %v2923_v13 = vpop.permute.xlu1 %2922  ;;  %2904 = vrot.lane.b32.xlu0 %v2651_v23, %s3391_s15 }
 0x290   : > { %2682 = vst.msk [vmem:[%s4845_s22 + $0xc0] sm:$0xff] %vm2669_vm11, %v2649_v16  ;;  %v2652_v53 = vsel %vm2581_vm2, %v2549_v60, %v2620_v21  ;;  %v2618_v56 = vmul.f32 %v4838_v54, %v2547_v11  ;;  %vm2594_vm9 = vcmp.gt.f32.partialorder %v2562_v35, 0.0  ;;  %v2633_v0 = vmul.f32 %v4838_v54, %v2562_v35  ;;  %3227 = vst.msk [vmem:[%s4845_s22 + $0x178] sm:$0xff] %vm2669_vm11, %v2923_v13 }
 0x291   : > { %v2667_v29 = vsel %vm2596_vm7, %v2564_v43, %v2635_v48  ;;  %2685 = vst.msk [vmem:[%s4845_s22 + $0xe8] sm:$0xff] %vm2669_vm11, %v2652_v53  ;;  %v2565_v34 = vadd.f32 %v3296_v19, %v4832_v2  ;;  %v2563_v37 = vadd.f32 %v4832_v2, %v2515_v44  ;;  %v2917_v26 = vpop.permute.xlu0 %2916  ;;  %2906 = vrot.lane.b32.xlu1 %v2652_v53, %s3391_s15 }
 0x292   : > { %2700 = vst.msk [vmem:[%s4845_s22 + $0x1e0] sm:$0xff] %vm2669_vm11, %v2667_v29  ;;  %v2650_v51 = vsel %vm2579_vm8, %v2547_v11, %v2618_v56  ;;  %v2665_v42 = vsel %vm2594_vm9, %v2562_v35, %v2633_v0  ;;  %3224 = vst.msk [vmem:[%s4845_s22 + $0x150] sm:$0xff] %vm2669_vm11, %v2917_v26 }
 0x293   : > { %2683 = vst.msk [vmem:[%s4845_s22 + $0xc8] sm:$0xff] %vm2669_vm11, %v2650_v51  ;;  %2698 = vst.msk [vmem:[%s4845_s22 + $0x1c0] sm:$0xff] %vm2669_vm11, %v2665_v42  ;;  %vm2597_vm10 = vcmp.gt.f32.partialorder %v2565_v34, 0.0  ;;  %v2636_v5 = vmul.f32 %v4838_v54, %v2565_v34  ;;  %vm2595_vm12 = vcmp.gt.f32.partialorder %v2563_v37, 0.0  ;;  %v2634_v2 = vmul.f32 %v4838_v54, %v2563_v37  ;;  %v2919_v41 = vpop.permute.xlu1 %2918  ;;  %2900 = vrot.lane.b32.xlu0 %v2649_v16, %s3391_s15 }
 0x294   : > { %3225 = vst.msk [vmem:[%s4845_s22 + $0x158] sm:$0xff] %vm2669_vm11, %v2919_v41 }
 0x295   : > { %v2668_v57 = vsel %vm2597_vm10, %v2565_v34, %v2636_v5  ;;  %v2666_v55 = vsel %vm2595_vm12, %v2563_v37, %v2634_v2  ;;  %2902 = vrot.lane.b32.xlu1 %v2650_v51, %s3391_s15 }
 0x296   : > { %2701 = vst.msk [vmem:[%s4845_s22 + $0x1e8] sm:$0xff] %vm2669_vm11, %v2668_v57  ;;  %2699 = vst.msk [vmem:[%s4845_s22 + $0x1c8] sm:$0xff] %vm2669_vm11, %v2666_v55 }
 0x297   : > { %2932 = vrot.lane.b32.xlu0 %v2665_v42, %s3391_s15 }
 0x299   : > { %2934 = vrot.lane.b32.xlu1 %v2666_v55, %s3391_s15 }
 0x29b   : > { %2936 = vrot.lane.b32.xlu0 %v2667_v29, %s3391_s15 }
 0x29d   : > { %2938 = vrot.lane.b32.xlu1 %v2668_v57, %s3391_s15 }
 0x2c5   : > { %v2897_v54 = vpop.permute.xlu0 %2896 }
 0x2c6   : > { %3214 = vst.msk [vmem:[%s4845_s22 + $0xb0] sm:$0xff] %vm2669_vm11, %v2897_v54 }
 0x2c7   : > { %v2899_v33 = vpop.permute.xlu1 %2898 }
 0x2c8   : > { %3215 = vst.msk [vmem:[%s4845_s22 + $0xb8] sm:$0xff] %vm2669_vm11, %v2899_v33 }
 0x2c9   : > { %v2893_v12 = vpop.permute.xlu0 %2892 }
 0x2ca   : > { %3212 = vst.msk [vmem:[%s4845_s22 + $0x90] sm:$0xff] %vm2669_vm11, %v2893_v12 }
 0x2cb   : > { %v2895_v52 = vpop.permute.xlu1 %2894 }
 0x2cc   : > { %3213 = vst.msk [vmem:[%s4845_s22 + $0x98] sm:$0xff] %vm2669_vm11, %v2895_v52 }
 0x2cd   : > { %v2929_v18 = vpop.permute.xlu0 %2928 }
 0x2ce   : > { %3230 = vst.msk [vmem:[%s4845_s22 + $0x1b0] sm:$0xff] %vm2669_vm11, %v2929_v18 }
 0x2cf   : > { %v2931_v25 = vpop.permute.xlu1 %2930 }
 0x2d0   : > { %3231 = vst.msk [vmem:[%s4845_s22 + $0x1b8] sm:$0xff] %vm2669_vm11, %v2931_v25 }
 0x2d1   : > { %v2925_v27 = vpop.permute.xlu0 %2924 }
 0x2d2   : > { %3228 = vst.msk [vmem:[%s4845_s22 + $0x190] sm:$0xff] %vm2669_vm11, %v2925_v27 }
 0x2d3   : > { %v2927_v49 = vpop.permute.xlu1 %2926 }
 0x2d4   : > { %3229 = vst.msk [vmem:[%s4845_s22 + $0x198] sm:$0xff] %vm2669_vm11, %v2927_v49 }
 0x301   : > { %v2905_v3 = vpop.permute.xlu0 %2904 }
 0x302   : > { %3218 = vst.msk [vmem:[%s4845_s22 + $0xf0] sm:$0xff] %vm2669_vm11, %v2905_v3 }
 0x303   : > { %v2907_v4 = vpop.permute.xlu1 %2906 }
 0x304   : > { %3219 = vst.msk [vmem:[%s4845_s22 + $0xf8] sm:$0xff] %vm2669_vm11, %v2907_v4 }
 0x305   : > { %v2901_v50 = vpop.permute.xlu0 %2900 }
 0x306   : > { %3216 = vst.msk [vmem:[%s4845_s22 + $0xd0] sm:$0xff] %vm2669_vm11, %v2901_v50 }
 0x307   : > { %v2903_v17 = vpop.permute.xlu1 %2902 }
 0x308   : > { %3217 = vst.msk [vmem:[%s4845_s22 + $0xd8] sm:$0xff] %vm2669_vm11, %v2903_v17 }
 0x309   : > { %v2933_v58 = vpop.permute.xlu0 %2932 }
 0x30a   : > { %3232 = vst.msk [vmem:[%s4845_s22 + $0x1d0] sm:$0xff] %vm2669_vm11, %v2933_v58 }
 0x30b   : > { %v2935_v1 = vpop.permute.xlu1 %2934 }
 0x30c   : > { %3233 = vst.msk [vmem:[%s4845_s22 + $0x1d8] sm:$0xff] %vm2669_vm11, %v2935_v1 }
 0x30d   : > { %v2937_v61 = vpop.permute.xlu0 %2936 }
 0x30e   : > { %3234 = vst.msk [vmem:[%s4845_s22 + $0x1f0] sm:$0xff] %vm2669_vm11, %v2937_v61 }
 0x30f   : > { %v2939_v40 = vpop.permute.xlu1 %2938 }
 0x310   : > { %3235 = vst.msk [vmem:[%s4845_s22 + $0x1f8] sm:$0xff] %vm2669_vm11, %v2939_v40 }
 0x311 PF: > { %s14_s17 = sadd.s32 1, %s3380_s17   ;;  %s5114_s15 = smov %s3376_s16 }
 0x312   : > { %p11_p5 = scmp.ge.s32.totalorder %s14_s17, 4   ;;  %s5115_s16 = smov %s5117_s18 }
 0x314   :  { %13 = sbr.rel (!%p11_p5) target bundleno = 2 (0x2), region = 72 }

</bundles_post_ra>
